<compile_context>
chip_gen: v6e
topology: v6e:2x2x1
jax: 0.10.0
libtpu: 0.0.40
codegen_flags: <defaults>
</compile_context>

<pallas_src>
import jax
import jax.numpy as jnp
from jax.experimental import pallas as pl
from jax.experimental.pallas import tpu as pltpu


def _round_up(x, m):
    return ((x + m - 1) // m) * m


# ------------------- fused encoder + decoder matmul kernel -------------------

def _encdec_kernel(x_ref, ew_ref, eb_ref, dw_ref, db_ref, o_ref):
    # x: (tm, 192) patches, ew: (192, 16), dw: (16, 192)
    feat = jnp.dot(x_ref[...], ew_ref[...], preferred_element_type=jnp.float32)
    feat = feat + eb_ref[...]
    dec = jnp.dot(feat, dw_ref[...], preferred_element_type=jnp.float32)
    o_ref[...] = (dec + db_ref[...]).astype(o_ref.dtype)


def pallas_encoder_decoder(patches, enc_w, enc_b, dec_w, dec_b, tile_m=512):
    M, K = patches.shape
    Kf = enc_w.shape[1]           # 16
    Nf = dec_w.shape[1]           # 192
    assert enc_w.shape == (K, Kf) and dec_w.shape == (Kf, Nf)

    tm = min(tile_m, _round_up(M, 8))
    Mp = _round_up(M, tm)
    if Mp != M:
        patches = jnp.pad(patches, ((0, Mp - M), (0, 0)))   # zero rows, sliced off below

    flops = 2 * Mp * K * Kf + 2 * Mp * Kf * Nf
    bytes_accessed = 4 * (Mp * K + Mp * Nf + K * Kf + Kf * Nf + Kf + Nf)

    out = pl.pallas_call(
        _encdec_kernel,
        out_shape=jax.ShapeDtypeStruct((Mp, Nf), patches.dtype),
        grid=(Mp // tm,),
        in_specs=[
            pl.BlockSpec((tm, K), lambda i: (i, 0)),          # row tile of patches
            pl.BlockSpec((K, Kf), lambda i: (0, 0)),          # weights resident
            pl.BlockSpec((1, Kf), lambda i: (0, 0)),
            pl.BlockSpec((Kf, Nf), lambda i: (0, 0)),
            pl.BlockSpec((1, Nf), lambda i: (0, 0)),
        ],
        out_specs=pl.BlockSpec((tm, Nf), lambda i: (i, 0)),
        compiler_params=pltpu.CompilerParams(
            dimension_semantics=("parallel",),
            vmem_limit_bytes=32 * 1024 * 1024,
        ),
        cost_estimate=pl.CostEstimate(
            flops=int(flops), transcendentals=0, bytes_accessed=int(bytes_accessed)),
    )(patches, enc_w, enc_b, dec_w, dec_b)
    return out[:M]


# ------------------------ fused refine chain kernel --------------------------

def _refine_fused_kernel(rec_ref, w2_ref, b2_ref, w1_ref, b1_ref, o_ref,
                         pad_x, pad_t):
    # rec_ref / o_ref: (C, H, W) for one batch element, W on lanes.
    # w*_ref: (81,) f32 in SMEM, flattened as [c_out, c_in, kh, kw].
    # b*_ref: (C,) f32 in SMEM.
    # pad_x / pad_t: VMEM scratch (C, H+2, W+2) zero-padded halo buffers.
    C, H, W = o_ref.shape

    def conv3x3(pad_ref, w_ref, b_ref):
        accs = [jnp.zeros((H, W), jnp.float32) + b_ref[co] for co in range(C)]
        for ci in range(C):
            for kh in range(3):
                for kw in range(3):
                    sh = pad_ref[ci, kh:kh + H, kw:kw + W]     # shifted plane (H, W)
                    for co in range(C):
                        wv = w_ref[(co * C + ci) * 9 + kh * 3 + kw]
                        accs[co] = accs[co] + wv * sh
        return accs

    # stage 1: t = relu(refine2(rec)), zero padding 1
    pad_x[...] = jnp.zeros_like(pad_x)
    pad_x[:, 1:H + 1, 1:W + 1] = rec_ref[...]
    t = conv3x3(pad_x, w2_ref, b2_ref)

    pad_t[...] = jnp.zeros_like(pad_t)
    for co in range(C):
        pad_t[co, 1:H + 1, 1:W + 1] = jnp.maximum(t[co], 0.0)

    # stage 2: out = rec + refine1(t), zero padding 1
    out = conv3x3(pad_t, w1_ref, b1_ref)
    for co in range(C):
        o_ref[co, :, :] = (rec_ref[co, :, :] + out[co]).astype(o_ref.dtype)


def pallas_refine(rec, w2_flat, b2, w1_flat, b1):
    N, C, H, W = rec.shape
    assert C == 3
    smem = pl.BlockSpec(memory_space=pltpu.MemorySpace.SMEM)
    img_spec = pl.BlockSpec((None, C, H, W), lambda n: (n, 0, 0, 0))
    return pl.pallas_call(
        _refine_fused_kernel,
        out_shape=jax.ShapeDtypeStruct((N, C, H, W), rec.dtype),
        grid=(N,),
        in_specs=[img_spec, smem, smem, smem, smem],
        out_specs=img_spec,
        scratch_shapes=[pltpu.VMEM((C, H + 2, W + 2), jnp.float32),
                        pltpu.VMEM((C, H + 2, W + 2), jnp.float32)],
        input_output_aliases={0: 0},     # write refine over the rec buffer
        compiler_params=pltpu.CompilerParams(dimension_semantics=("parallel",)),
    )(rec, w2_flat, b2, w1_flat, b1)


# ------------------------------ JAX-side glue --------------------------------

def reflection_pad2d(x, p):
    return jnp.pad(x, ((0, 0), (0, 0), (p, p), (p, p)), mode="reflect")


def extract_stride8_patches(x):
    """Non-overlapping 8x8 patches (Conv2d k=8 s=8 im2col), column order (c, kh, kw)."""
    N, C, H, W = x.shape
    oh, ow = H // 8, W // 8
    x = x.reshape(N, C, oh, 8, ow, 8)
    x = x.transpose(0, 2, 4, 1, 3, 5)          # (N, oh, ow, C, 8, 8)
    return x.reshape(N * oh * ow, C * 64), (N, oh, ow)


def pixel_shuffle_from_flat(y, N, oh, ow, c_out, r):
    """PixelShuffle(r) on flat 1x1-conv output; channel index = c*r*r + a*r + b."""
    y = y.reshape(N, oh, ow, c_out, r, r)       # (N, i, j, c, a, b)
    y = y.transpose(0, 3, 1, 4, 2, 5)           # (N, c, i, a, j, b)
    return y.reshape(N, c_out, oh * r, ow * r)


# -------------------------- parameter construction ---------------------------

def _conv_init(key, out_c, in_c, kh, kw):
    fan_in = in_c * kh * kw
    k = 1.0 / jnp.sqrt(jnp.float32(fan_in))
    kw_, kb_ = jax.random.split(key)
    w = jax.random.uniform(kw_, (out_c, in_c, kh, kw), jnp.float32, -k, k)
    b = jax.random.uniform(kb_, (out_c,), jnp.float32, -k, k)
    return w, b


def init_params(key):
    k_enc, k_dec, k_r1, k_r2 = jax.random.split(key, 4)
    enc_w, enc_b = _conv_init(k_enc, 16, 3, 8, 8)          # Conv2d(3, 16, k=8, s=8)
    dec_w, dec_b = _conv_init(k_dec, 8 * 8 * 3, 16, 1, 1)  # Conv2d(16, 192, k=1)
    r1_w, r1_b = _conv_init(k_r1, 3, 3, 3, 3)              # refine1
    r2_w, r2_b = _conv_init(k_r2, 3, 3, 3, 3)              # refine2
    return {
        "enc_w": enc_w.reshape(16, 3 * 64).T,              # (192, 16)
        "enc_b": enc_b.reshape(1, 16),
        "dec_w": dec_w.reshape(192, 16).T,                 # (16, 192)
        "dec_b": dec_b.reshape(1, 192),
        "ref1_w": r1_w.reshape(-1),                        # (81,) [co, ci, kh, kw]
        "ref1_b": r1_b,                                    # (3,)
        "ref2_w": r2_w.reshape(-1),                        # (81,)
        "ref2_b": r2_b,                                    # (3,)
    }


# ---------------------------------- forward ----------------------------------

@jax.jit
def model_ae_forward(params, x):
    # x: NCHW (N, 3, H, W), H and W divisible by 8
    padx = reflection_pad2d(x, 4)                                   # (N, 3, H+8, W+8)

    # fused encoder (k=8 s=8 patch matmul) + decoder (1x1 conv) on the MXU
    patches, (N, oh, ow) = extract_stride8_patches(padx)            # (N*oh*ow, 192)
    dec = pallas_encoder_decoder(patches, params["enc_w"], params["enc_b"],
                                 params["dec_w"], params["dec_b"])  # (N*oh*ow, 192)
    rec = pixel_shuffle_from_flat(dec, N, oh, ow, 3, 8)             # (N, 3, 8*oh, 8*ow)

    # fused refine: rec + refine1(relu(refine2(rec)))
    refine = pallas_refine(rec, params["ref2_w"], params["ref2_b"],
                           params["ref1_w"], params["ref1_b"])

    # crop back to the original spatial size
    return refine[:, :, 4:-4, 4:-4]


# ------------------------------------ main ------------------------------------

if __name__ == "__main__":
    key = jax.random.PRNGKey(0)
    k_param, k_x = jax.random.split(key)

    params = init_params(k_param)
    x = jax.random.normal(k_x, (2, 3, 16, 16), jnp.float32)   # NCHW, like PyTorch

    out = model_ae_forward(params, x)
    out = jax.block_until_ready(out)

    assert out.shape == (2, 3, 16, 16), out.shape
    assert out.dtype == jnp.float32
    print("KERNEL_OK")
</pallas_src>

<mosaic_0001>
module attributes {stable_mosaic.version = 11 : i64} {
  func.func @_encdec_kernel(%arg0: i32, %arg1: memref<24x192xf32, #tpu.memory_space<vmem>>, %arg2: memref<192x16xf32, #tpu.memory_space<vmem>>, %arg3: memref<1x16xf32, #tpu.memory_space<vmem>>, %arg4: memref<16x192xf32, #tpu.memory_space<vmem>>, %arg5: memref<1x192xf32, #tpu.memory_space<vmem>>, %arg6: memref<24x192xf32, #tpu.memory_space<vmem>>) attributes {dimension_semantics = [#tpu.dimension_semantics<parallel>], iteration_bounds = array<i64: 1>, scalar_prefetch = 0 : i64, scratch_operands = 0 : i64, tpu.core_type = #tpu.core_type<tc>, window_params = [{transform_indices = @transform_0, window_bounds = array<i64: 24, 192>}, {pipeline_mode = #tpu.pipeline_mode<synchronous>, transform_indices = @transform_1, window_bounds = array<i64: 192, 16>}, {pipeline_mode = #tpu.pipeline_mode<synchronous>, transform_indices = @transform_2, window_bounds = array<i64: 1, 16>}, {pipeline_mode = #tpu.pipeline_mode<synchronous>, transform_indices = @transform_3, window_bounds = array<i64: 16, 192>}, {pipeline_mode = #tpu.pipeline_mode<synchronous>, transform_indices = @transform_4, window_bounds = array<i64: 1, 192>}, {transform_indices = @transform_5, window_bounds = array<i64: 24, 192>}]} {
    %c0 = arith.constant 0 : index
    %c0_0 = arith.constant 0 : index
    %0 = vector.load %arg1[%c0, %c0_0] : memref<24x192xf32, #tpu.memory_space<vmem>>, vector<24x192xf32>
    %c0_1 = arith.constant 0 : index
    %c0_2 = arith.constant 0 : index
    %1 = vector.load %arg2[%c0_1, %c0_2] : memref<192x16xf32, #tpu.memory_space<vmem>>, vector<192x16xf32>
    %cst = arith.constant dense<0.000000e+00> : vector<24x16xf32>
    %2 = tpu.matmul %0, %1, %cst {dimension_numbers = #tpu.dot_dimension_numbers<[1], [0], [0], [1], [0, 0, 1, 1], [], []>} : vector<24x192xf32>, vector<192x16xf32>, vector<24x16xf32> -> vector<24x16xf32>
    %c0_3 = arith.constant 0 : index
    %c0_4 = arith.constant 0 : index
    %3 = vector.load %arg3[%c0_3, %c0_4] : memref<1x16xf32, #tpu.memory_space<vmem>>, vector<1x16xf32>
    %4 = vector.broadcast %3 : vector<1x16xf32> to vector<24x16xf32>
    %5 = arith.addf %2, %4 : vector<24x16xf32>
    %c0_5 = arith.constant 0 : index
    %c0_6 = arith.constant 0 : index
    %6 = vector.load %arg4[%c0_5, %c0_6] : memref<16x192xf32, #tpu.memory_space<vmem>>, vector<16x192xf32>
    %cst_7 = arith.constant dense<0.000000e+00> : vector<24x192xf32>
    %7 = tpu.matmul %5, %6, %cst_7 {dimension_numbers = #tpu.dot_dimension_numbers<[1], [0], [0], [1], [0, 0, 1, 1], [], []>} : vector<24x16xf32>, vector<16x192xf32>, vector<24x192xf32> -> vector<24x192xf32>
    %c0_8 = arith.constant 0 : index
    %c0_9 = arith.constant 0 : index
    %8 = vector.load %arg5[%c0_8, %c0_9] : memref<1x192xf32, #tpu.memory_space<vmem>>, vector<1x192xf32>
    %9 = vector.broadcast %8 : vector<1x192xf32> to vector<24x192xf32>
    %10 = arith.addf %7, %9 : vector<24x192xf32>
    %c0_10 = arith.constant 0 : index
    %c0_11 = arith.constant 0 : index
    %11 = vector.load %arg6[%c0_10, %c0_11] : memref<24x192xf32, #tpu.memory_space<vmem>>, vector<24x192xf32>
    tpu.vector_store %arg6[%c0_10, %c0_11], %10 {strides = array<i32>} : memref<24x192xf32, #tpu.memory_space<vmem>>, vector<24x192xf32>,
    return
  }
  func.func @transform_0(%arg0: i32) -> (i32, i32) {
    %c0_i32 = arith.constant 0 : i32
    %c0_i32_0 = arith.constant 0 : i32
    return %arg0, %c0_i32 : i32, i32
  }
  func.func @transform_1(%arg0: i32) -> (i32, i32) {
    %c0_i32 = arith.constant 0 : i32
    %c0_i32_0 = arith.constant 0 : i32
    %c0_i32_1 = arith.constant 0 : i32
    return %c0_i32, %c0_i32_0 : i32, i32
  }
  func.func @transform_2(%arg0: i32) -> (i32, i32) {
    %c0_i32 = arith.constant 0 : i32
    %c0_i32_0 = arith.constant 0 : i32
    %c0_i32_1 = arith.constant 0 : i32
    return %c0_i32, %c0_i32_0 : i32, i32
  }
  func.func @transform_3(%arg0: i32) -> (i32, i32) {
    %c0_i32 = arith.constant 0 : i32
    %c0_i32_0 = arith.constant 0 : i32
    %c0_i32_1 = arith.constant 0 : i32
    return %c0_i32, %c0_i32_0 : i32, i32
  }
  func.func @transform_4(%arg0: i32) -> (i32, i32) {
    %c0_i32 = arith.constant 0 : i32
    %c0_i32_0 = arith.constant 0 : i32
    %c0_i32_1 = arith.constant 0 : i32
    return %c0_i32, %c0_i32_0 : i32, i32
  }
  func.func @transform_5(%arg0: i32) -> (i32, i32) {
    %c0_i32 = arith.constant 0 : i32
    %c0_i32_0 = arith.constant 0 : i32
    return %arg0, %c0_i32 : i32, i32
  }
}

module attributes {stable_mosaic.version = 11 : i64} {
  func.func @_refine_fused_kernel(%arg0: i32, %arg1: memref<1x3x24x24xf32, #tpu.memory_space<vmem>>, %arg2: memref<81xf32, #tpu.memory_space<smem>>, %arg3: memref<3xf32, #tpu.memory_space<smem>>, %arg4: memref<81xf32, #tpu.memory_space<smem>>, %arg5: memref<3xf32, #tpu.memory_space<smem>>, %arg6: memref<1x3x24x24xf32, #tpu.memory_space<vmem>>, %arg7: memref<3x26x26xf32, #tpu.memory_space<vmem>>, %arg8: memref<3x26x26xf32, #tpu.memory_space<vmem>>) attributes {dimension_semantics = [#tpu.dimension_semantics<parallel>], iteration_bounds = array<i64: 2>, scalar_prefetch = 0 : i64, scratch_operands = 2 : i64, tpu.core_type = #tpu.core_type<tc>, window_params = [{transform_indices = @transform_0, window_bounds = array<i64: 1, 3, 24, 24>}, {transform_indices = @transform_1, window_bounds = array<i64: 81>}, {transform_indices = @transform_2, window_bounds = array<i64: 3>}, {transform_indices = @transform_3, window_bounds = array<i64: 81>}, {transform_indices = @transform_4, window_bounds = array<i64: 3>}, {transform_indices = @transform_5, window_bounds = array<i64: 1, 3, 24, 24>}]} {
    %cst = arith.constant 0.000000e+00 : f32
    %0 = vector.broadcast %cst : f32 to vector<3x26x26xf32>
    %c0 = arith.constant 0 : index
    %c0_0 = arith.constant 0 : index
    %c0_1 = arith.constant 0 : index
    %1 = vector.load %arg7[%c0, %c0_0, %c0_1] : memref<3x26x26xf32, #tpu.memory_space<vmem>>, vector<3x26x26xf32>
    tpu.vector_store %arg7[%c0, %c0_0, %c0_1], %0 {strides = array<i32>} : memref<3x26x26xf32, #tpu.memory_space<vmem>>, vector<3x26x26xf32>,
    %c0_2 = arith.constant 0 : index
    %c0_3 = arith.constant 0 : index
    %c0_4 = arith.constant 0 : index
    %c0_5 = arith.constant 0 : index
    %2 = vector.load %arg1[%c0_2, %c0_3, %c0_4, %c0_5] : memref<1x3x24x24xf32, #tpu.memory_space<vmem>>, vector<1x3x24x24xf32>
    %3 = vector.shape_cast %2 : vector<1x3x24x24xf32> to vector<3x24x24xf32>
    %c0_6 = arith.constant 0 : index
    %c1 = arith.constant 1 : index
    %c1_7 = arith.constant 1 : index
    %4 = vector.load %arg7[%c0_6, %c1, %c1_7] : memref<3x26x26xf32, #tpu.memory_space<vmem>>, vector<3x24x24xf32>
    tpu.vector_store %arg7[%c0_6, %c1, %c1_7], %3 {strides = array<i32>} : memref<3x26x26xf32, #tpu.memory_space<vmem>>, vector<3x24x24xf32>,
    %cst_8 = arith.constant 0.000000e+00 : f32
    %5 = vector.broadcast %cst_8 : f32 to vector<24x24xf32>
    %c0_9 = arith.constant 0 : index
    %6 = memref.load %arg3[%c0_9] : memref<3xf32, #tpu.memory_space<smem>>
    %7 = vector.broadcast %6 : f32 to vector<24x24xf32>
    %8 = arith.addf %5, %7 : vector<24x24xf32>
    %cst_10 = arith.constant 0.000000e+00 : f32
    %9 = vector.broadcast %cst_10 : f32 to vector<24x24xf32>
    %c1_11 = arith.constant 1 : index
    %10 = memref.load %arg3[%c1_11] : memref<3xf32, #tpu.memory_space<smem>>
    %11 = vector.broadcast %10 : f32 to vector<24x24xf32>
    %12 = arith.addf %9, %11 : vector<24x24xf32>
    %cst_12 = arith.constant 0.000000e+00 : f32
    %13 = vector.broadcast %cst_12 : f32 to vector<24x24xf32>
    %c2 = arith.constant 2 : index
    %14 = memref.load %arg3[%c2] : memref<3xf32, #tpu.memory_space<smem>>
    %15 = vector.broadcast %14 : f32 to vector<24x24xf32>
    %16 = arith.addf %13, %15 : vector<24x24xf32>
    %c0_13 = arith.constant 0 : index
    %c0_14 = arith.constant 0 : index
    %c0_15 = arith.constant 0 : index
    %17 = vector.load %arg7[%c0_13, %c0_14, %c0_15] : memref<3x26x26xf32, #tpu.memory_space<vmem>>, vector<1x24x24xf32>
    %18 = vector.shape_cast %17 : vector<1x24x24xf32> to vector<24x24xf32>
    %c0_16 = arith.constant 0 : index
    %19 = memref.load %arg2[%c0_16] : memref<81xf32, #tpu.memory_space<smem>>
    %20 = vector.broadcast %19 : f32 to vector<24x24xf32>
    %21 = arith.mulf %20, %18 : vector<24x24xf32>
    %22 = arith.addf %8, %21 : vector<24x24xf32>
    %c27 = arith.constant 27 : index
    %23 = memref.load %arg2[%c27] : memref<81xf32, #tpu.memory_space<smem>>
    %24 = vector.broadcast %23 : f32 to vector<24x24xf32>
    %25 = arith.mulf %24, %18 : vector<24x24xf32>
    %26 = arith.addf %12, %25 : vector<24x24xf32>
    %c54 = arith.constant 54 : index
    %27 = memref.load %arg2[%c54] : memref<81xf32, #tpu.memory_space<smem>>
    %28 = vector.broadcast %27 : f32 to vector<24x24xf32>
    %29 = arith.mulf %28, %18 : vector<24x24xf32>
    %30 = arith.addf %16, %29 : vector<24x24xf32>
    %c0_17 = arith.constant 0 : index
    %c0_18 = arith.constant 0 : index
    %c1_19 = arith.constant 1 : index
    %31 = vector.load %arg7[%c0_17, %c0_18, %c1_19] : memref<3x26x26xf32, #tpu.memory_space<vmem>>, vector<1x24x24xf32>
    %32 = vector.shape_cast %31 : vector<1x24x24xf32> to vector<24x24xf32>
    %c1_20 = arith.constant 1 : index
    %33 = memref.load %arg2[%c1_20] : memref<81xf32, #tpu.memory_space<smem>>
    %34 = vector.broadcast %33 : f32 to vector<24x24xf32>
    %35 = arith.mulf %34, %32 : vector<24x24xf32>
    %36 = arith.addf %22, %35 : vector<24x24xf32>
    %c28 = arith.constant 28 : index
    %37 = memref.load %arg2[%c28] : memref<81xf32, #tpu.memory_space<smem>>
    %38 = vector.broadcast %37 : f32 to vector<24x24xf32>
    %39 = arith.mulf %38, %32 : vector<24x24xf32>
    %40 = arith.addf %26, %39 : vector<24x24xf32>
    %c55 = arith.constant 55 : index
    %41 = memref.load %arg2[%c55] : memref<81xf32, #tpu.memory_space<smem>>
    %42 = vector.broadcast %41 : f32 to vector<24x24xf32>
    %43 = arith.mulf %42, %32 : vector<24x24xf32>
    %44 = arith.addf %30, %43 : vector<24x24xf32>
    %c0_21 = arith.constant 0 : index
    %c0_22 = arith.constant 0 : index
    %c2_23 = arith.constant 2 : index
    %45 = vector.load %arg7[%c0_21, %c0_22, %c2_23] : memref<3x26x26xf32, #tpu.memory_space<vmem>>, vector<1x24x24xf32>
    %46 = vector.shape_cast %45 : vector<1x24x24xf32> to vector<24x24xf32>
    %c2_24 = arith.constant 2 : index
    %47 = memref.load %arg2[%c2_24] : memref<81xf32, #tpu.memory_space<smem>>
    %48 = vector.broadcast %47 : f32 to vector<24x24xf32>
    %49 = arith.mulf %48, %46 : vector<24x24xf32>
    %50 = arith.addf %36, %49 : vector<24x24xf32>
    %c29 = arith.constant 29 : index
    %51 = memref.load %arg2[%c29] : memref<81xf32, #tpu.memory_space<smem>>
    %52 = vector.broadcast %51 : f32 to vector<24x24xf32>
    %53 = arith.mulf %52, %46 : vector<24x24xf32>
    %54 = arith.addf %40, %53 : vector<24x24xf32>
    %c56 = arith.constant 56 : index
    %55 = memref.load %arg2[%c56] : memref<81xf32, #tpu.memory_space<smem>>
    %56 = vector.broadcast %55 : f32 to vector<24x24xf32>
    %57 = arith.mulf %56, %46 : vector<24x24xf32>
    %58 = arith.addf %44, %57 : vector<24x24xf32>
    %c0_25 = arith.constant 0 : index
    %c1_26 = arith.constant 1 : index
    %c0_27 = arith.constant 0 : index
    %59 = vector.load %arg7[%c0_25, %c1_26, %c0_27] : memref<3x26x26xf32, #tpu.memory_space<vmem>>, vector<1x24x24xf32>
    %60 = vector.shape_cast %59 : vector<1x24x24xf32> to vector<24x24xf32>
    %c3 = arith.constant 3 : index
    %61 = memref.load %arg2[%c3] : memref<81xf32, #tpu.memory_space<smem>>
    %62 = vector.broadcast %61 : f32 to vector<24x24xf32>
    %63 = arith.mulf %62, %60 : vector<24x24xf32>
    %64 = arith.addf %50, %63 : vector<24x24xf32>
    %c30 = arith.constant 30 : index
    %65 = memref.load %arg2[%c30] : memref<81xf32, #tpu.memory_space<smem>>
    %66 = vector.broadcast %65 : f32 to vector<24x24xf32>
    %67 = arith.mulf %66, %60 : vector<24x24xf32>
    %68 = arith.addf %54, %67 : vector<24x24xf32>
    %c57 = arith.constant 57 : index
    %69 = memref.load %arg2[%c57] : memref<81xf32, #tpu.memory_space<smem>>
    %70 = vector.broadcast %69 : f32 to vector<24x24xf32>
    %71 = arith.mulf %70, %60 : vector<24x24xf32>
    %72 = arith.addf %58, %71 : vector<24x24xf32>
    %c0_28 = arith.constant 0 : index
    %c1_29 = arith.constant 1 : index
    %c1_30 = arith.constant 1 : index
    %73 = vector.load %arg7[%c0_28, %c1_29, %c1_30] : memref<3x26x26xf32, #tpu.memory_space<vmem>>, vector<1x24x24xf32>
    %74 = vector.shape_cast %73 : vector<1x24x24xf32> to vector<24x24xf32>
    %c4 = arith.constant 4 : index
    %75 = memref.load %arg2[%c4] : memref<81xf32, #tpu.memory_space<smem>>
    %76 = vector.broadcast %75 : f32 to vector<24x24xf32>
    %77 = arith.mulf %76, %74 : vector<24x24xf32>
    %78 = arith.addf %64, %77 : vector<24x24xf32>
    %c31 = arith.constant 31 : index
    %79 = memref.load %arg2[%c31] : memref<81xf32, #tpu.memory_space<smem>>
    %80 = vector.broadcast %79 : f32 to vector<24x24xf32>
    %81 = arith.mulf %80, %74 : vector<24x24xf32>
    %82 = arith.addf %68, %81 : vector<24x24xf32>
    %c58 = arith.constant 58 : index
    %83 = memref.load %arg2[%c58] : memref<81xf32, #tpu.memory_space<smem>>
    %84 = vector.broadcast %83 : f32 to vector<24x24xf32>
    %85 = arith.mulf %84, %74 : vector<24x24xf32>
    %86 = arith.addf %72, %85 : vector<24x24xf32>
    %c0_31 = arith.constant 0 : index
    %c1_32 = arith.constant 1 : index
    %c2_33 = arith.constant 2 : index
    %87 = vector.load %arg7[%c0_31, %c1_32, %c2_33] : memref<3x26x26xf32, #tpu.memory_space<vmem>>, vector<1x24x24xf32>
    %88 = vector.shape_cast %87 : vector<1x24x24xf32> to vector<24x24xf32>
    %c5 = arith.constant 5 : index
    %89 = memref.load %arg2[%c5] : memref<81xf32, #tpu.memory_space<smem>>
    %90 = vector.broadcast %89 : f32 to vector<24x24xf32>
    %91 = arith.mulf %90, %88 : vector<24x24xf32>
    %92 = arith.addf %78, %91 : vector<24x24xf32>
    %c32 = arith.constant 32 : index
    %93 = memref.load %arg2[%c32] : memref<81xf32, #tpu.memory_space<smem>>
    %94 = vector.broadcast %93 : f32 to vector<24x24xf32>
    %95 = arith.mulf %94, %88 : vector<24x24xf32>
    %96 = arith.addf %82, %95 : vector<24x24xf32>
    %c59 = arith.constant 59 : index
    %97 = memref.load %arg2[%c59] : memref<81xf32, #tpu.memory_space<smem>>
    %98 = vector.broadcast %97 : f32 to vector<24x24xf32>
    %99 = arith.mulf %98, %88 : vector<24x24xf32>
    %100 = arith.addf %86, %99 : vector<24x24xf32>
    %c0_34 = arith.constant 0 : index
    %c2_35 = arith.constant 2 : index
    %c0_36 = arith.constant 0 : index
    %101 = vector.load %arg7[%c0_34, %c2_35, %c0_36] : memref<3x26x26xf32, #tpu.memory_space<vmem>>, vector<1x24x24xf32>
    %102 = vector.shape_cast %101 : vector<1x24x24xf32> to vector<24x24xf32>
    %c6 = arith.constant 6 : index
    %103 = memref.load %arg2[%c6] : memref<81xf32, #tpu.memory_space<smem>>
    %104 = vector.broadcast %103 : f32 to vector<24x24xf32>
    %105 = arith.mulf %104, %102 : vector<24x24xf32>
    %106 = arith.addf %92, %105 : vector<24x24xf32>
    %c33 = arith.constant 33 : index
    %107 = memref.load %arg2[%c33] : memref<81xf32, #tpu.memory_space<smem>>
    %108 = vector.broadcast %107 : f32 to vector<24x24xf32>
    %109 = arith.mulf %108, %102 : vector<24x24xf32>
    %110 = arith.addf %96, %109 : vector<24x24xf32>
    %c60 = arith.constant 60 : index
    %111 = memref.load %arg2[%c60] : memref<81xf32, #tpu.memory_space<smem>>
    %112 = vector.broadcast %111 : f32 to vector<24x24xf32>
    %113 = arith.mulf %112, %102 : vector<24x24xf32>
    %114 = arith.addf %100, %113 : vector<24x24xf32>
    %c0_37 = arith.constant 0 : index
    %c2_38 = arith.constant 2 : index
    %c1_39 = arith.constant 1 : index
    %115 = vector.load %arg7[%c0_37, %c2_38, %c1_39] : memref<3x26x26xf32, #tpu.memory_space<vmem>>, vector<1x24x24xf32>
    %116 = vector.shape_cast %115 : vector<1x24x24xf32> to vector<24x24xf32>
    %c7 = arith.constant 7 : index
    %117 = memref.load %arg2[%c7] : memref<81xf32, #tpu.memory_space<smem>>
    %118 = vector.broadcast %117 : f32 to vector<24x24xf32>
    %119 = arith.mulf %118, %116 : vector<24x24xf32>
    %120 = arith.addf %106, %119 : vector<24x24xf32>
    %c34 = arith.constant 34 : index
    %121 = memref.load %arg2[%c34] : memref<81xf32, #tpu.memory_space<smem>>
    %122 = vector.broadcast %121 : f32 to vector<24x24xf32>
    %123 = arith.mulf %122, %116 : vector<24x24xf32>
    %124 = arith.addf %110, %123 : vector<24x24xf32>
    %c61 = arith.constant 61 : index
    %125 = memref.load %arg2[%c61] : memref<81xf32, #tpu.memory_space<smem>>
    %126 = vector.broadcast %125 : f32 to vector<24x24xf32>
    %127 = arith.mulf %126, %116 : vector<24x24xf32>
    %128 = arith.addf %114, %127 : vector<24x24xf32>
    %c0_40 = arith.constant 0 : index
    %c2_41 = arith.constant 2 : index
    %c2_42 = arith.constant 2 : index
    %129 = vector.load %arg7[%c0_40, %c2_41, %c2_42] : memref<3x26x26xf32, #tpu.memory_space<vmem>>, vector<1x24x24xf32>
    %130 = vector.shape_cast %129 : vector<1x24x24xf32> to vector<24x24xf32>
    %c8 = arith.constant 8 : index
    %131 = memref.load %arg2[%c8] : memref<81xf32, #tpu.memory_space<smem>>
    %132 = vector.broadcast %131 : f32 to vector<24x24xf32>
    %133 = arith.mulf %132, %130 : vector<24x24xf32>
    %134 = arith.addf %120, %133 : vector<24x24xf32>
    %c35 = arith.constant 35 : index
    %135 = memref.load %arg2[%c35] : memref<81xf32, #tpu.memory_space<smem>>
    %136 = vector.broadcast %135 : f32 to vector<24x24xf32>
    %137 = arith.mulf %136, %130 : vector<24x24xf32>
    %138 = arith.addf %124, %137 : vector<24x24xf32>
    %c62 = arith.constant 62 : index
    %139 = memref.load %arg2[%c62] : memref<81xf32, #tpu.memory_space<smem>>
    %140 = vector.broadcast %139 : f32 to vector<24x24xf32>
    %141 = arith.mulf %140, %130 : vector<24x24xf32>
    %142 = arith.addf %128, %141 : vector<24x24xf32>
    %c1_43 = arith.constant 1 : index
    %c0_44 = arith.constant 0 : index
    %c0_45 = arith.constant 0 : index
    %143 = vector.load %arg7[%c1_43, %c0_44, %c0_45] : memref<3x26x26xf32, #tpu.memory_space<vmem>>, vector<1x24x24xf32>
    %144 = vector.shape_cast %143 : vector<1x24x24xf32> to vector<24x24xf32>
    %c9 = arith.constant 9 : index
    %145 = memref.load %arg2[%c9] : memref<81xf32, #tpu.memory_space<smem>>
    %146 = vector.broadcast %145 : f32 to vector<24x24xf32>
    %147 = arith.mulf %146, %144 : vector<24x24xf32>
    %148 = arith.addf %134, %147 : vector<24x24xf32>
    %c36 = arith.constant 36 : index
    %149 = memref.load %arg2[%c36] : memref<81xf32, #tpu.memory_space<smem>>
    %150 = vector.broadcast %149 : f32 to vector<24x24xf32>
    %151 = arith.mulf %150, %144 : vector<24x24xf32>
    %152 = arith.addf %138, %151 : vector<24x24xf32>
    %c63 = arith.constant 63 : index
    %153 = memref.load %arg2[%c63] : memref<81xf32, #tpu.memory_space<smem>>
    %154 = vector.broadcast %153 : f32 to vector<24x24xf32>
    %155 = arith.mulf %154, %144 : vector<24x24xf32>
    %156 = arith.addf %142, %155 : vector<24x24xf32>
    %c1_46 = arith.constant 1 : index
    %c0_47 = arith.constant 0 : index
    %c1_48 = arith.constant 1 : index
    %157 = vector.load %arg7[%c1_46, %c0_47, %c1_48] : memref<3x26x26xf32, #tpu.memory_space<vmem>>, vector<1x24x24xf32>
    %158 = vector.shape_cast %157 : vector<1x24x24xf32> to vector<24x24xf32>
    %c10 = arith.constant 10 : index
    %159 = memref.load %arg2[%c10] : memref<81xf32, #tpu.memory_space<smem>>
    %160 = vector.broadcast %159 : f32 to vector<24x24xf32>
    %161 = arith.mulf %160, %158 : vector<24x24xf32>
    %162 = arith.addf %148, %161 : vector<24x24xf32>
    %c37 = arith.constant 37 : index
    %163 = memref.load %arg2[%c37] : memref<81xf32, #tpu.memory_space<smem>>
    %164 = vector.broadcast %163 : f32 to vector<24x24xf32>
    %165 = arith.mulf %164, %158 : vector<24x24xf32>
    %166 = arith.addf %152, %165 : vector<24x24xf32>
    %c64 = arith.constant 64 : index
    %167 = memref.load %arg2[%c64] : memref<81xf32, #tpu.memory_space<smem>>
    %168 = vector.broadcast %167 : f32 to vector<24x24xf32>
    %169 = arith.mulf %168, %158 : vector<24x24xf32>
    %170 = arith.addf %156, %169 : vector<24x24xf32>
    %c1_49 = arith.constant 1 : index
    %c0_50 = arith.constant 0 : index
    %c2_51 = arith.constant 2 : index
    %171 = vector.load %arg7[%c1_49, %c0_50, %c2_51] : memref<3x26x26xf32, #tpu.memory_space<vmem>>, vector<1x24x24xf32>
    %172 = vector.shape_cast %171 : vector<1x24x24xf32> to vector<24x24xf32>
    %c11 = arith.constant 11 : index
    %173 = memref.load %arg2[%c11] : memref<81xf32, #tpu.memory_space<smem>>
    %174 = vector.broadcast %173 : f32 to vector<24x24xf32>
    %175 = arith.mulf %174, %172 : vector<24x24xf32>
    %176 = arith.addf %162, %175 : vector<24x24xf32>
    %c38 = arith.constant 38 : index
    %177 = memref.load %arg2[%c38] : memref<81xf32, #tpu.memory_space<smem>>
    %178 = vector.broadcast %177 : f32 to vector<24x24xf32>
    %179 = arith.mulf %178, %172 : vector<24x24xf32>
    %180 = arith.addf %166, %179 : vector<24x24xf32>
    %c65 = arith.constant 65 : index
    %181 = memref.load %arg2[%c65] : memref<81xf32, #tpu.memory_space<smem>>
    %182 = vector.broadcast %181 : f32 to vector<24x24xf32>
    %183 = arith.mulf %182, %172 : vector<24x24xf32>
    %184 = arith.addf %170, %183 : vector<24x24xf32>
    %c1_52 = arith.constant 1 : index
    %c1_53 = arith.constant 1 : index
    %c0_54 = arith.constant 0 : index
    %185 = vector.load %arg7[%c1_52, %c1_53, %c0_54] : memref<3x26x26xf32, #tpu.memory_space<vmem>>, vector<1x24x24xf32>
    %186 = vector.shape_cast %185 : vector<1x24x24xf32> to vector<24x24xf32>
    %c12 = arith.constant 12 : index
    %187 = memref.load %arg2[%c12] : memref<81xf32, #tpu.memory_space<smem>>
    %188 = vector.broadcast %187 : f32 to vector<24x24xf32>
    %189 = arith.mulf %188, %186 : vector<24x24xf32>
    %190 = arith.addf %176, %189 : vector<24x24xf32>
    %c39 = arith.constant 39 : index
    %191 = memref.load %arg2[%c39] : memref<81xf32, #tpu.memory_space<smem>>
    %192 = vector.broadcast %191 : f32 to vector<24x24xf32>
    %193 = arith.mulf %192, %186 : vector<24x24xf32>
    %194 = arith.addf %180, %193 : vector<24x24xf32>
    %c66 = arith.constant 66 : index
    %195 = memref.load %arg2[%c66] : memref<81xf32, #tpu.memory_space<smem>>
    %196 = vector.broadcast %195 : f32 to vector<24x24xf32>
    %197 = arith.mulf %196, %186 : vector<24x24xf32>
    %198 = arith.addf %184, %197 : vector<24x24xf32>
    %c1_55 = arith.constant 1 : index
    %c1_56 = arith.constant 1 : index
    %c1_57 = arith.constant 1 : index
    %199 = vector.load %arg7[%c1_55, %c1_56, %c1_57] : memref<3x26x26xf32, #tpu.memory_space<vmem>>, vector<1x24x24xf32>
    %200 = vector.shape_cast %199 : vector<1x24x24xf32> to vector<24x24xf32>
    %c13 = arith.constant 13 : index
    %201 = memref.load %arg2[%c13] : memref<81xf32, #tpu.memory_space<smem>>
    %202 = vector.broadcast %201 : f32 to vector<24x24xf32>
    %203 = arith.mulf %202, %200 : vector<24x24xf32>
    %204 = arith.addf %190, %203 : vector<24x24xf32>
    %c40 = arith.constant 40 : index
    %205 = memref.load %arg2[%c40] : memref<81xf32, #tpu.memory_space<smem>>
    %206 = vector.broadcast %205 : f32 to vector<24x24xf32>
    %207 = arith.mulf %206, %200 : vector<24x24xf32>
    %208 = arith.addf %194, %207 : vector<24x24xf32>
    %c67 = arith.constant 67 : index
    %209 = memref.load %arg2[%c67] : memref<81xf32, #tpu.memory_space<smem>>
    %210 = vector.broadcast %209 : f32 to vector<24x24xf32>
    %211 = arith.mulf %210, %200 : vector<24x24xf32>
    %212 = arith.addf %198, %211 : vector<24x24xf32>
    %c1_58 = arith.constant 1 : index
    %c1_59 = arith.constant 1 : index
    %c2_60 = arith.constant 2 : index
    %213 = vector.load %arg7[%c1_58, %c1_59, %c2_60] : memref<3x26x26xf32, #tpu.memory_space<vmem>>, vector<1x24x24xf32>
    %214 = vector.shape_cast %213 : vector<1x24x24xf32> to vector<24x24xf32>
    %c14 = arith.constant 14 : index
    %215 = memref.load %arg2[%c14] : memref<81xf32, #tpu.memory_space<smem>>
    %216 = vector.broadcast %215 : f32 to vector<24x24xf32>
    %217 = arith.mulf %216, %214 : vector<24x24xf32>
    %218 = arith.addf %204, %217 : vector<24x24xf32>
    %c41 = arith.constant 41 : index
    %219 = memref.load %arg2[%c41] : memref<81xf32, #tpu.memory_space<smem>>
    %220 = vector.broadcast %219 : f32 to vector<24x24xf32>
    %221 = arith.mulf %220, %214 : vector<24x24xf32>
    %222 = arith.addf %208, %221 : vector<24x24xf32>
    %c68 = arith.constant 68 : index
    %223 = memref.load %arg2[%c68] : memref<81xf32, #tpu.memory_space<smem>>
    %224 = vector.broadcast %223 : f32 to vector<24x24xf32>
    %225 = arith.mulf %224, %214 : vector<24x24xf32>
    %226 = arith.addf %212, %225 : vector<24x24xf32>
    %c1_61 = arith.constant 1 : index
    %c2_62 = arith.constant 2 : index
    %c0_63 = arith.constant 0 : index
    %227 = vector.load %arg7[%c1_61, %c2_62, %c0_63] : memref<3x26x26xf32, #tpu.memory_space<vmem>>, vector<1x24x24xf32>
    %228 = vector.shape_cast %227 : vector<1x24x24xf32> to vector<24x24xf32>
    %c15 = arith.constant 15 : index
    %229 = memref.load %arg2[%c15] : memref<81xf32, #tpu.memory_space<smem>>
    %230 = vector.broadcast %229 : f32 to vector<24x24xf32>
    %231 = arith.mulf %230, %228 : vector<24x24xf32>
    %232 = arith.addf %218, %231 : vector<24x24xf32>
    %c42 = arith.constant 42 : index
    %233 = memref.load %arg2[%c42] : memref<81xf32, #tpu.memory_space<smem>>
    %234 = vector.broadcast %233 : f32 to vector<24x24xf32>
    %235 = arith.mulf %234, %228 : vector<24x24xf32>
    %236 = arith.addf %222, %235 : vector<24x24xf32>
    %c69 = arith.constant 69 : index
    %237 = memref.load %arg2[%c69] : memref<81xf32, #tpu.memory_space<smem>>
    %238 = vector.broadcast %237 : f32 to vector<24x24xf32>
    %239 = arith.mulf %238, %228 : vector<24x24xf32>
    %240 = arith.addf %226, %239 : vector<24x24xf32>
    %c1_64 = arith.constant 1 : index
    %c2_65 = arith.constant 2 : index
    %c1_66 = arith.constant 1 : index
    %241 = vector.load %arg7[%c1_64, %c2_65, %c1_66] : memref<3x26x26xf32, #tpu.memory_space<vmem>>, vector<1x24x24xf32>
    %242 = vector.shape_cast %241 : vector<1x24x24xf32> to vector<24x24xf32>
    %c16 = arith.constant 16 : index
    %243 = memref.load %arg2[%c16] : memref<81xf32, #tpu.memory_space<smem>>
    %244 = vector.broadcast %243 : f32 to vector<24x24xf32>
    %245 = arith.mulf %244, %242 : vector<24x24xf32>
    %246 = arith.addf %232, %245 : vector<24x24xf32>
    %c43 = arith.constant 43 : index
    %247 = memref.load %arg2[%c43] : memref<81xf32, #tpu.memory_space<smem>>
    %248 = vector.broadcast %247 : f32 to vector<24x24xf32>
    %249 = arith.mulf %248, %242 : vector<24x24xf32>
    %250 = arith.addf %236, %249 : vector<24x24xf32>
    %c70 = arith.constant 70 : index
    %251 = memref.load %arg2[%c70] : memref<81xf32, #tpu.memory_space<smem>>
    %252 = vector.broadcast %251 : f32 to vector<24x24xf32>
    %253 = arith.mulf %252, %242 : vector<24x24xf32>
    %254 = arith.addf %240, %253 : vector<24x24xf32>
    %c1_67 = arith.constant 1 : index
    %c2_68 = arith.constant 2 : index
    %c2_69 = arith.constant 2 : index
    %255 = vector.load %arg7[%c1_67, %c2_68, %c2_69] : memref<3x26x26xf32, #tpu.memory_space<vmem>>, vector<1x24x24xf32>
    %256 = vector.shape_cast %255 : vector<1x24x24xf32> to vector<24x24xf32>
    %c17 = arith.constant 17 : index
    %257 = memref.load %arg2[%c17] : memref<81xf32, #tpu.memory_space<smem>>
    %258 = vector.broadcast %257 : f32 to vector<24x24xf32>
    %259 = arith.mulf %258, %256 : vector<24x24xf32>
    %260 = arith.addf %246, %259 : vector<24x24xf32>
    %c44 = arith.constant 44 : index
    %261 = memref.load %arg2[%c44] : memref<81xf32, #tpu.memory_space<smem>>
    %262 = vector.broadcast %261 : f32 to vector<24x24xf32>
    %263 = arith.mulf %262, %256 : vector<24x24xf32>
    %264 = arith.addf %250, %263 : vector<24x24xf32>
    %c71 = arith.constant 71 : index
    %265 = memref.load %arg2[%c71] : memref<81xf32, #tpu.memory_space<smem>>
    %266 = vector.broadcast %265 : f32 to vector<24x24xf32>
    %267 = arith.mulf %266, %256 : vector<24x24xf32>
    %268 = arith.addf %254, %267 : vector<24x24xf32>
    %c2_70 = arith.constant 2 : index
    %c0_71 = arith.constant 0 : index
    %c0_72 = arith.constant 0 : index
    %269 = vector.load %arg7[%c2_70, %c0_71, %c0_72] : memref<3x26x26xf32, #tpu.memory_space<vmem>>, vector<1x24x24xf32>
    %270 = vector.shape_cast %269 : vector<1x24x24xf32> to vector<24x24xf32>
    %c18 = arith.constant 18 : index
    %271 = memref.load %arg2[%c18] : memref<81xf32, #tpu.memory_space<smem>>
    %272 = vector.broadcast %271 : f32 to vector<24x24xf32>
    %273 = arith.mulf %272, %270 : vector<24x24xf32>
    %274 = arith.addf %260, %273 : vector<24x24xf32>
    %c45 = arith.constant 45 : index
    %275 = memref.load %arg2[%c45] : memref<81xf32, #tpu.memory_space<smem>>
    %276 = vector.broadcast %275 : f32 to vector<24x24xf32>
    %277 = arith.mulf %276, %270 : vector<24x24xf32>
    %278 = arith.addf %264, %277 : vector<24x24xf32>
    %c72 = arith.constant 72 : index
    %279 = memref.load %arg2[%c72] : memref<81xf32, #tpu.memory_space<smem>>
    %280 = vector.broadcast %279 : f32 to vector<24x24xf32>
    %281 = arith.mulf %280, %270 : vector<24x24xf32>
    %282 = arith.addf %268, %281 : vector<24x24xf32>
    %c2_73 = arith.constant 2 : index
    %c0_74 = arith.constant 0 : index
    %c1_75 = arith.constant 1 : index
    %283 = vector.load %arg7[%c2_73, %c0_74, %c1_75] : memref<3x26x26xf32, #tpu.memory_space<vmem>>, vector<1x24x24xf32>
    %284 = vector.shape_cast %283 : vector<1x24x24xf32> to vector<24x24xf32>
    %c19 = arith.constant 19 : index
    %285 = memref.load %arg2[%c19] : memref<81xf32, #tpu.memory_space<smem>>
    %286 = vector.broadcast %285 : f32 to vector<24x24xf32>
    %287 = arith.mulf %286, %284 : vector<24x24xf32>
    %288 = arith.addf %274, %287 : vector<24x24xf32>
    %c46 = arith.constant 46 : index
    %289 = memref.load %arg2[%c46] : memref<81xf32, #tpu.memory_space<smem>>
    %290 = vector.broadcast %289 : f32 to vector<24x24xf32>
    %291 = arith.mulf %290, %284 : vector<24x24xf32>
    %292 = arith.addf %278, %291 : vector<24x24xf32>
    %c73 = arith.constant 73 : index
    %293 = memref.load %arg2[%c73] : memref<81xf32, #tpu.memory_space<smem>>
    %294 = vector.broadcast %293 : f32 to vector<24x24xf32>
    %295 = arith.mulf %294, %284 : vector<24x24xf32>
    %296 = arith.addf %282, %295 : vector<24x24xf32>
    %c2_76 = arith.constant 2 : index
    %c0_77 = arith.constant 0 : index
    %c2_78 = arith.constant 2 : index
    %297 = vector.load %arg7[%c2_76, %c0_77, %c2_78] : memref<3x26x26xf32, #tpu.memory_space<vmem>>, vector<1x24x24xf32>
    %298 = vector.shape_cast %297 : vector<1x24x24xf32> to vector<24x24xf32>
    %c20 = arith.constant 20 : index
    %299 = memref.load %arg2[%c20] : memref<81xf32, #tpu.memory_space<smem>>
    %300 = vector.broadcast %299 : f32 to vector<24x24xf32>
    %301 = arith.mulf %300, %298 : vector<24x24xf32>
    %302 = arith.addf %288, %301 : vector<24x24xf32>
    %c47 = arith.constant 47 : index
    %303 = memref.load %arg2[%c47] : memref<81xf32, #tpu.memory_space<smem>>
    %304 = vector.broadcast %303 : f32 to vector<24x24xf32>
    %305 = arith.mulf %304, %298 : vector<24x24xf32>
    %306 = arith.addf %292, %305 : vector<24x24xf32>
    %c74 = arith.constant 74 : index
    %307 = memref.load %arg2[%c74] : memref<81xf32, #tpu.memory_space<smem>>
    %308 = vector.broadcast %307 : f32 to vector<24x24xf32>
    %309 = arith.mulf %308, %298 : vector<24x24xf32>
    %310 = arith.addf %296, %309 : vector<24x24xf32>
    %c2_79 = arith.constant 2 : index
    %c1_80 = arith.constant 1 : index
    %c0_81 = arith.constant 0 : index
    %311 = vector.load %arg7[%c2_79, %c1_80, %c0_81] : memref<3x26x26xf32, #tpu.memory_space<vmem>>, vector<1x24x24xf32>
    %312 = vector.shape_cast %311 : vector<1x24x24xf32> to vector<24x24xf32>
    %c21 = arith.constant 21 : index
    %313 = memref.load %arg2[%c21] : memref<81xf32, #tpu.memory_space<smem>>
    %314 = vector.broadcast %313 : f32 to vector<24x24xf32>
    %315 = arith.mulf %314, %312 : vector<24x24xf32>
    %316 = arith.addf %302, %315 : vector<24x24xf32>
    %c48 = arith.constant 48 : index
    %317 = memref.load %arg2[%c48] : memref<81xf32, #tpu.memory_space<smem>>
    %318 = vector.broadcast %317 : f32 to vector<24x24xf32>
    %319 = arith.mulf %318, %312 : vector<24x24xf32>
    %320 = arith.addf %306, %319 : vector<24x24xf32>
    %c75 = arith.constant 75 : index
    %321 = memref.load %arg2[%c75] : memref<81xf32, #tpu.memory_space<smem>>
    %322 = vector.broadcast %321 : f32 to vector<24x24xf32>
    %323 = arith.mulf %322, %312 : vector<24x24xf32>
    %324 = arith.addf %310, %323 : vector<24x24xf32>
    %c2_82 = arith.constant 2 : index
    %c1_83 = arith.constant 1 : index
    %c1_84 = arith.constant 1 : index
    %325 = vector.load %arg7[%c2_82, %c1_83, %c1_84] : memref<3x26x26xf32, #tpu.memory_space<vmem>>, vector<1x24x24xf32>
    %326 = vector.shape_cast %325 : vector<1x24x24xf32> to vector<24x24xf32>
    %c22 = arith.constant 22 : index
    %327 = memref.load %arg2[%c22] : memref<81xf32, #tpu.memory_space<smem>>
    %328 = vector.broadcast %327 : f32 to vector<24x24xf32>
    %329 = arith.mulf %328, %326 : vector<24x24xf32>
    %330 = arith.addf %316, %329 : vector<24x24xf32>
    %c49 = arith.constant 49 : index
    %331 = memref.load %arg2[%c49] : memref<81xf32, #tpu.memory_space<smem>>
    %332 = vector.broadcast %331 : f32 to vector<24x24xf32>
    %333 = arith.mulf %332, %326 : vector<24x24xf32>
    %334 = arith.addf %320, %333 : vector<24x24xf32>
    %c76 = arith.constant 76 : index
    %335 = memref.load %arg2[%c76] : memref<81xf32, #tpu.memory_space<smem>>
    %336 = vector.broadcast %335 : f32 to vector<24x24xf32>
    %337 = arith.mulf %336, %326 : vector<24x24xf32>
    %338 = arith.addf %324, %337 : vector<24x24xf32>
    %c2_85 = arith.constant 2 : index
    %c1_86 = arith.constant 1 : index
    %c2_87 = arith.constant 2 : index
    %339 = vector.load %arg7[%c2_85, %c1_86, %c2_87] : memref<3x26x26xf32, #tpu.memory_space<vmem>>, vector<1x24x24xf32>
    %340 = vector.shape_cast %339 : vector<1x24x24xf32> to vector<24x24xf32>
    %c23 = arith.constant 23 : index
    %341 = memref.load %arg2[%c23] : memref<81xf32, #tpu.memory_space<smem>>
    %342 = vector.broadcast %341 : f32 to vector<24x24xf32>
    %343 = arith.mulf %342, %340 : vector<24x24xf32>
    %344 = arith.addf %330, %343 : vector<24x24xf32>
    %c50 = arith.constant 50 : index
    %345 = memref.load %arg2[%c50] : memref<81xf32, #tpu.memory_space<smem>>
    %346 = vector.broadcast %345 : f32 to vector<24x24xf32>
    %347 = arith.mulf %346, %340 : vector<24x24xf32>
    %348 = arith.addf %334, %347 : vector<24x24xf32>
    %c77 = arith.constant 77 : index
    %349 = memref.load %arg2[%c77] : memref<81xf32, #tpu.memory_space<smem>>
    %350 = vector.broadcast %349 : f32 to vector<24x24xf32>
    %351 = arith.mulf %350, %340 : vector<24x24xf32>
    %352 = arith.addf %338, %351 : vector<24x24xf32>
    %c2_88 = arith.constant 2 : index
    %c2_89 = arith.constant 2 : index
    %c0_90 = arith.constant 0 : index
    %353 = vector.load %arg7[%c2_88, %c2_89, %c0_90] : memref<3x26x26xf32, #tpu.memory_space<vmem>>, vector<1x24x24xf32>
    %354 = vector.shape_cast %353 : vector<1x24x24xf32> to vector<24x24xf32>
    %c24 = arith.constant 24 : index
    %355 = memref.load %arg2[%c24] : memref<81xf32, #tpu.memory_space<smem>>
    %356 = vector.broadcast %355 : f32 to vector<24x24xf32>
    %357 = arith.mulf %356, %354 : vector<24x24xf32>
    %358 = arith.addf %344, %357 : vector<24x24xf32>
    %c51 = arith.constant 51 : index
    %359 = memref.load %arg2[%c51] : memref<81xf32, #tpu.memory_space<smem>>
    %360 = vector.broadcast %359 : f32 to vector<24x24xf32>
    %361 = arith.mulf %360, %354 : vector<24x24xf32>
    %362 = arith.addf %348, %361 : vector<24x24xf32>
    %c78 = arith.constant 78 : index
    %363 = memref.load %arg2[%c78] : memref<81xf32, #tpu.memory_space<smem>>
    %364 = vector.broadcast %363 : f32 to vector<24x24xf32>
    %365 = arith.mulf %364, %354 : vector<24x24xf32>
    %366 = arith.addf %352, %365 : vector<24x24xf32>
    %c2_91 = arith.constant 2 : index
    %c2_92 = arith.constant 2 : index
    %c1_93 = arith.constant 1 : index
    %367 = vector.load %arg7[%c2_91, %c2_92, %c1_93] : memref<3x26x26xf32, #tpu.memory_space<vmem>>, vector<1x24x24xf32>
    %368 = vector.shape_cast %367 : vector<1x24x24xf32> to vector<24x24xf32>
    %c25 = arith.constant 25 : index
    %369 = memref.load %arg2[%c25] : memref<81xf32, #tpu.memory_space<smem>>
    %370 = vector.broadcast %369 : f32 to vector<24x24xf32>
    %371 = arith.mulf %370, %368 : vector<24x24xf32>
    %372 = arith.addf %358, %371 : vector<24x24xf32>
    %c52 = arith.constant 52 : index
    %373 = memref.load %arg2[%c52] : memref<81xf32, #tpu.memory_space<smem>>
    %374 = vector.broadcast %373 : f32 to vector<24x24xf32>
    %375 = arith.mulf %374, %368 : vector<24x24xf32>
    %376 = arith.addf %362, %375 : vector<24x24xf32>
    %c79 = arith.constant 79 : index
    %377 = memref.load %arg2[%c79] : memref<81xf32, #tpu.memory_space<smem>>
    %378 = vector.broadcast %377 : f32 to vector<24x24xf32>
    %379 = arith.mulf %378, %368 : vector<24x24xf32>
    %380 = arith.addf %366, %379 : vector<24x24xf32>
    %c2_94 = arith.constant 2 : index
    %c2_95 = arith.constant 2 : index
    %c2_96 = arith.constant 2 : index
    %381 = vector.load %arg7[%c2_94, %c2_95, %c2_96] : memref<3x26x26xf32, #tpu.memory_space<vmem>>, vector<1x24x24xf32>
    %382 = vector.shape_cast %381 : vector<1x24x24xf32> to vector<24x24xf32>
    %c26 = arith.constant 26 : index
    %383 = memref.load %arg2[%c26] : memref<81xf32, #tpu.memory_space<smem>>
    %384 = vector.broadcast %383 : f32 to vector<24x24xf32>
    %385 = arith.mulf %384, %382 : vector<24x24xf32>
    %386 = arith.addf %372, %385 : vector<24x24xf32>
    %c53 = arith.constant 53 : index
    %387 = memref.load %arg2[%c53] : memref<81xf32, #tpu.memory_space<smem>>
    %388 = vector.broadcast %387 : f32 to vector<24x24xf32>
    %389 = arith.mulf %388, %382 : vector<24x24xf32>
    %390 = arith.addf %376, %389 : vector<24x24xf32>
    %c80 = arith.constant 80 : index
    %391 = memref.load %arg2[%c80] : memref<81xf32, #tpu.memory_space<smem>>
    %392 = vector.broadcast %391 : f32 to vector<24x24xf32>
    %393 = arith.mulf %392, %382 : vector<24x24xf32>
    %394 = arith.addf %380, %393 : vector<24x24xf32>
    %cst_97 = arith.constant 0.000000e+00 : f32
    %395 = vector.broadcast %cst_97 : f32 to vector<3x26x26xf32>
    %c0_98 = arith.constant 0 : index
    %c0_99 = arith.constant 0 : index
    %c0_100 = arith.constant 0 : index
    %396 = vector.load %arg8[%c0_98, %c0_99, %c0_100] : memref<3x26x26xf32, #tpu.memory_space<vmem>>, vector<3x26x26xf32>
    tpu.vector_store %arg8[%c0_98, %c0_99, %c0_100], %395 {strides = array<i32>} : memref<3x26x26xf32, #tpu.memory_space<vmem>>, vector<3x26x26xf32>,
    %cst_101 = arith.constant 0.000000e+00 : f32
    %397 = vector.broadcast %cst_101 : f32 to vector<24x24xf32>
    %398 = arith.maximumf %386, %397 : vector<24x24xf32>
    %c0_102 = arith.constant 0 : index
    %c1_103 = arith.constant 1 : index
    %c1_104 = arith.constant 1 : index
    %399 = vector.load %arg8[%c0_102, %c1_103, %c1_104] : memref<3x26x26xf32, #tpu.memory_space<vmem>>, vector<1x24x24xf32>
    %400 = vector.shape_cast %399 : vector<1x24x24xf32> to vector<24x24xf32>
    %401 = vector.shape_cast %398 : vector<24x24xf32> to vector<1x24x24xf32>
    tpu.vector_store %arg8[%c0_102, %c1_103, %c1_104], %401 {strides = array<i32>} : memref<3x26x26xf32, #tpu.memory_space<vmem>>, vector<1x24x24xf32>,
    %cst_105 = arith.constant 0.000000e+00 : f32
    %402 = vector.broadcast %cst_105 : f32 to vector<24x24xf32>
    %403 = arith.maximumf %390, %402 : vector<24x24xf32>
    %c1_106 = arith.constant 1 : index
    %c1_107 = arith.constant 1 : index
    %c1_108 = arith.constant 1 : index
    %404 = vector.load %arg8[%c1_106, %c1_107, %c1_108] : memref<3x26x26xf32, #tpu.memory_space<vmem>>, vector<1x24x24xf32>
    %405 = vector.shape_cast %404 : vector<1x24x24xf32> to vector<24x24xf32>
    %406 = vector.shape_cast %403 : vector<24x24xf32> to vector<1x24x24xf32>
    tpu.vector_store %arg8[%c1_106, %c1_107, %c1_108], %406 {strides = array<i32>} : memref<3x26x26xf32, #tpu.memory_space<vmem>>, vector<1x24x24xf32>,
    %cst_109 = arith.constant 0.000000e+00 : f32
    %407 = vector.broadcast %cst_109 : f32 to vector<24x24xf32>
    %408 = arith.maximumf %394, %407 : vector<24x24xf32>
    %c2_110 = arith.constant 2 : index
    %c1_111 = arith.constant 1 : index
    %c1_112 = arith.constant 1 : index
    %409 = vector.load %arg8[%c2_110, %c1_111, %c1_112] : memref<3x26x26xf32, #tpu.memory_space<vmem>>, vector<1x24x24xf32>
    %410 = vector.shape_cast %409 : vector<1x24x24xf32> to vector<24x24xf32>
    %411 = vector.shape_cast %408 : vector<24x24xf32> to vector<1x24x24xf32>
    tpu.vector_store %arg8[%c2_110, %c1_111, %c1_112], %411 {strides = array<i32>} : memref<3x26x26xf32, #tpu.memory_space<vmem>>, vector<1x24x24xf32>,
    %cst_113 = arith.constant 0.000000e+00 : f32
    %412 = vector.broadcast %cst_113 : f32 to vector<24x24xf32>
    %c0_114 = arith.constant 0 : index
    %413 = memref.load %arg5[%c0_114] : memref<3xf32, #tpu.memory_space<smem>>
    %414 = vector.broadcast %413 : f32 to vector<24x24xf32>
    %415 = arith.addf %412, %414 : vector<24x24xf32>
    %cst_115 = arith.constant 0.000000e+00 : f32
    %416 = vector.broadcast %cst_115 : f32 to vector<24x24xf32>
    %c1_116 = arith.constant 1 : index
    %417 = memref.load %arg5[%c1_116] : memref<3xf32, #tpu.memory_space<smem>>
    %418 = vector.broadcast %417 : f32 to vector<24x24xf32>
    %419 = arith.addf %416, %418 : vector<24x24xf32>
    %cst_117 = arith.constant 0.000000e+00 : f32
    %420 = vector.broadcast %cst_117 : f32 to vector<24x24xf32>
    %c2_118 = arith.constant 2 : index
    %421 = memref.load %arg5[%c2_118] : memref<3xf32, #tpu.memory_space<smem>>
    %422 = vector.broadcast %421 : f32 to vector<24x24xf32>
    %423 = arith.addf %420, %422 : vector<24x24xf32>
    %c0_119 = arith.constant 0 : index
    %c0_120 = arith.constant 0 : index
    %c0_121 = arith.constant 0 : index
    %424 = vector.load %arg8[%c0_119, %c0_120, %c0_121] : memref<3x26x26xf32, #tpu.memory_space<vmem>>, vector<1x24x24xf32>
    %425 = vector.shape_cast %424 : vector<1x24x24xf32> to vector<24x24xf32>
    %c0_122 = arith.constant 0 : index
    %426 = memref.load %arg4[%c0_122] : memref<81xf32, #tpu.memory_space<smem>>
    %427 = vector.broadcast %426 : f32 to vector<24x24xf32>
    %428 = arith.mulf %427, %425 : vector<24x24xf32>
    %429 = arith.addf %415, %428 : vector<24x24xf32>
    %c27_123 = arith.constant 27 : index
    %430 = memref.load %arg4[%c27_123] : memref<81xf32, #tpu.memory_space<smem>>
    %431 = vector.broadcast %430 : f32 to vector<24x24xf32>
    %432 = arith.mulf %431, %425 : vector<24x24xf32>
    %433 = arith.addf %419, %432 : vector<24x24xf32>
    %c54_124 = arith.constant 54 : index
    %434 = memref.load %arg4[%c54_124] : memref<81xf32, #tpu.memory_space<smem>>
    %435 = vector.broadcast %434 : f32 to vector<24x24xf32>
    %436 = arith.mulf %435, %425 : vector<24x24xf32>
    %437 = arith.addf %423, %436 : vector<24x24xf32>
    %c0_125 = arith.constant 0 : index
    %c0_126 = arith.constant 0 : index
    %c1_127 = arith.constant 1 : index
    %438 = vector.load %arg8[%c0_125, %c0_126, %c1_127] : memref<3x26x26xf32, #tpu.memory_space<vmem>>, vector<1x24x24xf32>
    %439 = vector.shape_cast %438 : vector<1x24x24xf32> to vector<24x24xf32>
    %c1_128 = arith.constant 1 : index
    %440 = memref.load %arg4[%c1_128] : memref<81xf32, #tpu.memory_space<smem>>
    %441 = vector.broadcast %440 : f32 to vector<24x24xf32>
    %442 = arith.mulf %441, %439 : vector<24x24xf32>
    %443 = arith.addf %429, %442 : vector<24x24xf32>
    %c28_129 = arith.constant 28 : index
    %444 = memref.load %arg4[%c28_129] : memref<81xf32, #tpu.memory_space<smem>>
    %445 = vector.broadcast %444 : f32 to vector<24x24xf32>
    %446 = arith.mulf %445, %439 : vector<24x24xf32>
    %447 = arith.addf %433, %446 : vector<24x24xf32>
    %c55_130 = arith.constant 55 : index
    %448 = memref.load %arg4[%c55_130] : memref<81xf32, #tpu.memory_space<smem>>
    %449 = vector.broadcast %448 : f32 to vector<24x24xf32>
    %450 = arith.mulf %449, %439 : vector<24x24xf32>
    %451 = arith.addf %437, %450 : vector<24x24xf32>
    %c0_131 = arith.constant 0 : index
    %c0_132 = arith.constant 0 : index
    %c2_133 = arith.constant 2 : index
    %452 = vector.load %arg8[%c0_131, %c0_132, %c2_133] : memref<3x26x26xf32, #tpu.memory_space<vmem>>, vector<1x24x24xf32>
    %453 = vector.shape_cast %452 : vector<1x24x24xf32> to vector<24x24xf32>
    %c2_134 = arith.constant 2 : index
    %454 = memref.load %arg4[%c2_134] : memref<81xf32, #tpu.memory_space<smem>>
    %455 = vector.broadcast %454 : f32 to vector<24x24xf32>
    %456 = arith.mulf %455, %453 : vector<24x24xf32>
    %457 = arith.addf %443, %456 : vector<24x24xf32>
    %c29_135 = arith.constant 29 : index
    %458 = memref.load %arg4[%c29_135] : memref<81xf32, #tpu.memory_space<smem>>
    %459 = vector.broadcast %458 : f32 to vector<24x24xf32>
    %460 = arith.mulf %459, %453 : vector<24x24xf32>
    %461 = arith.addf %447, %460 : vector<24x24xf32>
    %c56_136 = arith.constant 56 : index
    %462 = memref.load %arg4[%c56_136] : memref<81xf32, #tpu.memory_space<smem>>
    %463 = vector.broadcast %462 : f32 to vector<24x24xf32>
    %464 = arith.mulf %463, %453 : vector<24x24xf32>
    %465 = arith.addf %451, %464 : vector<24x24xf32>
    %c0_137 = arith.constant 0 : index
    %c1_138 = arith.constant 1 : index
    %c0_139 = arith.constant 0 : index
    %466 = vector.load %arg8[%c0_137, %c1_138, %c0_139] : memref<3x26x26xf32, #tpu.memory_space<vmem>>, vector<1x24x24xf32>
    %467 = vector.shape_cast %466 : vector<1x24x24xf32> to vector<24x24xf32>
    %c3_140 = arith.constant 3 : index
    %468 = memref.load %arg4[%c3_140] : memref<81xf32, #tpu.memory_space<smem>>
    %469 = vector.broadcast %468 : f32 to vector<24x24xf32>
    %470 = arith.mulf %469, %467 : vector<24x24xf32>
    %471 = arith.addf %457, %470 : vector<24x24xf32>
    %c30_141 = arith.constant 30 : index
    %472 = memref.load %arg4[%c30_141] : memref<81xf32, #tpu.memory_space<smem>>
    %473 = vector.broadcast %472 : f32 to vector<24x24xf32>
    %474 = arith.mulf %473, %467 : vector<24x24xf32>
    %475 = arith.addf %461, %474 : vector<24x24xf32>
    %c57_142 = arith.constant 57 : index
    %476 = memref.load %arg4[%c57_142] : memref<81xf32, #tpu.memory_space<smem>>
    %477 = vector.broadcast %476 : f32 to vector<24x24xf32>
    %478 = arith.mulf %477, %467 : vector<24x24xf32>
    %479 = arith.addf %465, %478 : vector<24x24xf32>
    %c0_143 = arith.constant 0 : index
    %c1_144 = arith.constant 1 : index
    %c1_145 = arith.constant 1 : index
    %480 = vector.load %arg8[%c0_143, %c1_144, %c1_145] : memref<3x26x26xf32, #tpu.memory_space<vmem>>, vector<1x24x24xf32>
    %481 = vector.shape_cast %480 : vector<1x24x24xf32> to vector<24x24xf32>
    %c4_146 = arith.constant 4 : index
    %482 = memref.load %arg4[%c4_146] : memref<81xf32, #tpu.memory_space<smem>>
    %483 = vector.broadcast %482 : f32 to vector<24x24xf32>
    %484 = arith.mulf %483, %481 : vector<24x24xf32>
    %485 = arith.addf %471, %484 : vector<24x24xf32>
    %c31_147 = arith.constant 31 : index
    %486 = memref.load %arg4[%c31_147] : memref<81xf32, #tpu.memory_space<smem>>
    %487 = vector.broadcast %486 : f32 to vector<24x24xf32>
    %488 = arith.mulf %487, %481 : vector<24x24xf32>
    %489 = arith.addf %475, %488 : vector<24x24xf32>
    %c58_148 = arith.constant 58 : index
    %490 = memref.load %arg4[%c58_148] : memref<81xf32, #tpu.memory_space<smem>>
    %491 = vector.broadcast %490 : f32 to vector<24x24xf32>
    %492 = arith.mulf %491, %481 : vector<24x24xf32>
    %493 = arith.addf %479, %492 : vector<24x24xf32>
    %c0_149 = arith.constant 0 : index
    %c1_150 = arith.constant 1 : index
    %c2_151 = arith.constant 2 : index
    %494 = vector.load %arg8[%c0_149, %c1_150, %c2_151] : memref<3x26x26xf32, #tpu.memory_space<vmem>>, vector<1x24x24xf32>
    %495 = vector.shape_cast %494 : vector<1x24x24xf32> to vector<24x24xf32>
    %c5_152 = arith.constant 5 : index
    %496 = memref.load %arg4[%c5_152] : memref<81xf32, #tpu.memory_space<smem>>
    %497 = vector.broadcast %496 : f32 to vector<24x24xf32>
    %498 = arith.mulf %497, %495 : vector<24x24xf32>
    %499 = arith.addf %485, %498 : vector<24x24xf32>
    %c32_153 = arith.constant 32 : index
    %500 = memref.load %arg4[%c32_153] : memref<81xf32, #tpu.memory_space<smem>>
    %501 = vector.broadcast %500 : f32 to vector<24x24xf32>
    %502 = arith.mulf %501, %495 : vector<24x24xf32>
    %503 = arith.addf %489, %502 : vector<24x24xf32>
    %c59_154 = arith.constant 59 : index
    %504 = memref.load %arg4[%c59_154] : memref<81xf32, #tpu.memory_space<smem>>
    %505 = vector.broadcast %504 : f32 to vector<24x24xf32>
    %506 = arith.mulf %505, %495 : vector<24x24xf32>
    %507 = arith.addf %493, %506 : vector<24x24xf32>
    %c0_155 = arith.constant 0 : index
    %c2_156 = arith.constant 2 : index
    %c0_157 = arith.constant 0 : index
    %508 = vector.load %arg8[%c0_155, %c2_156, %c0_157] : memref<3x26x26xf32, #tpu.memory_space<vmem>>, vector<1x24x24xf32>
    %509 = vector.shape_cast %508 : vector<1x24x24xf32> to vector<24x24xf32>
    %c6_158 = arith.constant 6 : index
    %510 = memref.load %arg4[%c6_158] : memref<81xf32, #tpu.memory_space<smem>>
    %511 = vector.broadcast %510 : f32 to vector<24x24xf32>
    %512 = arith.mulf %511, %509 : vector<24x24xf32>
    %513 = arith.addf %499, %512 : vector<24x24xf32>
    %c33_159 = arith.constant 33 : index
    %514 = memref.load %arg4[%c33_159] : memref<81xf32, #tpu.memory_space<smem>>
    %515 = vector.broadcast %514 : f32 to vector<24x24xf32>
    %516 = arith.mulf %515, %509 : vector<24x24xf32>
    %517 = arith.addf %503, %516 : vector<24x24xf32>
    %c60_160 = arith.constant 60 : index
    %518 = memref.load %arg4[%c60_160] : memref<81xf32, #tpu.memory_space<smem>>
    %519 = vector.broadcast %518 : f32 to vector<24x24xf32>
    %520 = arith.mulf %519, %509 : vector<24x24xf32>
    %521 = arith.addf %507, %520 : vector<24x24xf32>
    %c0_161 = arith.constant 0 : index
    %c2_162 = arith.constant 2 : index
    %c1_163 = arith.constant 1 : index
    %522 = vector.load %arg8[%c0_161, %c2_162, %c1_163] : memref<3x26x26xf32, #tpu.memory_space<vmem>>, vector<1x24x24xf32>
    %523 = vector.shape_cast %522 : vector<1x24x24xf32> to vector<24x24xf32>
    %c7_164 = arith.constant 7 : index
    %524 = memref.load %arg4[%c7_164] : memref<81xf32, #tpu.memory_space<smem>>
    %525 = vector.broadcast %524 : f32 to vector<24x24xf32>
    %526 = arith.mulf %525, %523 : vector<24x24xf32>
    %527 = arith.addf %513, %526 : vector<24x24xf32>
    %c34_165 = arith.constant 34 : index
    %528 = memref.load %arg4[%c34_165] : memref<81xf32, #tpu.memory_space<smem>>
    %529 = vector.broadcast %528 : f32 to vector<24x24xf32>
    %530 = arith.mulf %529, %523 : vector<24x24xf32>
    %531 = arith.addf %517, %530 : vector<24x24xf32>
    %c61_166 = arith.constant 61 : index
    %532 = memref.load %arg4[%c61_166] : memref<81xf32, #tpu.memory_space<smem>>
    %533 = vector.broadcast %532 : f32 to vector<24x24xf32>
    %534 = arith.mulf %533, %523 : vector<24x24xf32>
    %535 = arith.addf %521, %534 : vector<24x24xf32>
    %c0_167 = arith.constant 0 : index
    %c2_168 = arith.constant 2 : index
    %c2_169 = arith.constant 2 : index
    %536 = vector.load %arg8[%c0_167, %c2_168, %c2_169] : memref<3x26x26xf32, #tpu.memory_space<vmem>>, vector<1x24x24xf32>
    %537 = vector.shape_cast %536 : vector<1x24x24xf32> to vector<24x24xf32>
    %c8_170 = arith.constant 8 : index
    %538 = memref.load %arg4[%c8_170] : memref<81xf32, #tpu.memory_space<smem>>
    %539 = vector.broadcast %538 : f32 to vector<24x24xf32>
    %540 = arith.mulf %539, %537 : vector<24x24xf32>
    %541 = arith.addf %527, %540 : vector<24x24xf32>
    %c35_171 = arith.constant 35 : index
    %542 = memref.load %arg4[%c35_171] : memref<81xf32, #tpu.memory_space<smem>>
    %543 = vector.broadcast %542 : f32 to vector<24x24xf32>
    %544 = arith.mulf %543, %537 : vector<24x24xf32>
    %545 = arith.addf %531, %544 : vector<24x24xf32>
    %c62_172 = arith.constant 62 : index
    %546 = memref.load %arg4[%c62_172] : memref<81xf32, #tpu.memory_space<smem>>
    %547 = vector.broadcast %546 : f32 to vector<24x24xf32>
    %548 = arith.mulf %547, %537 : vector<24x24xf32>
    %549 = arith.addf %535, %548 : vector<24x24xf32>
    %c1_173 = arith.constant 1 : index
    %c0_174 = arith.constant 0 : index
    %c0_175 = arith.constant 0 : index
    %550 = vector.load %arg8[%c1_173, %c0_174, %c0_175] : memref<3x26x26xf32, #tpu.memory_space<vmem>>, vector<1x24x24xf32>
    %551 = vector.shape_cast %550 : vector<1x24x24xf32> to vector<24x24xf32>
    %c9_176 = arith.constant 9 : index
    %552 = memref.load %arg4[%c9_176] : memref<81xf32, #tpu.memory_space<smem>>
    %553 = vector.broadcast %552 : f32 to vector<24x24xf32>
    %554 = arith.mulf %553, %551 : vector<24x24xf32>
    %555 = arith.addf %541, %554 : vector<24x24xf32>
    %c36_177 = arith.constant 36 : index
    %556 = memref.load %arg4[%c36_177] : memref<81xf32, #tpu.memory_space<smem>>
    %557 = vector.broadcast %556 : f32 to vector<24x24xf32>
    %558 = arith.mulf %557, %551 : vector<24x24xf32>
    %559 = arith.addf %545, %558 : vector<24x24xf32>
    %c63_178 = arith.constant 63 : index
    %560 = memref.load %arg4[%c63_178] : memref<81xf32, #tpu.memory_space<smem>>
    %561 = vector.broadcast %560 : f32 to vector<24x24xf32>
    %562 = arith.mulf %561, %551 : vector<24x24xf32>
    %563 = arith.addf %549, %562 : vector<24x24xf32>
    %c1_179 = arith.constant 1 : index
    %c0_180 = arith.constant 0 : index
    %c1_181 = arith.constant 1 : index
    %564 = vector.load %arg8[%c1_179, %c0_180, %c1_181] : memref<3x26x26xf32, #tpu.memory_space<vmem>>, vector<1x24x24xf32>
    %565 = vector.shape_cast %564 : vector<1x24x24xf32> to vector<24x24xf32>
    %c10_182 = arith.constant 10 : index
    %566 = memref.load %arg4[%c10_182] : memref<81xf32, #tpu.memory_space<smem>>
    %567 = vector.broadcast %566 : f32 to vector<24x24xf32>
    %568 = arith.mulf %567, %565 : vector<24x24xf32>
    %569 = arith.addf %555, %568 : vector<24x24xf32>
    %c37_183 = arith.constant 37 : index
    %570 = memref.load %arg4[%c37_183] : memref<81xf32, #tpu.memory_space<smem>>
    %571 = vector.broadcast %570 : f32 to vector<24x24xf32>
    %572 = arith.mulf %571, %565 : vector<24x24xf32>
    %573 = arith.addf %559, %572 : vector<24x24xf32>
    %c64_184 = arith.constant 64 : index
    %574 = memref.load %arg4[%c64_184] : memref<81xf32, #tpu.memory_space<smem>>
    %575 = vector.broadcast %574 : f32 to vector<24x24xf32>
    %576 = arith.mulf %575, %565 : vector<24x24xf32>
    %577 = arith.addf %563, %576 : vector<24x24xf32>
    %c1_185 = arith.constant 1 : index
    %c0_186 = arith.constant 0 : index
    %c2_187 = arith.constant 2 : index
    %578 = vector.load %arg8[%c1_185, %c0_186, %c2_187] : memref<3x26x26xf32, #tpu.memory_space<vmem>>, vector<1x24x24xf32>
    %579 = vector.shape_cast %578 : vector<1x24x24xf32> to vector<24x24xf32>
    %c11_188 = arith.constant 11 : index
    %580 = memref.load %arg4[%c11_188] : memref<81xf32, #tpu.memory_space<smem>>
    %581 = vector.broadcast %580 : f32 to vector<24x24xf32>
    %582 = arith.mulf %581, %579 : vector<24x24xf32>
    %583 = arith.addf %569, %582 : vector<24x24xf32>
    %c38_189 = arith.constant 38 : index
    %584 = memref.load %arg4[%c38_189] : memref<81xf32, #tpu.memory_space<smem>>
    %585 = vector.broadcast %584 : f32 to vector<24x24xf32>
    %586 = arith.mulf %585, %579 : vector<24x24xf32>
    %587 = arith.addf %573, %586 : vector<24x24xf32>
    %c65_190 = arith.constant 65 : index
    %588 = memref.load %arg4[%c65_190] : memref<81xf32, #tpu.memory_space<smem>>
    %589 = vector.broadcast %588 : f32 to vector<24x24xf32>
    %590 = arith.mulf %589, %579 : vector<24x24xf32>
    %591 = arith.addf %577, %590 : vector<24x24xf32>
    %c1_191 = arith.constant 1 : index
    %c1_192 = arith.constant 1 : index
    %c0_193 = arith.constant 0 : index
    %592 = vector.load %arg8[%c1_191, %c1_192, %c0_193] : memref<3x26x26xf32, #tpu.memory_space<vmem>>, vector<1x24x24xf32>
    %593 = vector.shape_cast %592 : vector<1x24x24xf32> to vector<24x24xf32>
    %c12_194 = arith.constant 12 : index
    %594 = memref.load %arg4[%c12_194] : memref<81xf32, #tpu.memory_space<smem>>
    %595 = vector.broadcast %594 : f32 to vector<24x24xf32>
    %596 = arith.mulf %595, %593 : vector<24x24xf32>
    %597 = arith.addf %583, %596 : vector<24x24xf32>
    %c39_195 = arith.constant 39 : index
    %598 = memref.load %arg4[%c39_195] : memref<81xf32, #tpu.memory_space<smem>>
    %599 = vector.broadcast %598 : f32 to vector<24x24xf32>
    %600 = arith.mulf %599, %593 : vector<24x24xf32>
    %601 = arith.addf %587, %600 : vector<24x24xf32>
    %c66_196 = arith.constant 66 : index
    %602 = memref.load %arg4[%c66_196] : memref<81xf32, #tpu.memory_space<smem>>
    %603 = vector.broadcast %602 : f32 to vector<24x24xf32>
    %604 = arith.mulf %603, %593 : vector<24x24xf32>
    %605 = arith.addf %591, %604 : vector<24x24xf32>
    %c1_197 = arith.constant 1 : index
    %c1_198 = arith.constant 1 : index
    %c1_199 = arith.constant 1 : index
    %606 = vector.load %arg8[%c1_197, %c1_198, %c1_199] : memref<3x26x26xf32, #tpu.memory_space<vmem>>, vector<1x24x24xf32>
    %607 = vector.shape_cast %606 : vector<1x24x24xf32> to vector<24x24xf32>
    %c13_200 = arith.constant 13 : index
    %608 = memref.load %arg4[%c13_200] : memref<81xf32, #tpu.memory_space<smem>>
    %609 = vector.broadcast %608 : f32 to vector<24x24xf32>
    %610 = arith.mulf %609, %607 : vector<24x24xf32>
    %611 = arith.addf %597, %610 : vector<24x24xf32>
    %c40_201 = arith.constant 40 : index
    %612 = memref.load %arg4[%c40_201] : memref<81xf32, #tpu.memory_space<smem>>
    %613 = vector.broadcast %612 : f32 to vector<24x24xf32>
    %614 = arith.mulf %613, %607 : vector<24x24xf32>
    %615 = arith.addf %601, %614 : vector<24x24xf32>
    %c67_202 = arith.constant 67 : index
    %616 = memref.load %arg4[%c67_202] : memref<81xf32, #tpu.memory_space<smem>>
    %617 = vector.broadcast %616 : f32 to vector<24x24xf32>
    %618 = arith.mulf %617, %607 : vector<24x24xf32>
    %619 = arith.addf %605, %618 : vector<24x24xf32>
    %c1_203 = arith.constant 1 : index
    %c1_204 = arith.constant 1 : index
    %c2_205 = arith.constant 2 : index
    %620 = vector.load %arg8[%c1_203, %c1_204, %c2_205] : memref<3x26x26xf32, #tpu.memory_space<vmem>>, vector<1x24x24xf32>
    %621 = vector.shape_cast %620 : vector<1x24x24xf32> to vector<24x24xf32>
    %c14_206 = arith.constant 14 : index
    %622 = memref.load %arg4[%c14_206] : memref<81xf32, #tpu.memory_space<smem>>
    %623 = vector.broadcast %622 : f32 to vector<24x24xf32>
    %624 = arith.mulf %623, %621 : vector<24x24xf32>
    %625 = arith.addf %611, %624 : vector<24x24xf32>
    %c41_207 = arith.constant 41 : index
    %626 = memref.load %arg4[%c41_207] : memref<81xf32, #tpu.memory_space<smem>>
    %627 = vector.broadcast %626 : f32 to vector<24x24xf32>
    %628 = arith.mulf %627, %621 : vector<24x24xf32>
    %629 = arith.addf %615, %628 : vector<24x24xf32>
    %c68_208 = arith.constant 68 : index
    %630 = memref.load %arg4[%c68_208] : memref<81xf32, #tpu.memory_space<smem>>
    %631 = vector.broadcast %630 : f32 to vector<24x24xf32>
    %632 = arith.mulf %631, %621 : vector<24x24xf32>
    %633 = arith.addf %619, %632 : vector<24x24xf32>
    %c1_209 = arith.constant 1 : index
    %c2_210 = arith.constant 2 : index
    %c0_211 = arith.constant 0 : index
    %634 = vector.load %arg8[%c1_209, %c2_210, %c0_211] : memref<3x26x26xf32, #tpu.memory_space<vmem>>, vector<1x24x24xf32>
    %635 = vector.shape_cast %634 : vector<1x24x24xf32> to vector<24x24xf32>
    %c15_212 = arith.constant 15 : index
    %636 = memref.load %arg4[%c15_212] : memref<81xf32, #tpu.memory_space<smem>>
    %637 = vector.broadcast %636 : f32 to vector<24x24xf32>
    %638 = arith.mulf %637, %635 : vector<24x24xf32>
    %639 = arith.addf %625, %638 : vector<24x24xf32>
    %c42_213 = arith.constant 42 : index
    %640 = memref.load %arg4[%c42_213] : memref<81xf32, #tpu.memory_space<smem>>
    %641 = vector.broadcast %640 : f32 to vector<24x24xf32>
    %642 = arith.mulf %641, %635 : vector<24x24xf32>
    %643 = arith.addf %629, %642 : vector<24x24xf32>
    %c69_214 = arith.constant 69 : index
    %644 = memref.load %arg4[%c69_214] : memref<81xf32, #tpu.memory_space<smem>>
    %645 = vector.broadcast %644 : f32 to vector<24x24xf32>
    %646 = arith.mulf %645, %635 : vector<24x24xf32>
    %647 = arith.addf %633, %646 : vector<24x24xf32>
    %c1_215 = arith.constant 1 : index
    %c2_216 = arith.constant 2 : index
    %c1_217 = arith.constant 1 : index
    %648 = vector.load %arg8[%c1_215, %c2_216, %c1_217] : memref<3x26x26xf32, #tpu.memory_space<vmem>>, vector<1x24x24xf32>
    %649 = vector.shape_cast %648 : vector<1x24x24xf32> to vector<24x24xf32>
    %c16_218 = arith.constant 16 : index
    %650 = memref.load %arg4[%c16_218] : memref<81xf32, #tpu.memory_space<smem>>
    %651 = vector.broadcast %650 : f32 to vector<24x24xf32>
    %652 = arith.mulf %651, %649 : vector<24x24xf32>
    %653 = arith.addf %639, %652 : vector<24x24xf32>
    %c43_219 = arith.constant 43 : index
    %654 = memref.load %arg4[%c43_219] : memref<81xf32, #tpu.memory_space<smem>>
    %655 = vector.broadcast %654 : f32 to vector<24x24xf32>
    %656 = arith.mulf %655, %649 : vector<24x24xf32>
    %657 = arith.addf %643, %656 : vector<24x24xf32>
    %c70_220 = arith.constant 70 : index
    %658 = memref.load %arg4[%c70_220] : memref<81xf32, #tpu.memory_space<smem>>
    %659 = vector.broadcast %658 : f32 to vector<24x24xf32>
    %660 = arith.mulf %659, %649 : vector<24x24xf32>
    %661 = arith.addf %647, %660 : vector<24x24xf32>
    %c1_221 = arith.constant 1 : index
    %c2_222 = arith.constant 2 : index
    %c2_223 = arith.constant 2 : index
    %662 = vector.load %arg8[%c1_221, %c2_222, %c2_223] : memref<3x26x26xf32, #tpu.memory_space<vmem>>, vector<1x24x24xf32>
    %663 = vector.shape_cast %662 : vector<1x24x24xf32> to vector<24x24xf32>
    %c17_224 = arith.constant 17 : index
    %664 = memref.load %arg4[%c17_224] : memref<81xf32, #tpu.memory_space<smem>>
    %665 = vector.broadcast %664 : f32 to vector<24x24xf32>
    %666 = arith.mulf %665, %663 : vector<24x24xf32>
    %667 = arith.addf %653, %666 : vector<24x24xf32>
    %c44_225 = arith.constant 44 : index
    %668 = memref.load %arg4[%c44_225] : memref<81xf32, #tpu.memory_space<smem>>
    %669 = vector.broadcast %668 : f32 to vector<24x24xf32>
    %670 = arith.mulf %669, %663 : vector<24x24xf32>
    %671 = arith.addf %657, %670 : vector<24x24xf32>
    %c71_226 = arith.constant 71 : index
    %672 = memref.load %arg4[%c71_226] : memref<81xf32, #tpu.memory_space<smem>>
    %673 = vector.broadcast %672 : f32 to vector<24x24xf32>
    %674 = arith.mulf %673, %663 : vector<24x24xf32>
    %675 = arith.addf %661, %674 : vector<24x24xf32>
    %c2_227 = arith.constant 2 : index
    %c0_228 = arith.constant 0 : index
    %c0_229 = arith.constant 0 : index
    %676 = vector.load %arg8[%c2_227, %c0_228, %c0_229] : memref<3x26x26xf32, #tpu.memory_space<vmem>>, vector<1x24x24xf32>
    %677 = vector.shape_cast %676 : vector<1x24x24xf32> to vector<24x24xf32>
    %c18_230 = arith.constant 18 : index
    %678 = memref.load %arg4[%c18_230] : memref<81xf32, #tpu.memory_space<smem>>
    %679 = vector.broadcast %678 : f32 to vector<24x24xf32>
    %680 = arith.mulf %679, %677 : vector<24x24xf32>
    %681 = arith.addf %667, %680 : vector<24x24xf32>
    %c45_231 = arith.constant 45 : index
    %682 = memref.load %arg4[%c45_231] : memref<81xf32, #tpu.memory_space<smem>>
    %683 = vector.broadcast %682 : f32 to vector<24x24xf32>
    %684 = arith.mulf %683, %677 : vector<24x24xf32>
    %685 = arith.addf %671, %684 : vector<24x24xf32>
    %c72_232 = arith.constant 72 : index
    %686 = memref.load %arg4[%c72_232] : memref<81xf32, #tpu.memory_space<smem>>
    %687 = vector.broadcast %686 : f32 to vector<24x24xf32>
    %688 = arith.mulf %687, %677 : vector<24x24xf32>
    %689 = arith.addf %675, %688 : vector<24x24xf32>
    %c2_233 = arith.constant 2 : index
    %c0_234 = arith.constant 0 : index
    %c1_235 = arith.constant 1 : index
    %690 = vector.load %arg8[%c2_233, %c0_234, %c1_235] : memref<3x26x26xf32, #tpu.memory_space<vmem>>, vector<1x24x24xf32>
    %691 = vector.shape_cast %690 : vector<1x24x24xf32> to vector<24x24xf32>
    %c19_236 = arith.constant 19 : index
    %692 = memref.load %arg4[%c19_236] : memref<81xf32, #tpu.memory_space<smem>>
    %693 = vector.broadcast %692 : f32 to vector<24x24xf32>
    %694 = arith.mulf %693, %691 : vector<24x24xf32>
    %695 = arith.addf %681, %694 : vector<24x24xf32>
    %c46_237 = arith.constant 46 : index
    %696 = memref.load %arg4[%c46_237] : memref<81xf32, #tpu.memory_space<smem>>
    %697 = vector.broadcast %696 : f32 to vector<24x24xf32>
    %698 = arith.mulf %697, %691 : vector<24x24xf32>
    %699 = arith.addf %685, %698 : vector<24x24xf32>
    %c73_238 = arith.constant 73 : index
    %700 = memref.load %arg4[%c73_238] : memref<81xf32, #tpu.memory_space<smem>>
    %701 = vector.broadcast %700 : f32 to vector<24x24xf32>
    %702 = arith.mulf %701, %691 : vector<24x24xf32>
    %703 = arith.addf %689, %702 : vector<24x24xf32>
    %c2_239 = arith.constant 2 : index
    %c0_240 = arith.constant 0 : index
    %c2_241 = arith.constant 2 : index
    %704 = vector.load %arg8[%c2_239, %c0_240, %c2_241] : memref<3x26x26xf32, #tpu.memory_space<vmem>>, vector<1x24x24xf32>
    %705 = vector.shape_cast %704 : vector<1x24x24xf32> to vector<24x24xf32>
    %c20_242 = arith.constant 20 : index
    %706 = memref.load %arg4[%c20_242] : memref<81xf32, #tpu.memory_space<smem>>
    %707 = vector.broadcast %706 : f32 to vector<24x24xf32>
    %708 = arith.mulf %707, %705 : vector<24x24xf32>
    %709 = arith.addf %695, %708 : vector<24x24xf32>
    %c47_243 = arith.constant 47 : index
    %710 = memref.load %arg4[%c47_243] : memref<81xf32, #tpu.memory_space<smem>>
    %711 = vector.broadcast %710 : f32 to vector<24x24xf32>
    %712 = arith.mulf %711, %705 : vector<24x24xf32>
    %713 = arith.addf %699, %712 : vector<24x24xf32>
    %c74_244 = arith.constant 74 : index
    %714 = memref.load %arg4[%c74_244] : memref<81xf32, #tpu.memory_space<smem>>
    %715 = vector.broadcast %714 : f32 to vector<24x24xf32>
    %716 = arith.mulf %715, %705 : vector<24x24xf32>
    %717 = arith.addf %703, %716 : vector<24x24xf32>
    %c2_245 = arith.constant 2 : index
    %c1_246 = arith.constant 1 : index
    %c0_247 = arith.constant 0 : index
    %718 = vector.load %arg8[%c2_245, %c1_246, %c0_247] : memref<3x26x26xf32, #tpu.memory_space<vmem>>, vector<1x24x24xf32>
    %719 = vector.shape_cast %718 : vector<1x24x24xf32> to vector<24x24xf32>
    %c21_248 = arith.constant 21 : index
    %720 = memref.load %arg4[%c21_248] : memref<81xf32, #tpu.memory_space<smem>>
    %721 = vector.broadcast %720 : f32 to vector<24x24xf32>
    %722 = arith.mulf %721, %719 : vector<24x24xf32>
    %723 = arith.addf %709, %722 : vector<24x24xf32>
    %c48_249 = arith.constant 48 : index
    %724 = memref.load %arg4[%c48_249] : memref<81xf32, #tpu.memory_space<smem>>
    %725 = vector.broadcast %724 : f32 to vector<24x24xf32>
    %726 = arith.mulf %725, %719 : vector<24x24xf32>
    %727 = arith.addf %713, %726 : vector<24x24xf32>
    %c75_250 = arith.constant 75 : index
    %728 = memref.load %arg4[%c75_250] : memref<81xf32, #tpu.memory_space<smem>>
    %729 = vector.broadcast %728 : f32 to vector<24x24xf32>
    %730 = arith.mulf %729, %719 : vector<24x24xf32>
    %731 = arith.addf %717, %730 : vector<24x24xf32>
    %c2_251 = arith.constant 2 : index
    %c1_252 = arith.constant 1 : index
    %c1_253 = arith.constant 1 : index
    %732 = vector.load %arg8[%c2_251, %c1_252, %c1_253] : memref<3x26x26xf32, #tpu.memory_space<vmem>>, vector<1x24x24xf32>
    %733 = vector.shape_cast %732 : vector<1x24x24xf32> to vector<24x24xf32>
    %c22_254 = arith.constant 22 : index
    %734 = memref.load %arg4[%c22_254] : memref<81xf32, #tpu.memory_space<smem>>
    %735 = vector.broadcast %734 : f32 to vector<24x24xf32>
    %736 = arith.mulf %735, %733 : vector<24x24xf32>
    %737 = arith.addf %723, %736 : vector<24x24xf32>
    %c49_255 = arith.constant 49 : index
    %738 = memref.load %arg4[%c49_255] : memref<81xf32, #tpu.memory_space<smem>>
    %739 = vector.broadcast %738 : f32 to vector<24x24xf32>
    %740 = arith.mulf %739, %733 : vector<24x24xf32>
    %741 = arith.addf %727, %740 : vector<24x24xf32>
    %c76_256 = arith.constant 76 : index
    %742 = memref.load %arg4[%c76_256] : memref<81xf32, #tpu.memory_space<smem>>
    %743 = vector.broadcast %742 : f32 to vector<24x24xf32>
    %744 = arith.mulf %743, %733 : vector<24x24xf32>
    %745 = arith.addf %731, %744 : vector<24x24xf32>
    %c2_257 = arith.constant 2 : index
    %c1_258 = arith.constant 1 : index
    %c2_259 = arith.constant 2 : index
    %746 = vector.load %arg8[%c2_257, %c1_258, %c2_259] : memref<3x26x26xf32, #tpu.memory_space<vmem>>, vector<1x24x24xf32>
    %747 = vector.shape_cast %746 : vector<1x24x24xf32> to vector<24x24xf32>
    %c23_260 = arith.constant 23 : index
    %748 = memref.load %arg4[%c23_260] : memref<81xf32, #tpu.memory_space<smem>>
    %749 = vector.broadcast %748 : f32 to vector<24x24xf32>
    %750 = arith.mulf %749, %747 : vector<24x24xf32>
    %751 = arith.addf %737, %750 : vector<24x24xf32>
    %c50_261 = arith.constant 50 : index
    %752 = memref.load %arg4[%c50_261] : memref<81xf32, #tpu.memory_space<smem>>
    %753 = vector.broadcast %752 : f32 to vector<24x24xf32>
    %754 = arith.mulf %753, %747 : vector<24x24xf32>
    %755 = arith.addf %741, %754 : vector<24x24xf32>
    %c77_262 = arith.constant 77 : index
    %756 = memref.load %arg4[%c77_262] : memref<81xf32, #tpu.memory_space<smem>>
    %757 = vector.broadcast %756 : f32 to vector<24x24xf32>
    %758 = arith.mulf %757, %747 : vector<24x24xf32>
    %759 = arith.addf %745, %758 : vector<24x24xf32>
    %c2_263 = arith.constant 2 : index
    %c2_264 = arith.constant 2 : index
    %c0_265 = arith.constant 0 : index
    %760 = vector.load %arg8[%c2_263, %c2_264, %c0_265] : memref<3x26x26xf32, #tpu.memory_space<vmem>>, vector<1x24x24xf32>
    %761 = vector.shape_cast %760 : vector<1x24x24xf32> to vector<24x24xf32>
    %c24_266 = arith.constant 24 : index
    %762 = memref.load %arg4[%c24_266] : memref<81xf32, #tpu.memory_space<smem>>
    %763 = vector.broadcast %762 : f32 to vector<24x24xf32>
    %764 = arith.mulf %763, %761 : vector<24x24xf32>
    %765 = arith.addf %751, %764 : vector<24x24xf32>
    %c51_267 = arith.constant 51 : index
    %766 = memref.load %arg4[%c51_267] : memref<81xf32, #tpu.memory_space<smem>>
    %767 = vector.broadcast %766 : f32 to vector<24x24xf32>
    %768 = arith.mulf %767, %761 : vector<24x24xf32>
    %769 = arith.addf %755, %768 : vector<24x24xf32>
    %c78_268 = arith.constant 78 : index
    %770 = memref.load %arg4[%c78_268] : memref<81xf32, #tpu.memory_space<smem>>
    %771 = vector.broadcast %770 : f32 to vector<24x24xf32>
    %772 = arith.mulf %771, %761 : vector<24x24xf32>
    %773 = arith.addf %759, %772 : vector<24x24xf32>
    %c2_269 = arith.constant 2 : index
    %c2_270 = arith.constant 2 : index
    %c1_271 = arith.constant 1 : index
    %774 = vector.load %arg8[%c2_269, %c2_270, %c1_271] : memref<3x26x26xf32, #tpu.memory_space<vmem>>, vector<1x24x24xf32>
    %775 = vector.shape_cast %774 : vector<1x24x24xf32> to vector<24x24xf32>
    %c25_272 = arith.constant 25 : index
    %776 = memref.load %arg4[%c25_272] : memref<81xf32, #tpu.memory_space<smem>>
    %777 = vector.broadcast %776 : f32 to vector<24x24xf32>
    %778 = arith.mulf %777, %775 : vector<24x24xf32>
    %779 = arith.addf %765, %778 : vector<24x24xf32>
    %c52_273 = arith.constant 52 : index
    %780 = memref.load %arg4[%c52_273] : memref<81xf32, #tpu.memory_space<smem>>
    %781 = vector.broadcast %780 : f32 to vector<24x24xf32>
    %782 = arith.mulf %781, %775 : vector<24x24xf32>
    %783 = arith.addf %769, %782 : vector<24x24xf32>
    %c79_274 = arith.constant 79 : index
    %784 = memref.load %arg4[%c79_274] : memref<81xf32, #tpu.memory_space<smem>>
    %785 = vector.broadcast %784 : f32 to vector<24x24xf32>
    %786 = arith.mulf %785, %775 : vector<24x24xf32>
    %787 = arith.addf %773, %786 : vector<24x24xf32>
    %c2_275 = arith.constant 2 : index
    %c2_276 = arith.constant 2 : index
    %c2_277 = arith.constant 2 : index
    %788 = vector.load %arg8[%c2_275, %c2_276, %c2_277] : memref<3x26x26xf32, #tpu.memory_space<vmem>>, vector<1x24x24xf32>
    %789 = vector.shape_cast %788 : vector<1x24x24xf32> to vector<24x24xf32>
    %c26_278 = arith.constant 26 : index
    %790 = memref.load %arg4[%c26_278] : memref<81xf32, #tpu.memory_space<smem>>
    %791 = vector.broadcast %790 : f32 to vector<24x24xf32>
    %792 = arith.mulf %791, %789 : vector<24x24xf32>
    %793 = arith.addf %779, %792 : vector<24x24xf32>
    %c53_279 = arith.constant 53 : index
    %794 = memref.load %arg4[%c53_279] : memref<81xf32, #tpu.memory_space<smem>>
    %795 = vector.broadcast %794 : f32 to vector<24x24xf32>
    %796 = arith.mulf %795, %789 : vector<24x24xf32>
    %797 = arith.addf %783, %796 : vector<24x24xf32>
    %c80_280 = arith.constant 80 : index
    %798 = memref.load %arg4[%c80_280] : memref<81xf32, #tpu.memory_space<smem>>
    %799 = vector.broadcast %798 : f32 to vector<24x24xf32>
    %800 = arith.mulf %799, %789 : vector<24x24xf32>
    %801 = arith.addf %787, %800 : vector<24x24xf32>
    %c0_281 = arith.constant 0 : index
    %c0_282 = arith.constant 0 : index
    %c0_283 = arith.constant 0 : index
    %c0_284 = arith.constant 0 : index
    %802 = vector.load %arg1[%c0_281, %c0_282, %c0_283, %c0_284] : memref<1x3x24x24xf32, #tpu.memory_space<vmem>>, vector<1x1x24x24xf32>
    %803 = vector.shape_cast %802 : vector<1x1x24x24xf32> to vector<24x24xf32>
    %804 = arith.addf %803, %793 : vector<24x24xf32>
    %c0_285 = arith.constant 0 : index
    %c0_286 = arith.constant 0 : index
    %c0_287 = arith.constant 0 : index
    %c0_288 = arith.constant 0 : index
    %805 = vector.load %arg6[%c0_285, %c0_286, %c0_287, %c0_288] : memref<1x3x24x24xf32, #tpu.memory_space<vmem>>, vector<1x1x24x24xf32>
    %806 = vector.shape_cast %805 : vector<1x1x24x24xf32> to vector<24x24xf32>
    %807 = vector.shape_cast %804 : vector<24x24xf32> to vector<1x1x24x24xf32>
    tpu.vector_store %arg6[%c0_285, %c0_286, %c0_287, %c0_288], %807 {strides = array<i32>} : memref<1x3x24x24xf32, #tpu.memory_space<vmem>>, vector<1x1x24x24xf32>,
    %c0_289 = arith.constant 0 : index
    %c1_290 = arith.constant 1 : index
    %c0_291 = arith.constant 0 : index
    %c0_292 = arith.constant 0 : index
    %808 = vector.load %arg1[%c0_289, %c1_290, %c0_291, %c0_292] : memref<1x3x24x24xf32, #tpu.memory_space<vmem>>, vector<1x1x24x24xf32>
    %809 = vector.shape_cast %808 : vector<1x1x24x24xf32> to vector<24x24xf32>
    %810 = arith.addf %809, %797 : vector<24x24xf32>
    %c0_293 = arith.constant 0 : index
    %c1_294 = arith.constant 1 : index
    %c0_295 = arith.constant 0 : index
    %c0_296 = arith.constant 0 : index
    %811 = vector.load %arg6[%c0_293, %c1_294, %c0_295, %c0_296] : memref<1x3x24x24xf32, #tpu.memory_space<vmem>>, vector<1x1x24x24xf32>
    %812 = vector.shape_cast %811 : vector<1x1x24x24xf32> to vector<24x24xf32>
    %813 = vector.shape_cast %810 : vector<24x24xf32> to vector<1x1x24x24xf32>
    tpu.vector_store %arg6[%c0_293, %c1_294, %c0_295, %c0_296], %813 {strides = array<i32>} : memref<1x3x24x24xf32, #tpu.memory_space<vmem>>, vector<1x1x24x24xf32>,
    %c0_297 = arith.constant 0 : index
    %c2_298 = arith.constant 2 : index
    %c0_299 = arith.constant 0 : index
    %c0_300 = arith.constant 0 : index
    %814 = vector.load %arg1[%c0_297, %c2_298, %c0_299, %c0_300] : memref<1x3x24x24xf32, #tpu.memory_space<vmem>>, vector<1x1x24x24xf32>
    %815 = vector.shape_cast %814 : vector<1x1x24x24xf32> to vector<24x24xf32>
    %816 = arith.addf %815, %801 : vector<24x24xf32>
    %c0_301 = arith.constant 0 : index
    %c2_302 = arith.constant 2 : index
    %c0_303 = arith.constant 0 : index
    %c0_304 = arith.constant 0 : index
    %817 = vector.load %arg6[%c0_301, %c2_302, %c0_303, %c0_304] : memref<1x3x24x24xf32, #tpu.memory_space<vmem>>, vector<1x1x24x24xf32>
    %818 = vector.shape_cast %817 : vector<1x1x24x24xf32> to vector<24x24xf32>
    %819 = vector.shape_cast %816 : vector<24x24xf32> to vector<1x1x24x24xf32>
    tpu.vector_store %arg6[%c0_301, %c2_302, %c0_303, %c0_304], %819 {strides = array<i32>} : memref<1x3x24x24xf32, #tpu.memory_space<vmem>>, vector<1x1x24x24xf32>,
    return
  }
  func.func @transform_0(%arg0: i32) -> (i32, i32, i32, i32) {
    %c0_i32 = arith.constant 0 : i32
    %c0_i32_0 = arith.constant 0 : i32
    %c0_i32_1 = arith.constant 0 : i32
    %c0_i32_2 = arith.constant 0 : i32
    return %arg0, %c0_i32, %c0_i32_0, %c0_i32_1 : i32, i32, i32, i32
  }
  func.func @transform_1(%arg0: i32) -> i32 {
    %c0_i32 = arith.constant 0 : i32
    %c0_i32_0 = arith.constant 0 : i32
    return %c0_i32 : i32
  }
  func.func @transform_2(%arg0: i32) -> i32 {
    %c0_i32 = arith.constant 0 : i32
    %c0_i32_0 = arith.constant 0 : i32
    return %c0_i32 : i32
  }
  func.func @transform_3(%arg0: i32) -> i32 {
    %c0_i32 = arith.constant 0 : i32
    %c0_i32_0 = arith.constant 0 : i32
    return %c0_i32 : i32
  }
  func.func @transform_4(%arg0: i32) -> i32 {
    %c0_i32 = arith.constant 0 : i32
    %c0_i32_0 = arith.constant 0 : i32
    return %c0_i32 : i32
  }
  func.func @transform_5(%arg0: i32) -> (i32, i32, i32, i32) {
    %c0_i32 = arith.constant 0 : i32
    %c0_i32_0 = arith.constant 0 : i32
    %c0_i32_1 = arith.constant 0 : i32
    %c0_i32_2 = arith.constant 0 : i32
    return %arg0, %c0_i32, %c0_i32_0, %c0_i32_1 : i32, i32, i32, i32
  }
}

</mosaic_0001>

<bundles_post_ra>
// kernel: model_ae_forward.2
= control target key start
LH: loop header
LB: loop body
LE: loop exit
PB: predicated region body
PF: predicated region fallthrough
CT: control target
= control target key end

     0   :  { %v274_v0 = vmov 0.0   ;;  %vm57_vm0 = vcmask 523264   ;;  %vm163_vm1 = vcmask 130048   ;;  %v153_v45 = vlaneseq  ;;  %s464_s1 = inlined_call_operand.vmem [shape: f32[192,16], index: 1, kind: input, shape index: {}]   ;;  %s465_s0 = inlined_call_operand.vmem [shape: f32[24,192], index: 0, kind: input, shape index: {}]   ;;  %s466_s3 = inlined_call_operand.vmem [shape: f32[16,192], index: 3, kind: input, shape index: {}]   ;;  %s467_s2 = inlined_call_operand.vmem [shape: f32[1,16], index: 2, kind: input, shape index: {}]   ;;  %s468_s4 = inlined_call_operand.vmem [shape: f32[1,192], index: 4, kind: input, shape index: {}]   ;;  %s469_s5 = inlined_call_operand.vmem [shape: f32[24,192], index: 5, kind: output, shape index: {}]  }
   0x1   :  { %67 = vmatprep.subr.mxu0 %v274_v0  ;;  %v41_v1 = vld [vmem:[%s464_s1 + $0x78] sm:$0xff]  ;;  %v40_v2 = vld [vmem:[%s464_s1 + $0x70] sm:$0xff]  ;;  %237 = vmatprep.mubr.f32.mxu1 %v274_v0  ;;  %v39_v3 = vld [vmem:[%s464_s1 + $0x68] sm:$0xff] }
   0x2   :  { %68 = vmatpush1.msra.mxu0 %v41_v1  ;;  %v38_v4 = vld [vmem:[%s464_s1 + $0x60] sm:$0xff]  ;;  %v37_v5 = vld [vmem:[%s464_s1 + $0x58] sm:$0xff]  ;;  %v36_v6 = vld [vmem:[%s464_s1 + $0x50] sm:$0xff]  ;;  %v154_v46 = vshrl.u32 %v153_v45, 7 }
   0x3   :  { %69 = vmatprep.subr.mxu0 %v274_v0  ;;  %v21_v7 = vld [vmem:[%s465_s0 + $0x8] sm:$0xff]  ;;  %v150_v9 = vld [vmem:[%s466_s3 + $0x18] sm:$0xff]  ;;  %v34_v10 = vld [vmem:[%s464_s1 + $0x40] sm:$0xff] }
   0x4   :  { %70 = vmatpush1.msra.mxu0 %v40_v2  ;;  %267 = vmatprep.mubr.msk.f32.mxu0 %vm57_vm0, %v21_v7  ;;  %v35_v8 = vld [vmem:[%s464_s1 + $0x48] sm:$0xff]  ;;  %v33_v11 = vld [vmem:[%s464_s1 + $0x38] sm:$0xff]  ;;  %v32_v12 = vld [vmem:[%s464_s1 + $0x30] sm:$0xff]  ;;  %v155_v47 = vsub.s32 0, %v154_v46  ;;  %v159_v49 = vsub.s32 1, %v154_v46 }
   0x5   :  { %71 = vmatprep.subr.mxu0 %v274_v0  ;;  %201 = vmatprep.subr.mxu1 %v150_v9  ;;  %v31_v13 = vld [vmem:[%s464_s1 + $0x28] sm:$0xff]  ;;  %v30_v14 = vld [vmem:[%s464_s1 + $0x20] sm:$0xff]  ;;  %v29_v15 = vld [vmem:[%s464_s1 + $0x18] sm:$0xff] }
   0x6   :  { %72 = vmatpush1.msra.mxu0 %v39_v3  ;;  %v28_v16 = vld [vmem:[%s464_s1 + $0x10] sm:$0xff]  ;;  %v27_v17 = vld [vmem:[%s464_s1 + $0x8] sm:$0xff]  ;;  %v26_v18 = vld [vmem:[%s464_s1] sm:$0xff] }
   0x7   :  { %73 = vmatprep.subr.mxu0 %v274_v0  ;;  %v49_v19 = vld [vmem:[%s464_s1 + $0xb8] sm:$0xff]  ;;  %v48_v20 = vld [vmem:[%s464_s1 + $0xb0] sm:$0xff]  ;;  %v47_v21 = vld [vmem:[%s464_s1 + $0xa8] sm:$0xff] }
   0x8   :  { %74 = vmatpush1.msra.mxu0 %v38_v4  ;;  %v46_v22 = vld [vmem:[%s464_s1 + $0xa0] sm:$0xff]  ;;  %v45_v23 = vld [vmem:[%s464_s1 + $0x98] sm:$0xff]  ;;  %v44_v24 = vld [vmem:[%s464_s1 + $0x90] sm:$0xff] }
   0x9   :  { %75 = vmatprep.subr.mxu0 %v274_v0  ;;  %v43_v25 = vld [vmem:[%s464_s1 + $0x88] sm:$0xff]  ;;  %v42_v26 = vld [vmem:[%s464_s1 + $0x80] sm:$0xff]  ;;  %v23_v28 = vld [vmem:[%s465_s0 + $0x18] sm:$0xff] }
   0xa   :  { %76 = vmatpush1.msra.mxu0 %v37_v5  ;;  %v20_v27 = vld [vmem:[%s465_s0] sm:$0xff]  ;;  %v22_v29 = vld [vmem:[%s465_s0 + $0x10] sm:$0xff]  ;;  %v25_v30 = vld [vmem:[%s465_s0 + $0x28] sm:$0xff] }
   0xb   :  { %77 = vmatprep.subr.mxu0 %v274_v0  ;;  %v24_v31 = vld [vmem:[%s465_s0 + $0x20] sm:$0xff]  ;;  %v149_v32 = vld [vmem:[%s466_s3 + $0x10] sm:$0xff]  ;;  %v148_v33 = vld [vmem:[%s466_s3 + $0x8] sm:$0xff] }
   0xc   :  { %78 = vmatpush1.msra.mxu0 %v36_v6  ;;  %202 = vmatpush1.msra.mxu1 %v149_v32  ;;  %v147_v34 = vld [vmem:[%s466_s3] sm:$0xff] }
   0xd   :  { %79 = vmatprep.subr.mxu0 %v274_v0  ;;  %203 = vmatprep.subr.mxu1 %v148_v33  ;;  %v266_v35 = vld [vmem:[%s467_s2] ss:$0 sm:$0xff] }
   0xe   :  { %80 = vmatpush1.msra.mxu0 %v35_v8  ;;  %204 = vmatpush1.msra.mxu1 %v147_v34  ;;  %v151_v48 = vld [vmem:[%s468_s4] sm:$0x3] }
   0xf   :  { %81 = vmatprep.subr.mxu0 %v274_v0  ;;  %v156_v50 = vrot.slane %v151_v48, %v155_v47  ;;  %v160_v51 = vrot.slane %v151_v48, %v159_v49 }
  0x10   :  { %82 = vmatpush1.msra.mxu0 %v34_v10 }
  0x11   :  { %83 = vmatprep.subr.mxu0 %v274_v0 }
  0x12   :  { %84 = vmatpush1.msra.mxu0 %v33_v11 }
  0x13   :  { %85 = vmatprep.subr.mxu0 %v274_v0 }
  0x14   :  { %86 = vmatpush1.msra.mxu0 %v32_v12 }
  0x15   :  { %87 = vmatprep.subr.mxu0 %v274_v0 }
  0x16   :  { %88 = vmatpush1.msra.mxu0 %v31_v13 }
  0x17   :  { %89 = vmatprep.subr.mxu0 %v274_v0 }
  0x18   :  { %90 = vmatpush1.msra.mxu0 %v30_v14 }
  0x19   :  { %91 = vmatprep.subr.mxu0 %v274_v0 }
  0x1a   :  { %92 = vmatpush1.msra.mxu0 %v29_v15 }
  0x1b   :  { %93 = vmatprep.subr.mxu0 %v274_v0 }
  0x1c   :  { %94 = vmatpush1.msra.mxu0 %v28_v16 }
  0x1d   :  { %95 = vmatprep.subr.mxu0 %v274_v0 }
  0x1e   :  { %96 = vmatpush1.msra.mxu0 %v27_v17 }
  0x1f   :  { %97 = vmatprep.subr.mxu0 %v274_v0 }
  0x20   :  { %98 = vmatpush1.msra.mxu0 %v26_v18 }
  0x21   :  { %115 = vmatprep.subr.mxu0 %v274_v0 }
  0x22   :  { %116 = vmatpush2.msra.mxu0 %v49_v19 }
  0x23   :  { %117 = vmatprep.subr.mxu0 %v274_v0 }
  0x24   :  { %118 = vmatpush2.msra.mxu0 %v48_v20 }
  0x25   :  { %119 = vmatprep.subr.mxu0 %v274_v0 }
  0x26   :  { %120 = vmatpush2.msra.mxu0 %v47_v21 }
  0x27   :  { %121 = vmatprep.subr.mxu0 %v274_v0 }
  0x28   :  { %122 = vmatpush2.msra.mxu0 %v46_v22 }
  0x29   :  { %123 = vmatprep.subr.mxu0 %v274_v0 }
  0x2a   :  { %124 = vmatpush2.msra.mxu0 %v45_v23 }
  0x2b   :  { %125 = vmatprep.subr.mxu0 %v274_v0 }
  0x2c   :  { %126 = vmatpush2.msra.mxu0 %v44_v24 }
  0x2d   :  { %127 = vmatprep.subr.mxu0 %v274_v0 }
  0x2e   :  { %128 = vmatpush2.msra.mxu0 %v43_v25 }
  0x2f   :  { %129 = vmatprep.subr.mxu0 %v274_v0 }
  0x30   :  { %130 = vmatpush2.msra.mxu0 %v42_v26 }
  0x31   :  { %132 = vmatmul.mubr.f32.vlgmr.msra.gmra.mxu0 %v20_v27 }
  0x32   :  { %268 = vmatprep.mubr.msk.f32.mxu0 %vm57_vm0, %v23_v28 }
  0x35   :  { %137 = vmatmul.mubr.f32.gmra.mxu0 %v22_v29 }
  0x36   :  { %269 = vmatprep.mubr.msk.f32.mxu0 %vm57_vm0, %v25_v30 }
  0x39   :  { %142 = vmatmul.mubr.f32.gmra.mxu0 %v24_v31 }
  0xf1   :  { %v133_v36 = vpop.f32.mrf.mxu0 }
  0xf2   :  { %v134_v37 = vadd.f32 %v266_v35, %v133_v36 }
  0xf3   :  { %v135_v38 = vpop.f32.mrf.mxu0 }
  0xf4   :  { %270 = vmatmul.mubr.msk.f32.vlgmr.msra.gmra.mxu1 %vm163_vm1, %v134_v37 }
  0xf5   :  { %v138_v39 = vpop.f32.mrf.mxu0  ;;  %243 = vmatprep.mubr.f32.mxu1 %v274_v0 }
  0xf6   :  { %v139_v40 = vadd.f32 %v266_v35, %v138_v39 }
  0xf7   :  { %v140_v41 = vpop.f32.mrf.mxu0 }
  0xf8   :  { %271 = vmatmul.mubr.msk.f32.gmra.mxu1 %vm163_vm1, %v139_v40 }
  0xf9   :  { %v143_v42 = vpop.f32.mrf.mxu0  ;;  %249 = vmatprep.mubr.f32.mxu1 %v274_v0 }
  0xfa   :  { %v144_v43 = vadd.f32 %v266_v35, %v143_v42 }
  0xfb   :  { %v145_v44 = vpop.f32.mrf.mxu0 }
  0xfc   :  { %272 = vmatmul.mubr.msk.f32.gmra.mxu1 %vm163_vm1, %v144_v43 }
 0x1b4   :  { %v239_v52 = vpop.f32.mrf.mxu1 }
 0x1b5   :  { %v240_v53 = vadd.f32 %v239_v52, %v156_v50 }
 0x1b6   :  { %v241_v54 = vpop.f32.mrf.mxu1 }
 0x1b7   :  { %256 = vst [vmem:[%s469_s5] sm:$0xff] %v240_v53  ;;  %v242_v55 = vadd.f32 %v241_v54, %v160_v51 }
 0x1b8   :  { %v245_v56 = vpop.f32.mrf.mxu1 }
 0x1b9   :  { %257 = vst.msk [vmem:[%s469_s5 + $0x8] sm:$0xff] %vm57_vm0, %v242_v55  ;;  %v246_v57 = vadd.f32 %v245_v56, %v156_v50 }
 0x1ba   :  { %v247_v58 = vpop.f32.mrf.mxu1 }
 0x1bb   :  { %258 = vst [vmem:[%s469_s5 + $0x10] sm:$0xff] %v246_v57  ;;  %v248_v59 = vadd.f32 %v247_v58, %v160_v51 }
 0x1bc   :  { %v251_v60 = vpop.f32.mrf.mxu1 }
 0x1bd   :  { %259 = vst.msk [vmem:[%s469_s5 + $0x18] sm:$0xff] %vm57_vm0, %v248_v59  ;;  %v252_v61 = vadd.f32 %v251_v60, %v156_v50 }
 0x1be   :  { %v253_v62 = vpop.f32.mrf.mxu1 }
 0x1bf   :  { %260 = vst [vmem:[%s469_s5 + $0x20] sm:$0xff] %v252_v61  ;;  %v254_v63 = vadd.f32 %v253_v62, %v160_v51 }
 0x1c1   :  { %261 = vst.msk [vmem:[%s469_s5 + $0x28] sm:$0xff] %vm57_vm0, %v254_v63 }

// kernel: model_ae_forward.3
= control target key start
LH: loop header
LB: loop body
LE: loop exit
PB: predicated region body
PF: predicated region fallthrough
CT: control target
= control target key end

     0   :  { %10 = vsyncpa [#allocation5], 0  ;;  %s5127_s0 = inlined_call_operand.vmem [shape: f32[2,3,24,24], index: 0, kind: input, shape index: {}, may-alias: {0,5}]   ;;  %s5128_s1 = inlined_call_operand.vmem [shape: f32[81], index: 1, kind: input, shape index: {}]   ;;  %s5129_s2 = inlined_call_operand.vmem [shape: f32[3], index: 2, kind: input, shape index: {}]   ;;  %s5130_s3 = inlined_call_operand.vmem [shape: f32[81], index: 3, kind: input, shape index: {}]   ;;  %s5131_s4 = inlined_call_operand.vmem [shape: f32[3], index: 4, kind: input, shape index: {}]   ;;  %s5132_s5 = inlined_call_operand.vmem [shape: f32[2,3,24,24], index: 5, kind: output, shape index: {}, may-alias: {0,5}]  }
   0x1   :  { %11 = vsyncpa [#allocation7], 0 }
   0x2   :  { %12 = vsyncpa [#allocation10], 0  ;;  %s3573_s18 = smov 0  }
   0x3 LB: > { %s183_s21 = sshll.u32 %s5129_s2, 4  ;;  %s3582_s22 = sadd.s32 4294967295, %s3533_s18   ;;  %s3533_s18 = sphi %s3573_s18, %s18_s18   ;;  %s184_s21 = int_to_ptr.vmem [resolvable:$true] %s183_s21 }
   0x4   : > { %p3210_p0 = scmp.ge.s32.totalorder %s3533_s18, 1  ;;  %p159_p1 = scmp.lt.s32.totalorder %s3533_s18, 3 }
   0x5   : > { %p3431_p2 = scmp.eq.s32.totalorder %s3582_s22, 0  ;;  %s172_s26 = sshll.u32 %s5128_s1, 4  ;;  %s3594_s26 = int_to_ptr.vmem [resolvable:$true] %s172_s26 }
   0x6   : > { %p3587_p3 = pnand %p3210_p0, %p159_p1  ;;  %s194_s29 = sshll.u32 %s5130_s3, 4  ;;  %s3601_s29 = int_to_ptr.vmem [resolvable:$true] %s194_s29 }
   0x7   : > { %s205_s8 = sshll.u32 %s5131_s4, 4  ;;  %s3455_s9 = scalar_lea.vmem %s184_s21, 16  ;;  %s3612_s8 = int_to_ptr.vmem [resolvable:$true] %s205_s8 }
   0x8   : > { %p3418_p4 = pneg %p3587_p3  ;;  %p3456_p6 = scmp.ne.s32.totalorder %s184_s21, %s3455_s9 }
   0x9   : > { %p3463_p10 = scmp.lt.s32.totalorder %s184_s21, %s184_s21  ;;  %p3464_p11 = scmp.lt.s32.totalorder %s3455_s9, %s3455_s9 }
   0xa   : > { %p3605_p5 = pnand %p3431_p2, %p3418_p4 }
   0xb   : > { %p3465_p12 = por %p3464_p11, %p3463_p10 }
   0xc   : > { %p3457_p7 = pneg %p3605_p5 }
   0xe   : > { %p3458_p8 = pnand %p3457_p7, %p3456_p6 }
  0x10   : > { %p3459_p9 = pneg %p3458_p8 }
  0x12   : > { %p3466_p13 = pnand %p3465_p12, %p3459_p9 }
  0x14   : > { %3469 = shalt.err (!%p3466_p13)
}
  0x15   : > { %s3535_s10 = smov [#allocation6]   ;;  %s3470_s11 = scalar_lea.vmem %s3594_s26, 16 }
  0x16   : > { %3424 = dma.vmem_to_smem (!%p3605_p5), %s184_s21, 16, %s3535_s10, [#allocation7]  }
  0x17   : > { %p3471_p0 = scmp.ne.s32.totalorder %s3594_s26, %s3470_s11  ;;  %p3478_p6 = scmp.lt.s32.totalorder %s3594_s26, %s3594_s26 }
  0x18   : > { %p3479_p8 = scmp.lt.s32.totalorder %s3470_s11, %s3470_s11 }
  0x19   : > { %p3473_p1 = pnand %p3471_p0, %p3457_p7 }
  0x1a   : > { %p3480_p10 = por %p3479_p8, %p3478_p6 }
  0x1b   : > { %p3474_p4 = pneg %p3473_p1 }
  0x1d   : > { %p3481_p9 = pnand %p3480_p10, %p3474_p4 }
  0x1f   : > { %3484 = shalt.err (!%p3481_p9)
}
  0x20   : > { %s3536_s12 = smov [#allocation4]   ;;  %s3485_s13 = scalar_lea.vmem %s3601_s29, 16 }
  0x21   : > { %3421 = dma.vmem_to_smem (!%p3605_p5), %s3594_s26, 16, %s3536_s12, [#allocation5]  }
  0x22   : > { %p3486_p11 = scmp.ne.s32.totalorder %s3601_s29, %s3485_s13  ;;  %p3493_p0 = scmp.lt.s32.totalorder %s3601_s29, %s3601_s29 }
  0x23   : > { %p3494_p1 = scmp.lt.s32.totalorder %s3485_s13, %s3485_s13 }
  0x24   : > { %p3488_p12 = pnand %p3486_p11, %p3457_p7 }
  0x25   : > { %p3495_p4 = por %p3494_p1, %p3493_p0 }
  0x26   : > { %p3489_p13 = pneg %p3488_p12 }
  0x28   : > { %p3496_p6 = pnand %p3495_p4, %p3489_p13 }
  0x2a   : > { %3499 = shalt.err (!%p3496_p6)
}
  0x2b   : > { %s3537_s14 = smov [#allocation8]   ;;  %s3500_s15 = scalar_lea.vmem %s3612_s8, 16 }
  0x2c   : > { %3427 = dma.vmem_to_smem (!%p3605_p5), %s3601_s29, 16, %s3537_s14, [#allocation7]  }
  0x2d   : > { %p3501_p8 = scmp.ne.s32.totalorder %s3612_s8, %s3500_s15  ;;  %p3508_p11 = scmp.lt.s32.totalorder %s3612_s8, %s3612_s8 }
  0x2e   : > { %p3509_p12 = scmp.lt.s32.totalorder %s3500_s15, %s3500_s15 }
  0x2f   : > { %p3503_p10 = pnand %p3501_p8, %p3457_p7 }
  0x30   : > { %p3510_p13 = por %p3509_p12, %p3508_p11 }
  0x31   : > { %p3504_p9 = pneg %p3503_p10 }
  0x33   : > { %p3511_p0 = pnand %p3510_p13, %p3504_p9 }
  0x35   : > { %3514 = shalt.err (!%p3511_p0)
}
  0x36   : > { %s3538_s16 = smov [#allocation9]   ;;  %226 = sbr.rel (%p3587_p3) target bundleno = 1190 (0x4a6), region = 40 }
  0x37   : > { %3430 = dma.vmem_to_smem (!%p3605_p5), %s3612_s8, 16, %s3538_s16, [#allocation10]  }
  0x3b   : > { %3520 = dma.done.wait (%p3431_p2), [#allocation5], 16  }
  0x3c   : > { %3522 = vsyncadd (%p3431_p2), [#allocation5], 4294967280 }
  0x3d   : > { %3524 = dma.done.wait (%p3431_p2), [#allocation7], 32  }
  0x3e   : > { %3526 = vsyncadd (%p3431_p2), [#allocation7], 4294967264 }
  0x3f   : > { %3528 = dma.done.wait (%p3431_p2), [#allocation10], 16  }
  0x40   : > { %3530 = vsyncadd (%p3431_p2), [#allocation10], 4294967280 }
  0x41   : > { %244 = sfence }
  0x42   : > { %p267_p3 = scmp.lt.s32.totalorder %s3582_s22, 1  ;;  %vm277_vm0 = vcmask 211968   ;;  %vm281_vm1 = vcmask 205824   ;;  %v3539_v0 = vmov 0.0   ;;  %s3540_s23 = smov 1   ;;  %vm336_vm2 = vcmask 203784  }
  0x43   : > { %278 = vst.msk [vmem:[#allocation2] sm:$0xff] %vm277_vm0, %v3539_v0  ;;  %279 = vst.msk [vmem:[#allocation2 + $0x8] sm:$0xff] %vm277_vm0, %v3539_v0  ;;  %s3227_s24 = sld [smem:[#allocation4 + $0x1]]  ;;  %s3541_s27 = smov 127   ;;  %vm3086_vm3 = vcmask 195584  }
  0x44   : > { %280 = vst.msk [vmem:[#allocation2 + $0x10] sm:$0xff] %vm277_vm0, %v3539_v0  ;;  %283 = vst.msk [vmem:[#allocation2 + $0x20] sm:$0xff] %vm277_vm0, %v3539_v0  ;;  %s5136_s22 = smov (!%p267_p3, %s3582_s22), 1  ;;  %s3228_s25 = sld [smem:[#allocation4 + $0x1c]] }
  0x45   : > { %284 = vst.msk [vmem:[#allocation2 + $0x28] sm:$0xff] %vm277_vm0, %v3539_v0  ;;  %285 = vst.msk [vmem:[#allocation2 + $0x30] sm:$0xff] %vm277_vm0, %v3539_v0  ;;  %s3401_s17 = smul.u32 72, %s5136_s22  ;;  %s3229_s26 = sld [smem:[#allocation4 + $0x37]] }
  0x46   : > { %287 = vst.msk [vmem:[#allocation2 + $0x40] sm:$0xff] %vm277_vm0, %v3539_v0  ;;  %288 = vst.msk [vmem:[#allocation2 + $0x48] sm:$0xff] %vm277_vm0, %v3539_v0  ;;  %s3230_s28 = sld [smem:[#allocation4 + $0x2]]  ;;  %s3542_s6 = smov 126  }
  0x47   : > { %289 = vst.msk [vmem:[#allocation2 + $0x50] sm:$0xff] %vm277_vm0, %v3539_v0  ;;  %1680 = vst.msk [vmem:[#allocation3] sm:$0xff] %vm277_vm0, %v3539_v0  ;;  %s3701_s21 = scalar_lea.vmem %s5127_s0, %s3401_s17  ;;  %s3231_s29 = sld [smem:[#allocation4 + $0x1d]] }
  0x48   : > { %1681 = vst.msk [vmem:[#allocation3 + $0x8] sm:$0xff] %vm277_vm0, %v3539_v0  ;;  %1682 = vst.msk [vmem:[#allocation3 + $0x10] sm:$0xff] %vm277_vm0, %v3539_v0  ;;  %v291_v1 = vld [vmem:[%s3701_s21] sm:$0xff]  ;;  %v293_v2 = vld [vmem:[%s3701_s21 + $0x10] sm:$0xff]  ;;  %s3232_s30 = sld [smem:[#allocation4 + $0x38]] }
  0x49   : > { %1684 = vst.msk [vmem:[#allocation3 + $0x20] sm:$0xff] %vm277_vm0, %v3539_v0  ;;  %1685 = vst.msk [vmem:[#allocation3 + $0x28] sm:$0xff] %vm277_vm0, %v3539_v0  ;;  %309 = vrot.lane.b32.xlu0 %v291_v1, %s3540_s23  ;;  %313 = vrot.lane.b32.xlu1 %v293_v2, %s3540_s23  ;;  %v292_v3 = vld [vmem:[%s3701_s21 + $0x8] sm:$0xff]  ;;  %v294_v4 = vld [vmem:[%s3701_s21 + $0x18] sm:$0xff]  ;;  %s3236_s7 = sld [smem:[#allocation4 + $0x4]] }
  0x4a   : > { %1686 = vst.msk [vmem:[#allocation3 + $0x30] sm:$0xff] %vm277_vm0, %v3539_v0  ;;  %1688 = vst.msk [vmem:[#allocation3 + $0x40] sm:$0xff] %vm277_vm0, %v3539_v0  ;;  %v295_v5 = vld [vmem:[%s3701_s21 + $0x20] sm:$0xff]  ;;  %v296_v6 = vld [vmem:[%s3701_s21 + $0x28] sm:$0xff]  ;;  %v383_v14 = vstv %s3227_s24  ;;  %v403_v25 = vstv %s3228_s25  ;;  %s3237_s8 = sld [smem:[#allocation4 + $0x1f]] }
  0x4b   : > { %1689 = vst.msk [vmem:[#allocation3 + $0x48] sm:$0xff] %vm277_vm0, %v3539_v0  ;;  %1690 = vst.msk [vmem:[#allocation3 + $0x50] sm:$0xff] %vm277_vm0, %v3539_v0  ;;  %v297_v7 = vld [vmem:[%s3701_s21 + $0x30] sm:$0xff]  ;;  %v298_v8 = vld [vmem:[%s3701_s21 + $0x38] sm:$0xff]  ;;  %v423_v29 = vstv %s3229_s26  ;;  %s3238_s9 = sld [smem:[#allocation4 + $0x3a]] }
  0x4c   : > { %282 = vst.msk [vmem:[#allocation2 + $0x18] sm:$0x3] %vm281_vm1, %v3539_v0  ;;  %286 = vst.msk [vmem:[#allocation2 + $0x38] sm:$0x3] %vm281_vm1, %v3539_v0  ;;  %v299_v9 = vld [vmem:[%s3701_s21 + $0x40] sm:$0xff]  ;;  %v443_v34 = vstv %s3230_s28  ;;  %s3239_s10 = sld [smem:[#allocation4 + $0x5]] }
  0x4d   : > { %290 = vst.msk [vmem:[#allocation2 + $0x58] sm:$0x3] %vm281_vm1, %v3539_v0  ;;  %1683 = vst.msk [vmem:[#allocation3 + $0x18] sm:$0x3] %vm281_vm1, %v3539_v0  ;;  %311 = vrot.lane.b32.xlu0 %v292_v3, %s3540_s23  ;;  %315 = vrot.lane.b32.xlu1 %v294_v4, %s3540_s23  ;;  %v463_v37 = vstv %s3231_s29  ;;  %s3240_s11 = sld [smem:[#allocation4 + $0x20]] }
  0x4e   : > { %1687 = vst.msk [vmem:[#allocation3 + $0x38] sm:$0x3] %vm281_vm1, %v3539_v0  ;;  %1691 = vst.msk [vmem:[#allocation3 + $0x58] sm:$0x3] %vm281_vm1, %v3539_v0  ;;  %v483_v42 = vstv %s3232_s30  ;;  %s3241_s12 = sld [smem:[#allocation4 + $0x3b]] }
  0x4f   : > { %v530_v46 = vstv %s3236_s7  ;;  %s3245_s13 = sld [smem:[#allocation4 + $0x7]] }
  0x50   : > { %v550_v53 = vstv %s3237_s8  ;;  %s3246_s14 = sld [smem:[#allocation4 + $0x22]] }
  0x51   : > { %317 = vrot.lane.b32.xlu0 %v295_v5, %s3540_s23  ;;  %319 = vrot.lane.b32.xlu1 %v296_v6, %s3540_s23  ;;  %v570_v56 = vstv %s3238_s9  ;;  %s3247_s15 = sld [smem:[#allocation4 + $0x3d]] }
  0x52   : > { %v590_v61 = vstv %s3239_s10  ;;  %s3248_s16 = sld [smem:[#allocation4 + $0x8]] }
  0x53   : > { %v610_v0 = vstv %s3240_s11  ;;  %s3249_s19 = sld [smem:[#allocation4 + $0x23]] }
  0x54   : > { %v630_v5 = vstv %s3241_s12  ;;  %s3250_s20 = sld [smem:[#allocation4 + $0x3e]] }
  0x55   : > { %321 = vrot.lane.b32.xlu0 %v297_v7, %s3540_s23  ;;  %323 = vrot.lane.b32.xlu1 %v298_v8, %s3540_s23  ;;  %s3254_s24 = sld [smem:[#allocation4 + $0xa]] }
  0x56   : > { %s3255_s25 = sld [smem:[#allocation4 + $0x25]] }
  0x57   : > { %s3256_s26 = sld [smem:[#allocation4 + $0x40]] }
  0x58   : > { %s3257_s28 = sld [smem:[#allocation4 + $0xb]] }
  0x59   : > { %325 = vrot.lane.b32.xlu0 %v299_v9, %s3540_s23  ;;  %v677_v9 = vstv %s3245_s13  ;;  %s358_s29 = sld [smem:[#allocation4]] }
  0x5a   : > { %s3225_s30 = sld [smem:[#allocation4 + $0x1b]] }
  0x5b   : > { %s3258_s7 = sld [smem:[#allocation4 + $0x26]] }
  0x5c   : > { %s346_s8 = sld [smem:[#allocation6]] }
  0x5d   : > { %s3878_s9 = sld [smem:[#allocation6 + $0x1]] }
  0x5e   : > { %s3884_s10 = sld [smem:[#allocation6 + $0x2]] }
  0x5f   : > { %s3886_s11 = sld [smem:[#allocation4 + $0x36]] }
  0x60   : > { %s3233_s12 = sld [smem:[#allocation4 + $0x3]] }
  0x61   : > { %s3890_s13 = sld [smem:[#allocation4 + $0x41]] }
  0x62   : > { %s3371_s22 = sld [smem:[#allocation8 + $0x4b]] }
  0xbb   : > { %v310_v10 = vpop.permute.xlu0 %309  ;;  %v314_v11 = vpop.permute.xlu1 %313 }
  0xbc   : > { %337 = vst.msk [vmem:[#allocation2 + $0x1] sm:$0xff] %vm336_vm2, %v310_v10  ;;  %339 = vst.msk [vmem:[#allocation2 + $0x11] sm:$0xff] %vm336_vm2, %v314_v11 }
  0xbf   : > { %v312_v12 = vpop.permute.xlu0 %311  ;;  %v316_v13 = vpop.permute.xlu1 %315 }
  0xc0   : > { %338 = vst.msk [vmem:[#allocation2 + $0x9] sm:$0xff] %vm336_vm2, %v312_v12  ;;  %340 = vst.msk [vmem:[#allocation2 + $0x21] sm:$0xff] %vm336_vm2, %v316_v13 }
  0xc3   : > { %v3725_v15 = vld [vmem:[#allocation2] sm:$0xff]  ;;  %v318_v16 = vpop.permute.xlu0 %317  ;;  %v320_v17 = vpop.permute.xlu1 %319  ;;  %v3774_v49 = vld [vmem:[#allocation2 + $0x11] sm:$0xff] }
  0xc4   : > { %v384_v18 = vmul.f32 %v383_v14, %v3725_v15  ;;  %341 = vst.msk [vmem:[#allocation2 + $0x29] sm:$0xff] %vm336_vm2, %v318_v16  ;;  %342 = vst.msk [vmem:[#allocation2 + $0x31] sm:$0xff] %vm336_vm2, %v320_v17  ;;  %v404_v28 = vmul.f32 %v403_v25, %v3725_v15  ;;  %v424_v30 = vmul.f32 %v423_v29, %v3725_v15  ;;  %v3768_v45 = vld [vmem:[#allocation2 + $0x1] sm:$0xff]  ;;  %v3816_v12 = vld [vmem:[#allocation2 + $0x12] sm:$0xff]  ;;  %v697_v17 = vstv %s3246_s14  ;;  %s3900_s14 = sld [smem:[#allocation4 + $0x1e]] }
  0xc5   : > { %v444_v36 = vmul.f32 %v443_v34, %v3725_v15  ;;  %v464_v38 = vmul.f32 %v463_v37, %v3725_v15  ;;  %v484_v44 = vmul.f32 %v483_v42, %v3725_v15  ;;  %v531_v47 = vmul.f32 %v530_v46, %v3768_v45 }
  0xc6   : > { %390 = vrot.lane.b32.xlu1 %v384_v18, %s3541_s27  ;;  %v533_v51 = vmul.f32 %v530_v46, %v3774_v49  ;;  %v551_v55 = vmul.f32 %v550_v53, %v3768_v45  ;;  %v571_v57 = vmul.f32 %v570_v56, %v3768_v45  ;;  %v553_v58 = vmul.f32 %v550_v53, %v3774_v49 }
  0xc7   : > { %v3731_v19 = vld [vmem:[#allocation2 + $0x10] sm:$0xff]  ;;  %v3733_v20 = vld [vmem:[#allocation2 + $0x8] sm:$0xff]  ;;  %v322_v21 = vpop.permute.xlu0 %321  ;;  %v324_v22 = vpop.permute.xlu1 %323  ;;  %v573_v59 = vmul.f32 %v570_v56, %v3774_v49  ;;  %v591_v63 = vmul.f32 %v590_v61, %v3768_v45  ;;  %v611_v1 = vmul.f32 %v610_v0, %v3768_v45  ;;  %v593_v2 = vmul.f32 %v590_v61, %v3774_v49 }
  0xc8   : > { %v386_v23 = vmul.f32 %v383_v14, %v3731_v19  ;;  %v385_v24 = vmul.f32 %v383_v14, %v3733_v20  ;;  %343 = vst.msk [vmem:[#allocation2 + $0x41] sm:$0xff] %vm336_vm2, %v322_v21  ;;  %344 = vst.msk [vmem:[#allocation2 + $0x49] sm:$0xff] %vm336_vm2, %v324_v22  ;;  %v405_v27 = vmul.f32 %v403_v25, %v3733_v20  ;;  %v3776_v50 = vld [vmem:[#allocation2 + $0x9] sm:$0xff]  ;;  %v717_v22 = vstv %s3247_s15  ;;  %s3904_s15 = sld [smem:[#allocation4 + $0xd]] }
  0xc9   : > { %v406_v31 = vmul.f32 %v403_v25, %v3731_v19  ;;  %v426_v32 = vmul.f32 %v423_v29, %v3731_v19  ;;  %v425_v33 = vmul.f32 %v423_v29, %v3733_v20  ;;  %v445_v35 = vmul.f32 %v443_v34, %v3733_v20  ;;  %v3810_v8 = vld [vmem:[#allocation2 + $0x2] sm:$0xff]  ;;  %v3818_v13 = vld [vmem:[#allocation2 + $0xa] sm:$0xff] }
  0xca   : > { %394 = vrot.lane.b32.xlu1 %v386_v23, %s3541_s27  ;;  %392 = vrot.lane.b32.xlu0 %v385_v24, %s3541_s27  ;;  %v446_v39 = vmul.f32 %v443_v34, %v3731_v19  ;;  %v466_v40 = vmul.f32 %v463_v37, %v3731_v19  ;;  %v465_v41 = vmul.f32 %v463_v37, %v3733_v20  ;;  %v825_v37 = vstv %s3254_s24  ;;  %s3266_s24 = sld [smem:[#allocation4 + $0xe]] }
  0xcb   : > { %v326_v26 = vpop.permute.xlu0 %325  ;;  %v485_v43 = vmul.f32 %v483_v42, %v3733_v20  ;;  %v486_v48 = vmul.f32 %v483_v42, %v3731_v19  ;;  %v532_v52 = vmul.f32 %v530_v46, %v3776_v50  ;;  %v552_v54 = vmul.f32 %v550_v53, %v3776_v50 }
  0xcc   : > { %345 = vst.msk [vmem:[#allocation2 + $0x51] sm:$0xff] %vm336_vm2, %v326_v26  ;;  %v572_v60 = vmul.f32 %v570_v56, %v3776_v50  ;;  %v592_v62 = vmul.f32 %v590_v61, %v3776_v50  ;;  %v613_v3 = vmul.f32 %v610_v0, %v3774_v49  ;;  %v612_v4 = vmul.f32 %v610_v0, %v3776_v50 }
  0xcd   : > { %v632_v6 = vmul.f32 %v630_v5, %v3776_v50  ;;  %v631_v7 = vmul.f32 %v630_v5, %v3768_v45  ;;  %v678_v10 = vmul.f32 %v677_v9, %v3810_v8  ;;  %v633_v11 = vmul.f32 %v630_v5, %v3774_v49 }
  0xce   : > { %412 = vrot.lane.b32.xlu1 %v405_v27, %s3541_s27  ;;  %410 = vrot.lane.b32.xlu0 %v404_v28, %s3541_s27  ;;  %v680_v14 = vmul.f32 %v677_v9, %v3816_v12  ;;  %v679_v16 = vmul.f32 %v677_v9, %v3818_v13  ;;  %v699_v18 = vmul.f32 %v697_v17, %v3818_v13  ;;  %v737_v27 = vstv %s3248_s16  ;;  %s3933_s16 = sld [smem:[#allocation4 + $0x39]] }
  0xcf   : > { %v698_v21 = vmul.f32 %v697_v17, %v3810_v8  ;;  %v718_v23 = vmul.f32 %v717_v22, %v3810_v8  ;;  %v700_v24 = vmul.f32 %v697_v17, %v3816_v12  ;;  %v720_v25 = vmul.f32 %v717_v22, %v3816_v12 }
  0xd0   : > { %v719_v26 = vmul.f32 %v717_v22, %v3818_v13  ;;  %v739_v28 = vmul.f32 %v737_v27, %v3818_v13  ;;  %v738_v29 = vmul.f32 %v737_v27, %v3810_v8  ;;  %v865_v53 = vstv %s3256_s26  ;;  %s3242_s26 = sld [smem:[#allocation4 + $0x6]] }
  0xd1   : > { %v347_v9 = vstv %s346_s8  ;;  %s4035_s8 = sld [smem:[#allocation4 + $0x2b]] }
  0xd2   : > { %430 = vrot.lane.b32.xlu1 %v424_v30, %s3541_s27  ;;  %414 = vrot.lane.b32.xlu0 %v406_v31, %s3541_s27  ;;  %v757_v30 = vstv %s3249_s19  ;;  %s3943_s19 = sld [smem:[#allocation4 + $0x28]] }
  0xd3   : > { %v758_v31 = vmul.f32 %v757_v30, %v3810_v8  ;;  %v759_v34 = vmul.f32 %v757_v30, %v3818_v13 }
  0xd6   : > { %434 = vrot.lane.b32.xlu1 %v426_v32, %s3541_s27  ;;  %432 = vrot.lane.b32.xlu0 %v425_v33, %s3541_s27  ;;  %v740_v32 = vmul.f32 %v737_v27, %v3816_v12  ;;  %v760_v33 = vmul.f32 %v757_v30, %v3816_v12  ;;  %v506_v27 = vstv %s3233_s12  ;;  %s3251_s12 = sld [smem:[#allocation4 + $0x9]] }
  0xda   : > { %452 = vrot.lane.b32.xlu1 %v445_v35, %s3542_s6  ;;  %450 = vrot.lane.b32.xlu0 %v444_v36, %s3542_s6  ;;  %v777_v35 = vstv %s3250_s20  ;;  %v3850_v36 = vld [vmem:[#allocation2 + $0x20] sm:$0xff]  ;;  %s3265_s20 = sld [smem:[#allocation4 + $0x43]] }
  0xdb   : > { %v780_v42 = vmul.f32 %v777_v35, %v3816_v12  ;;  %v866_v56 = vmul.f32 %v865_v53, %v3850_v36 }
  0xde   : > { %470 = vrot.lane.b32.xlu1 %v464_v38, %s3542_s6  ;;  %454 = vrot.lane.b32.xlu0 %v446_v39, %s3542_s6  ;;  %v779_v38 = vmul.f32 %v777_v35, %v3818_v13  ;;  %v778_v39 = vmul.f32 %v777_v35, %v3810_v8 }
  0xe2   : > { %474 = vrot.lane.b32.xlu1 %v466_v40, %s3542_s6  ;;  %472 = vrot.lane.b32.xlu0 %v465_v41, %s3542_s6  ;;  %v826_v40 = vmul.f32 %v825_v37, %v3850_v36  ;;  %v3857_v41 = vld [vmem:[#allocation2 + $0x30] sm:$0xff] }
  0xe6   : > { %492 = vrot.lane.b32.xlu1 %v485_v43, %s3542_s6  ;;  %490 = vrot.lane.b32.xlu0 %v484_v44, %s3542_s6  ;;  %v3860_v43 = vld [vmem:[#allocation2 + $0x28] sm:$0xff]  ;;  %v828_v44 = vmul.f32 %v825_v37, %v3857_v41 }
  0xe7   : > { %v827_v46 = vmul.f32 %v825_v37, %v3860_v43  ;;  %v867_v61 = vmul.f32 %v865_v53, %v3860_v43 }
  0xea   : > { %537 = vrot.lane.b32.xlu1 %v531_v47, %s3541_s27  ;;  %494 = vrot.lane.b32.xlu0 %v486_v48, %s3542_s6  ;;  %v845_v47 = vstv %s3255_s25  ;;  %s3267_s25 = sld [smem:[#allocation4 + $0x29]] }
  0xee   : > { %541 = vrot.lane.b32.xlu1 %v533_v51, %s3541_s27  ;;  %539 = vrot.lane.b32.xlu0 %v532_v52, %s3541_s27  ;;  %v847_v51 = vmul.f32 %v845_v47, %v3860_v43  ;;  %v846_v52 = vmul.f32 %v845_v47, %v3850_v36 }
  0xf2   : > { %559 = vrot.lane.b32.xlu1 %v552_v54, %s3541_s27  ;;  %557 = vrot.lane.b32.xlu0 %v551_v55, %s3541_s27 }
  0xf6   : > { %577 = vrot.lane.b32.xlu1 %v571_v57, %s3541_s27  ;;  %561 = vrot.lane.b32.xlu0 %v553_v58, %s3541_s27  ;;  %v848_v57 = vmul.f32 %v845_v47, %v3857_v41 }
  0xfa   : > { %581 = vrot.lane.b32.xlu1 %v573_v59, %s3541_s27  ;;  %579 = vrot.lane.b32.xlu0 %v572_v60, %s3541_s27  ;;  %v868_v60 = vmul.f32 %v865_v53, %v3857_v41 }
  0xfe   : > { %599 = vrot.lane.b32.xlu1 %v592_v62, %s3542_s6  ;;  %597 = vrot.lane.b32.xlu0 %v591_v63, %s3542_s6  ;;  %v885_v62 = vstv %s3257_s28  ;;  %v359_v63 = vstv %s358_s29  ;;  %s3268_s28 = sld [smem:[#allocation4 + $0x44]] }
  0xff   : > { %v361_v5 = vmul.f32 %v359_v63, %v3733_v20  ;;  %s3243_s29 = sld [smem:[#allocation4 + $0x21]] }
 0x101   : > { %v364_v22 = vadd.f32 %v361_v5, %v347_v9 }
 0x102   : > { %617 = vrot.lane.b32.xlu1 %v611_v1, %s3542_s6  ;;  %601 = vrot.lane.b32.xlu0 %v593_v2, %s3542_s6  ;;  %v887_v2 = vmul.f32 %v885_v62, %v3860_v43 }
 0x106   : > { %621 = vrot.lane.b32.xlu1 %v613_v3, %s3542_s6  ;;  %619 = vrot.lane.b32.xlu0 %v612_v4, %s3542_s6  ;;  %v886_v3 = vmul.f32 %v885_v62, %v3850_v36  ;;  %v360_v4 = vmul.f32 %v359_v63, %v3725_v15 }
 0x10a   : > { %639 = vrot.lane.b32.xlu1 %v632_v6, %s3542_s6  ;;  %637 = vrot.lane.b32.xlu0 %v631_v7, %s3542_s6  ;;  %v367_v6 = vstv %s3225_s30  ;;  %v905_v7 = vstv %s3258_s7  ;;  %s3272_s30 = sld [smem:[#allocation4 + $0x10]] }
 0x10b   : > { %v906_v17 = vmul.f32 %v905_v7, %v3850_v36  ;;  %v908_v37 = vmul.f32 %v905_v7, %v3857_v41  ;;  %s4025_s7 = sld [smem:[#allocation4 + $0x3c]] }
 0x10e   : > { %684 = vrot.lane.b32.xlu1 %v678_v10, %s3541_s27  ;;  %641 = vrot.lane.b32.xlu0 %v633_v11, %s3542_s6  ;;  %v362_v10 = vmul.f32 %v359_v63, %v3731_v19  ;;  %v368_v11 = vmul.f32 %v367_v6, %v3725_v15 }
 0x112   : > { %688 = vrot.lane.b32.xlu1 %v680_v14, %s3541_s27  ;;  %686 = vrot.lane.b32.xlu0 %v679_v16, %s3541_s27 }
 0x116   : > { %706 = vrot.lane.b32.xlu1 %v699_v18, %s3541_s27  ;;  %704 = vrot.lane.b32.xlu0 %v698_v21, %s3541_s27  ;;  %v888_v18 = vmul.f32 %v885_v62, %v3857_v41  ;;  %v363_v21 = vadd.f32 %v360_v4, %v347_v9  ;;  %v3945_v4 = vld [vmem:[#allocation2 + $0x21] sm:$0xff] }
 0x11a   : > { %724 = vrot.lane.b32.xlu1 %v718_v23, %s3541_s27  ;;  %708 = vrot.lane.b32.xlu0 %v700_v24, %s3541_s27  ;;  %v350_v23 = vstv %s3878_s9  ;;  %v3916_v24 = vstv %s3884_s10  ;;  %s3274_s9 = sld [smem:[#allocation4 + $0x46]] }
 0x11b   : > { %s3275_s10 = sld [smem:[#allocation4 + $0x11]] }
 0x11e   : > { %728 = vrot.lane.b32.xlu1 %v720_v25, %s3541_s27  ;;  %726 = vrot.lane.b32.xlu0 %v719_v26, %s3541_s27  ;;  %v369_v25 = vmul.f32 %v367_v6, %v3733_v20  ;;  %v375_v26 = vstv %s3886_s11  ;;  %s3276_s11 = sld [smem:[#allocation4 + $0x2c]] }
 0x11f   : > { %v376_v47 = vmul.f32 %v375_v26, %v3725_v15  ;;  %v378_v5 = vmul.f32 %v375_v26, %v3731_v19 }
 0x122   : > { %746 = vrot.lane.b32.xlu1 %v739_v28, %s3542_s6  ;;  %744 = vrot.lane.b32.xlu0 %v738_v29, %s3542_s6  ;;  %v365_v29 = vadd.f32 %v362_v10, %v347_v9  ;;  %v379_v10 = vadd.f32 %v376_v47, %v3916_v24 }
 0x126   : > { %764 = vrot.lane.b32.xlu1 %v758_v31, %s3542_s6  ;;  %748 = vrot.lane.b32.xlu0 %v740_v32, %s3542_s6  ;;  %v925_v31 = vstv %s3890_s13  ;;  %v371_v32 = vadd.f32 %v368_v11, %v350_v23  ;;  %s3277_s13 = sld [smem:[#allocation4 + $0x47]] }
 0x127   : > { %v927_v62 = vmul.f32 %v925_v31, %v3860_v43  ;;  %v926_v63 = vmul.f32 %v925_v31, %v3850_v36 }
 0x12a   : > { %768 = vrot.lane.b32.xlu1 %v760_v33, %s3542_s6  ;;  %766 = vrot.lane.b32.xlu0 %v759_v34, %s3542_s6  ;;  %v370_v33 = vmul.f32 %v367_v6, %v3731_v19 }
 0x12e   : > { %786 = vrot.lane.b32.xlu1 %v779_v38, %s3542_s6  ;;  %784 = vrot.lane.b32.xlu0 %v778_v39, %s3542_s6  ;;  %v907_v38 = vmul.f32 %v905_v7, %v3860_v43 }
 0x132   : > { %832 = vrot.lane.b32.xlu1 %v826_v40, %s3541_s27  ;;  %788 = vrot.lane.b32.xlu0 %v780_v42, %s3542_s6  ;;  %v507_v42 = vmul.f32 %v506_v27, %v3768_v45 }
 0x136   : > { %836 = vrot.lane.b32.xlu1 %v828_v44, %s3541_s27  ;;  %834 = vrot.lane.b32.xlu0 %v827_v46, %s3541_s27  ;;  %v508_v44 = vmul.f32 %v506_v27, %v3776_v50  ;;  %v372_v46 = vadd.f32 %v369_v25, %v350_v23 }
 0x138   : > { %v391_v48 = vpop.permute.xlu1 %390 }
 0x139   : > { %v399_v28 = vadd.f32 %v391_v48, %v363_v21  ;;  %v972_v48 = vstv %s3904_s15  ;;  %v928_v21 = vmul.f32 %v925_v31, %v3857_v41  ;;  %s3281_s15 = sld [smem:[#allocation4 + $0x13]] }
 0x13a   : > { %854 = vrot.lane.b32.xlu1 %v847_v51, %s3541_s27  ;;  %852 = vrot.lane.b32.xlu0 %v846_v52, %s3541_s27  ;;  %v514_v51 = vstv %s3900_s14  ;;  %v973_v19 = vmul.f32 %v972_v48, %v3945_v4  ;;  %s3252_s14 = sld [smem:[#allocation4 + $0x24]] }
 0x13b   : > { %v516_v25 = vmul.f32 %v514_v51, %v3776_v50 }
 0x13c   : > { %v3872_v54 = vpop.permute.xlu1 %394  ;;  %v393_v55 = vpop.permute.xlu0 %392 }
 0x13d   : > { %v400_v30 = vadd.f32 %v393_v55, %v364_v22  ;;  %v401_v52 = vadd.f32 %v3872_v54, %v365_v29  ;;  %v509_v54 = vmul.f32 %v506_v27, %v3774_v49  ;;  %v522_v27 = vstv %s3933_s16  ;;  %s4115_s16 = sld [smem:[#allocation4 + $0x3f]] }
 0x13e   : > { %872 = vrot.lane.b32.xlu1 %v866_v56, %s3541_s27  ;;  %856 = vrot.lane.b32.xlu0 %v848_v57, %s3541_s27  ;;  %v373_v57 = vadd.f32 %v370_v33, %v350_v23 }
 0x140   : > { %v3880_v58 = vpop.permute.xlu1 %412  ;;  %v411_v59 = vpop.permute.xlu0 %410 }
 0x141   : > { %v419_v53 = vadd.f32 %v411_v59, %v371_v32  ;;  %v515_v59 = vmul.f32 %v514_v51, %v3768_v45  ;;  %v381_v32 = vadd.f32 %v378_v5, %v3916_v24 }
 0x142   : > { %876 = vrot.lane.b32.xlu1 %v868_v60, %s3541_s27  ;;  %874 = vrot.lane.b32.xlu0 %v867_v61, %s3541_s27  ;;  %v377_v60 = vmul.f32 %v375_v26, %v3733_v20  ;;  %v420_v20 = vadd.f32 %v3880_v58, %v372_v46  ;;  %v3962_v58 = vld [vmem:[#allocation2 + $0x31] sm:$0xff]  ;;  %v517_v26 = vmul.f32 %v514_v51, %v3774_v49 }
 0x144   : > { %v3892_v0 = vpop.permute.xlu1 %430  ;;  %v3894_v1 = vpop.permute.xlu0 %414  ;;  %v380_v11 = vadd.f32 %v377_v60, %v3916_v24 }
 0x145   : > { %v421_v6 = vadd.f32 %v3894_v1, %v373_v57  ;;  %v3964_v1 = vld [vmem:[#allocation2 + $0x29] sm:$0xff] }
 0x146   : > { %894 = vrot.lane.b32.xlu1 %v887_v2, %s3542_s6  ;;  %892 = vrot.lane.b32.xlu0 %v886_v3, %s3542_s6 }
 0x148   : > { %v3908_v14 = vpop.permute.xlu1 %434  ;;  %v3910_v16 = vpop.permute.xlu0 %432 }
 0x149   : > { %v440_v29 = vadd.f32 %v3910_v16, %v380_v11  ;;  %v441_v16 = vadd.f32 %v3908_v14, %v381_v32 }
 0x14a   : > { %912 = vrot.lane.b32.xlu1 %v906_v17, %s3542_s6  ;;  %896 = vrot.lane.b32.xlu0 %v888_v18, %s3542_s6 }
 0x14c   : > { %v453_v34 = vpop.permute.xlu1 %452  ;;  %v451_v35 = vpop.permute.xlu0 %450 }
 0x14d   : > { %v460_v39 = vadd.f32 %v453_v34, %v400_v30  ;;  %v459_v40 = vadd.f32 %v451_v35, %v399_v28  ;;  %v439_v28 = vadd.f32 %v3892_v0, %v379_v10  ;;  %v975_v35 = vmul.f32 %v972_v48, %v3962_v58 }
 0x14e   : > { %916 = vrot.lane.b32.xlu1 %v908_v37, %s3542_s6  ;;  %914 = vrot.lane.b32.xlu0 %v907_v38, %s3542_s6  ;;  %v974_v37 = vmul.f32 %v972_v48, %v3964_v1  ;;  %v992_v38 = vstv %s3943_s19  ;;  %v524_v0 = vmul.f32 %v522_v27, %v3776_v50  ;;  %v525_v50 = vmul.f32 %v522_v27, %v3774_v49  ;;  %s4125_s19 = sld [smem:[#allocation4 + $0x2e]] }
 0x14f   : > { %v3936_v55 = vadd.f32 %v507_v42, %v459_v40  ;;  %v3938_v56 = vadd.f32 %v508_v44, %v460_v39  ;;  %v523_v42 = vmul.f32 %v522_v27, %v3768_v45  ;;  %v994_v48 = vmul.f32 %v992_v38, %v3964_v1 }
 0x150   : > { %v471_v61 = vpop.permute.xlu1 %470  ;;  %v455_v15 = vpop.permute.xlu0 %454  ;;  %v993_v51 = vmul.f32 %v992_v38, %v3945_v4  ;;  %v1012_v45 = vstv %s3265_s20  ;;  %v1072_v27 = vstv %s3268_s28  ;;  %s3283_s20 = sld [smem:[#allocation4 + $0x49]] }
 0x151   : > { %v479_v2 = vadd.f32 %v471_v61, %v419_v53  ;;  %v461_v3 = vadd.f32 %v455_v15, %v401_v52  ;;  %v1013_v60 = vmul.f32 %v1012_v45, %v3945_v4  ;;  %v995_v61 = vmul.f32 %v992_v38, %v3962_v58  ;;  %s3286_s28 = sld [smem:[#allocation4 + $0x4a]] }
 0x152   : > { %934 = vrot.lane.b32.xlu1 %v927_v62, %s3542_s6  ;;  %932 = vrot.lane.b32.xlu0 %v926_v63, %s3542_s6  ;;  %v1015_v49 = vmul.f32 %v1012_v45, %v3962_v58  ;;  %v1014_v63 = vmul.f32 %v1012_v45, %v3964_v1 }
 0x153   : > { %v3954_v7 = vadd.f32 %v509_v54, %v461_v3  ;;  %v3956_v9 = vadd.f32 %v515_v59, %v479_v2  ;;  %v1032_v2 = vstv %s3266_s24  ;;  %s3284_s24 = sld [smem:[#allocation4 + $0x14]] }
 0x154   : > { %v475_v17 = vpop.permute.xlu1 %474  ;;  %v473_v18 = vpop.permute.xlu0 %472  ;;  %v1034_v59 = vmul.f32 %v1032_v2, %v3964_v1  ;;  %v1033_v5 = vmul.f32 %v1032_v2, %v3945_v4 }
 0x155   : > { %v481_v22 = vadd.f32 %v475_v17, %v421_v6  ;;  %v480_v23 = vadd.f32 %v473_v18, %v420_v20  ;;  %v1052_v20 = vstv %s3267_s25  ;;  %v1035_v17 = vmul.f32 %v1032_v2, %v3962_v58  ;;  %s3285_s25 = sld [smem:[#allocation4 + $0x2f]] }
 0x156   : > { %979 = vrot.lane.b32.xlu1 %v973_v19, %s3541_s27  ;;  %936 = vrot.lane.b32.xlu0 %v928_v21, %s3542_s6  ;;  %v1053_v11 = vmul.f32 %v1052_v20, %v3945_v4  ;;  %v653_v18 = vstv %s3242_s26  ;;  %s3260_s26 = sld [smem:[#allocation4 + $0xc]] }
 0x157   : > { %v3973_v30 = vadd.f32 %v516_v25, %v480_v23  ;;  %v3975_v31 = vadd.f32 %v517_v26, %v481_v22  ;;  %v1055_v25 = vmul.f32 %v1052_v20, %v3962_v58  ;;  %v1054_v26 = vmul.f32 %v1052_v20, %v3964_v1 }
 0x158   : > { %v493_v33 = vpop.permute.xlu1 %492  ;;  %v491_v34 = vpop.permute.xlu0 %490  ;;  %v654_v32 = vmul.f32 %v653_v18, %v3810_v8 }
 0x159   : > { %v500_v39 = vadd.f32 %v493_v33, %v440_v29  ;;  %v499_v40 = vadd.f32 %v491_v34, %v439_v28  ;;  %v655_v33 = vmul.f32 %v653_v18, %v3818_v13 }
 0x15a   : > { %983 = vrot.lane.b32.xlu1 %v975_v35, %s3541_s27  ;;  %981 = vrot.lane.b32.xlu0 %v974_v37, %s3541_s27 }
 0x15b   : > { %v3986_v24 = vadd.f32 %v523_v42, %v499_v40  ;;  %v3988_v44 = vadd.f32 %v524_v0, %v500_v39  ;;  %v1074_v40 = vmul.f32 %v1072_v27, %v3964_v1  ;;  %v1073_v42 = vmul.f32 %v1072_v27, %v3945_v4 }
 0x15c   : > { %v538_v46 = vpop.permute.xlu1 %537  ;;  %v495_v47 = vpop.permute.xlu0 %494  ;;  %v1119_v0 = vstv %s3272_s30  ;;  %s3290_s30 = sld [smem:[#allocation4 + $0x16]] }
 0x15d   : > { %v501_v52 = vadd.f32 %v495_v47, %v441_v16  ;;  %v546_v19 = vadd.f32 %v538_v46, %v3936_v55  ;;  %v661_v55 = vstv %s3243_s29  ;;  %v4037_v47 = vld [vmem:[#allocation2 + $0x22] sm:$0xff]  ;;  %s3261_s29 = sld [smem:[#allocation4 + $0x27]] }
 0x15e   : > { %1001 = vrot.lane.b32.xlu1 %v994_v48, %s3541_s27  ;;  %999 = vrot.lane.b32.xlu0 %v993_v51, %s3541_s27 }
 0x15f   : > { %v3995_v14 = vadd.f32 %v525_v50, %v501_v52 }
 0x160   : > { %v542_v53 = vpop.permute.xlu1 %541  ;;  %v540_v57 = vpop.permute.xlu0 %539 }
 0x161   : > { %v547_v21 = vadd.f32 %v540_v57, %v3938_v56  ;;  %v548_v56 = vadd.f32 %v542_v53, %v3954_v7  ;;  %v656_v7 = vmul.f32 %v653_v18, %v3816_v12  ;;  %v1120_v57 = vmul.f32 %v1119_v0, %v4037_v47 }
 0x162   : > { %1019 = vrot.lane.b32.xlu1 %v1013_v60, %s3541_s27  ;;  %1003 = vrot.lane.b32.xlu0 %v995_v61, %s3541_s27  ;;  %v1075_v60 = vmul.f32 %v1072_v27, %v3962_v58 }
 0x164   : > { %v560_v15 = vpop.permute.xlu1 %559  ;;  %v558_v62 = vpop.permute.xlu0 %557 }
 0x165   : > { %v566_v34 = vadd.f32 %v558_v62, %v3956_v9  ;;  %v662_v9 = vmul.f32 %v661_v55, %v3810_v8  ;;  %v567_v48 = vadd.f32 %v560_v15, %v3973_v30  ;;  %v663_v30 = vmul.f32 %v661_v55, %v3818_v13 }
 0x166   : > { %1023 = vrot.lane.b32.xlu1 %v1015_v49, %s3541_s27  ;;  %1021 = vrot.lane.b32.xlu0 %v1014_v63, %s3541_s27  ;;  %v4051_v49 = vld [vmem:[#allocation2 + $0x32] sm:$0xff]  ;;  %v4053_v63 = vld [vmem:[#allocation2 + $0x2a] sm:$0xff]  ;;  %v669_v15 = vstv %s4025_s7  ;;  %s4205_s7 = sld [smem:[#allocation4 + $0x42]] }
 0x167   : > { %v1121_v18 = vmul.f32 %v1119_v0, %v4053_v63 }
 0x168   : > { %v4005_v3 = vpop.permute.xlu1 %577  ;;  %v562_v54 = vpop.permute.xlu0 %561 }
 0x169   : > { %v568_v51 = vadd.f32 %v562_v54, %v3975_v31  ;;  %v664_v31 = vmul.f32 %v661_v55, %v3816_v12  ;;  %v586_v2 = vadd.f32 %v4005_v3, %v3986_v24 }
 0x16a   : > { %1041 = vrot.lane.b32.xlu1 %v1034_v59, %s3542_s6  ;;  %1039 = vrot.lane.b32.xlu0 %v1033_v5, %s3542_s6 }
 0x16c   : > { %v4011_v6 = vpop.permute.xlu1 %581  ;;  %v580_v10 = vpop.permute.xlu0 %579 }
 0x16d   : > { %v587_v54 = vadd.f32 %v580_v10, %v3988_v44  ;;  %v588_v24 = vadd.f32 %v4011_v6, %v3995_v14 }
 0x16e   : > { %1059 = vrot.lane.b32.xlu1 %v1053_v11, %s3542_s6  ;;  %1043 = vrot.lane.b32.xlu0 %v1035_v17, %s3542_s6  ;;  %v1122_v17 = vmul.f32 %v1119_v0, %v4051_v49 }
 0x170   : > { %v600_v22 = vpop.permute.xlu1 %599  ;;  %v598_v23 = vpop.permute.xlu0 %597 }
 0x171   : > { %v607_v28 = vadd.f32 %v600_v22, %v547_v21  ;;  %v606_v29 = vadd.f32 %v598_v23, %v546_v19  ;;  %v1139_v19 = vstv %s4035_s8  ;;  %v670_v23 = vmul.f32 %v669_v15, %v3810_v8  ;;  %s4215_s8 = sld [smem:[#allocation4 + $0x31]] }
 0x172   : > { %1063 = vrot.lane.b32.xlu1 %v1055_v25, %s3542_s6  ;;  %1061 = vrot.lane.b32.xlu0 %v1054_v26, %s3542_s6  ;;  %v671_v25 = vmul.f32 %v669_v15, %v3818_v13  ;;  %v1141_v27 = vmul.f32 %v1139_v19, %v4053_v63  ;;  %v672_v13 = vmul.f32 %v669_v15, %v3816_v12 }
 0x173   : > { %v4029_v35 = vadd.f32 %v654_v32, %v606_v29  ;;  %v4031_v37 = vadd.f32 %v655_v33, %v607_v28  ;;  %v1140_v28 = vmul.f32 %v1139_v19, %v4037_v47  ;;  %v1159_v29 = vstv %s3274_s9  ;;  %s3292_s9 = sld [smem:[#allocation4 + $0x4c]] }
 0x174   : > { %v618_v38 = vpop.permute.xlu1 %617  ;;  %v602_v39 = vpop.permute.xlu0 %601  ;;  %v1160_v33 = vmul.f32 %v1159_v29, %v4037_v47  ;;  %v1142_v55 = vmul.f32 %v1139_v19, %v4051_v49  ;;  %v1162_v12 = vmul.f32 %v1159_v29, %v4051_v49 }
 0x175   : > { %v626_v16 = vadd.f32 %v618_v38, %v566_v34  ;;  %v608_v46 = vadd.f32 %v602_v39, %v548_v56  ;;  %v1161_v38 = vmul.f32 %v1159_v29, %v4053_v63  ;;  %v1179_v39 = vstv %s3275_s10  ;;  %s3293_s10 = sld [smem:[#allocation4 + $0x17]] }
 0x176   : > { %1081 = vrot.lane.b32.xlu1 %v1074_v40, %s3542_s6  ;;  %1079 = vrot.lane.b32.xlu0 %v1073_v42, %s3542_s6  ;;  %v1181_v0 = vmul.f32 %v1179_v39, %v4053_v63 }
 0x177   : > { %v4045_v52 = vadd.f32 %v656_v7, %v608_v46  ;;  %v4047_v45 = vadd.f32 %v662_v9, %v626_v16  ;;  %v1180_v16 = vmul.f32 %v1179_v39, %v4037_v47  ;;  %v1199_v46 = vstv %s3276_s11  ;;  %s3294_s11 = sld [smem:[#allocation4 + $0x32]] }
 0x178   : > { %v622_v50 = vpop.permute.xlu1 %621  ;;  %v620_v53 = vpop.permute.xlu0 %619 }
 0x179   : > { %v628_v61 = vadd.f32 %v622_v50, %v568_v51  ;;  %v627_v62 = vadd.f32 %v620_v53, %v567_v48  ;;  %v1200_v48 = vmul.f32 %v1199_v46, %v4037_v47  ;;  %v1182_v51 = vmul.f32 %v1179_v39, %v4051_v49 }
 0x17a   : > { %1126 = vrot.lane.b32.xlu1 %v1120_v57, %s3541_s27  ;;  %1083 = vrot.lane.b32.xlu0 %v1075_v60, %s3542_s6  ;;  %v801_v50 = vstv %s3251_s12  ;;  %s3269_s12 = sld [smem:[#allocation4 + $0xf]] }
 0x17b   : > { %v4063_v59 = vadd.f32 %v663_v30, %v627_v62  ;;  %v4065_v5 = vadd.f32 %v664_v31, %v628_v61  ;;  %v1202_v62 = vmul.f32 %v1199_v46, %v4051_v49  ;;  %v1201_v30 = vmul.f32 %v1199_v46, %v4053_v63 }
 0x17c   : > { %v640_v20 = vpop.permute.xlu1 %639  ;;  %v638_v11 = vpop.permute.xlu0 %637  ;;  %v1219_v31 = vstv %s3277_s13  ;;  %s3295_s13 = sld [smem:[#allocation4 + $0x4d]] }
 0x17d   : > { %v647_v21 = vadd.f32 %v640_v20, %v587_v54  ;;  %v646_v22 = vadd.f32 %v638_v11, %v586_v2  ;;  %v802_v54 = vmul.f32 %v801_v50, %v3850_v36  ;;  %v803_v20 = vmul.f32 %v801_v50, %v3860_v43 }
 0x17e   : > { %1130 = vrot.lane.b32.xlu1 %v1122_v17, %s3541_s27  ;;  %1128 = vrot.lane.b32.xlu0 %v1121_v18, %s3541_s27 }
 0x17f   : > { %v4076_v44 = vadd.f32 %v670_v23, %v646_v22  ;;  %v4078_v3 = vadd.f32 %v671_v25, %v647_v21  ;;  %v1221_v22 = vmul.f32 %v1219_v31, %v4053_v63  ;;  %v1220_v23 = vmul.f32 %v1219_v31, %v4037_v47 }
 0x180   : > { %v685_v10 = vpop.permute.xlu1 %684  ;;  %v642_v26 = vpop.permute.xlu0 %641  ;;  %v1267_v25 = vstv %s3281_s15  ;;  %s3299_s15 = sld [smem:[#allocation4 + $0x19]] }
 0x181   : > { %v648_v8 = vadd.f32 %v642_v26, %v588_v24  ;;  %v693_v53 = vadd.f32 %v685_v10, %v4029_v35  ;;  %v809_v35 = vstv %s3252_s14  ;;  %v4127_v26 = vld [vmem:[#allocation2 + $0x40] sm:$0xff]  ;;  %s3270_s14 = sld [smem:[#allocation4 + $0x2a]] }
 0x182   : > { %1148 = vrot.lane.b32.xlu1 %v1141_v27, %s3541_s27  ;;  %1146 = vrot.lane.b32.xlu0 %v1140_v28, %s3541_s27 }
 0x183   : > { %v4085_v14 = vadd.f32 %v672_v13, %v648_v8 }
 0x184   : > { %v689_v6 = vpop.permute.xlu1 %688  ;;  %v687_v32 = vpop.permute.xlu0 %686 }
 0x185   : > { %v694_v57 = vadd.f32 %v687_v32, %v4031_v37  ;;  %v695_v37 = vadd.f32 %v689_v6, %v4045_v52  ;;  %v804_v52 = vmul.f32 %v801_v50, %v3857_v41  ;;  %v1268_v32 = vmul.f32 %v1267_v25, %v4127_v26 }
 0x186   : > { %1166 = vrot.lane.b32.xlu1 %v1160_v33, %s3541_s27  ;;  %1150 = vrot.lane.b32.xlu0 %v1142_v55, %s3541_s27  ;;  %v1222_v33 = vmul.f32 %v1219_v31, %v4051_v49 }
 0x188   : > { %v707_v56 = vpop.permute.xlu1 %706  ;;  %v705_v34 = vpop.permute.xlu0 %704 }
 0x189   : > { %v713_v11 = vadd.f32 %v705_v34, %v4047_v45  ;;  %v810_v45 = vmul.f32 %v809_v35, %v3850_v36  ;;  %v714_v27 = vadd.f32 %v707_v56, %v4063_v59  ;;  %v811_v59 = vmul.f32 %v809_v35, %v3860_v43 }
 0x18a   : > { %1170 = vrot.lane.b32.xlu1 %v1162_v12, %s3541_s27  ;;  %1168 = vrot.lane.b32.xlu0 %v1161_v38, %s3541_s27  ;;  %v4141_v12 = vld [vmem:[#allocation2 + $0x50] sm:$0xff]  ;;  %v4143_v38 = vld [vmem:[#allocation2 + $0x48] sm:$0xff]  ;;  %v817_v56 = vstv %s4115_s16  ;;  %s4295_s16 = sld [smem:[#allocation4 + $0x45]] }
 0x18b   : > { %v1269_v50 = vmul.f32 %v1267_v25, %v4143_v38 }
 0x18c   : > { %v4095_v40 = vpop.permute.xlu1 %724  ;;  %v709_v42 = vpop.permute.xlu0 %708 }
 0x18d   : > { %v715_v28 = vadd.f32 %v709_v42, %v4065_v5  ;;  %v812_v5 = vmul.f32 %v809_v35, %v3857_v41  ;;  %v733_v39 = vadd.f32 %v4095_v40, %v4076_v44 }
 0x18e   : > { %1188 = vrot.lane.b32.xlu1 %v1181_v0, %s3542_s6  ;;  %1186 = vrot.lane.b32.xlu0 %v1180_v16, %s3542_s6 }
 0x190   : > { %v4101_v7 = vpop.permute.xlu1 %728  ;;  %v727_v9 = vpop.permute.xlu0 %726 }
 0x191   : > { %v734_v42 = vadd.f32 %v727_v9, %v4078_v3  ;;  %v735_v44 = vadd.f32 %v4101_v7, %v4085_v14 }
 0x192   : > { %1206 = vrot.lane.b32.xlu1 %v1200_v48, %s3542_s6  ;;  %1190 = vrot.lane.b32.xlu0 %v1182_v51, %s3542_s6  ;;  %v1270_v51 = vmul.f32 %v1267_v25, %v4141_v12 }
 0x194   : > { %v747_v60 = vpop.permute.xlu1 %746  ;;  %v745_v61 = vpop.permute.xlu0 %744 }
 0x195   : > { %v754_v15 = vadd.f32 %v747_v60, %v694_v57  ;;  %v753_v2 = vadd.f32 %v745_v61, %v693_v53  ;;  %v1287_v53 = vstv %s4125_s19  ;;  %v818_v61 = vmul.f32 %v817_v56, %v3850_v36  ;;  %s4305_s19 = sld [smem:[#allocation4 + $0x34]] }
 0x196   : > { %1210 = vrot.lane.b32.xlu1 %v1202_v62, %s3542_s6  ;;  %1208 = vrot.lane.b32.xlu0 %v1201_v30, %s3542_s6  ;;  %v819_v62 = vmul.f32 %v817_v56, %v3860_v43  ;;  %v1289_v31 = vmul.f32 %v1287_v53, %v4143_v38  ;;  %v820_v43 = vmul.f32 %v817_v56, %v3857_v41 }
 0x197   : > { %v4119_v17 = vadd.f32 %v802_v54, %v753_v2  ;;  %v4121_v18 = vadd.f32 %v803_v20, %v754_v15  ;;  %v1288_v15 = vmul.f32 %v1287_v53, %v4127_v26  ;;  %v1307_v2 = vstv %s3283_s20  ;;  %s3301_s20 = sld [smem:[#allocation4 + $0x4f]] }
 0x198   : > { %v765_v19 = vpop.permute.xlu1 %764  ;;  %v749_v21 = vpop.permute.xlu0 %748  ;;  %v1308_v20 = vmul.f32 %v1307_v2, %v4127_v26  ;;  %v1290_v35 = vmul.f32 %v1287_v53, %v4141_v12  ;;  %v1310_v41 = vmul.f32 %v1307_v2, %v4141_v12 }
 0x199   : > { %v773_v24 = vadd.f32 %v765_v19, %v713_v11  ;;  %v755_v10 = vadd.f32 %v749_v21, %v695_v37  ;;  %v1309_v19 = vmul.f32 %v1307_v2, %v4143_v38  ;;  %v1327_v21 = vstv %s3284_s24  ;;  %s3302_s24 = sld [smem:[#allocation4 + $0x1a]] }
 0x19a   : > { %1228 = vrot.lane.b32.xlu1 %v1221_v22, %s3542_s6  ;;  %1226 = vrot.lane.b32.xlu0 %v1220_v23, %s3542_s6  ;;  %v1329_v25 = vmul.f32 %v1327_v21, %v4143_v38 }
 0x19b   : > { %v4135_v8 = vadd.f32 %v804_v52, %v755_v10  ;;  %v4137_v29 = vadd.f32 %v810_v45, %v773_v24  ;;  %v1328_v24 = vmul.f32 %v1327_v21, %v4127_v26  ;;  %v1347_v10 = vstv %s3285_s25  ;;  %s3303_s25 = sld [smem:[#allocation4 + $0x35]] }
 0x19c   : > { %v769_v13 = vpop.permute.xlu1 %768  ;;  %v767_v6 = vpop.permute.xlu0 %766 }
 0x19d   : > { %v775_v55 = vadd.f32 %v769_v13, %v715_v28  ;;  %v774_v34 = vadd.f32 %v767_v6, %v714_v27  ;;  %v1348_v27 = vmul.f32 %v1347_v10, %v4127_v26  ;;  %v1330_v28 = vmul.f32 %v1327_v21, %v4141_v12 }
 0x19e   : > { %1274 = vrot.lane.b32.xlu1 %v1268_v32, %s3541_s27  ;;  %1230 = vrot.lane.b32.xlu0 %v1222_v33, %s3542_s6  ;;  %v948_v13 = vstv %s3260_s26  ;;  %s3278_s26 = sld [smem:[#allocation4 + $0x12]] }
 0x19f   : > { %v4153_v0 = vadd.f32 %v811_v59, %v774_v34  ;;  %v4155_v16 = vadd.f32 %v812_v5, %v775_v55  ;;  %v1350_v34 = vmul.f32 %v1347_v10, %v4141_v12  ;;  %v1349_v59 = vmul.f32 %v1347_v10, %v4143_v38 }
 0x1a0   : > { %v787_v46 = vpop.permute.xlu1 %786  ;;  %v785_v48 = vpop.permute.xlu0 %784  ;;  %v1367_v5 = vstv %s3286_s28  ;;  %s3304_s28 = sld [smem:[#allocation4 + $0x50]] }
 0x1a1   : > { %v794_v57 = vadd.f32 %v787_v46, %v734_v42  ;;  %v793_v60 = vadd.f32 %v785_v48, %v733_v39  ;;  %v949_v42 = vmul.f32 %v948_v13, %v3945_v4  ;;  %v950_v46 = vmul.f32 %v948_v13, %v3964_v1 }
 0x1a2   : > { %1278 = vrot.lane.b32.xlu1 %v1270_v51, %s3541_s27  ;;  %1276 = vrot.lane.b32.xlu0 %v1269_v50, %s3541_s27 }
 0x1a3   : > { %v4166_v3 = vadd.f32 %v818_v61, %v793_v60  ;;  %v4168_v40 = vadd.f32 %v819_v62, %v794_v57  ;;  %v1369_v60 = vmul.f32 %v1367_v5, %v4143_v38  ;;  %v1368_v61 = vmul.f32 %v1367_v5, %v4127_v26 }
 0x1a4   : > { %v833_v9 = vpop.permute.xlu1 %832  ;;  %v789_v30 = vpop.permute.xlu0 %788  ;;  %v1414_v62 = vstv %s3290_s30  ;;  %s3280_s30 = sld [smem:[#allocation4 + $0x48]] }
 0x1a5   : > { %v795_v36 = vadd.f32 %v789_v30, %v735_v44  ;;  %v841_v6 = vadd.f32 %v833_v9, %v4119_v17  ;;  %v956_v17 = vstv %s3261_s29  ;;  %v4217_v30 = vld [vmem:[#allocation2 + $0x41] sm:$0xff]  ;;  %s3279_s29 = sld [smem:[#allocation4 + $0x2d]] }
 0x1a6   : > { %1296 = vrot.lane.b32.xlu1 %v1289_v31, %s3541_s27  ;;  %1294 = vrot.lane.b32.xlu0 %v1288_v15, %s3541_s27 }
 0x1a7   : > { %v4175_v14 = vadd.f32 %v820_v43, %v795_v36 }
 0x1a8   : > { %v837_v7 = vpop.permute.xlu1 %836  ;;  %v835_v54 = vpop.permute.xlu0 %834 }
 0x1a9   : > { %v842_v32 = vadd.f32 %v835_v54, %v4121_v18  ;;  %v843_v18 = vadd.f32 %v837_v7, %v4135_v8  ;;  %v951_v8 = vmul.f32 %v948_v13, %v3962_v58  ;;  %v1415_v54 = vmul.f32 %v1414_v62, %v4217_v30 }
 0x1aa   : > { %1314 = vrot.lane.b32.xlu1 %v1308_v20, %s3541_s27  ;;  %1298 = vrot.lane.b32.xlu0 %v1290_v35, %s3541_s27  ;;  %v1370_v20 = vmul.f32 %v1367_v5, %v4141_v12 }
 0x1ac   : > { %v855_v37 = vpop.permute.xlu1 %854  ;;  %v853_v11 = vpop.permute.xlu0 %852 }
 0x1ad   : > { %v861_v48 = vadd.f32 %v853_v11, %v4137_v29  ;;  %v957_v29 = vmul.f32 %v956_v17, %v3945_v4  ;;  %v862_v31 = vadd.f32 %v855_v37, %v4153_v0  ;;  %v958_v0 = vmul.f32 %v956_v17, %v3964_v1 }
 0x1ae   : > { %1318 = vrot.lane.b32.xlu1 %v1310_v41, %s3541_s27  ;;  %1316 = vrot.lane.b32.xlu0 %v1309_v19, %s3541_s27  ;;  %v4231_v41 = vld [vmem:[#allocation2 + $0x51] sm:$0xff]  ;;  %v4233_v19 = vld [vmem:[#allocation2 + $0x49] sm:$0xff]  ;;  %v964_v37 = vstv %s4205_s7  ;;  %s3287_s7 = sld [smem:[#allocation4 + $0x15]] }
 0x1af   : > { %v1416_v13 = vmul.f32 %v1414_v62, %v4233_v19 }
 0x1b0   : > { %v4185_v22 = vpop.permute.xlu1 %872  ;;  %v857_v23 = vpop.permute.xlu0 %856 }
 0x1b1   : > { %v863_v15 = vadd.f32 %v857_v23, %v4155_v16  ;;  %v959_v16 = vmul.f32 %v956_v17, %v3962_v58  ;;  %v881_v21 = vadd.f32 %v4185_v22, %v4166_v3 }
 0x1b2   : > { %1336 = vrot.lane.b32.xlu1 %v1329_v25, %s3542_s6  ;;  %1334 = vrot.lane.b32.xlu0 %v1328_v24, %s3542_s6 }
 0x1b4   : > { %v4191_v52 = vpop.permute.xlu1 %876  ;;  %v875_v45 = vpop.permute.xlu0 %874 }
 0x1b5   : > { %v882_v23 = vadd.f32 %v875_v45, %v4168_v40  ;;  %v883_v3 = vadd.f32 %v4191_v52, %v4175_v14 }
 0x1b6   : > { %1354 = vrot.lane.b32.xlu1 %v1348_v27, %s3542_s6  ;;  %1338 = vrot.lane.b32.xlu0 %v1330_v28, %s3542_s6  ;;  %v1417_v28 = vmul.f32 %v1414_v62, %v4231_v41 }
 0x1b8   : > { %v895_v33 = vpop.permute.xlu1 %894  ;;  %v893_v55 = vpop.permute.xlu0 %892 }
 0x1b9   : > { %v902_v56 = vadd.f32 %v895_v33, %v842_v32  ;;  %v901_v39 = vadd.f32 %v893_v55, %v841_v6  ;;  %v1434_v6 = vstv %s4215_s8  ;;  %v965_v55 = vmul.f32 %v964_v37, %v3945_v4  ;;  %s3288_s8 = sld [smem:[#allocation4 + $0x30]] }
 0x1ba   : > { %1358 = vrot.lane.b32.xlu1 %v1350_v34, %s3542_s6  ;;  %1356 = vrot.lane.b32.xlu0 %v1349_v59, %s3542_s6  ;;  %v966_v34 = vmul.f32 %v964_v37, %v3964_v1  ;;  %v1436_v5 = vmul.f32 %v1434_v6, %v4233_v19  ;;  %v967_v1 = vmul.f32 %v964_v37, %v3962_v58 }
 0x1bb   : > { %v4209_v51 = vadd.f32 %v949_v42, %v901_v39  ;;  %v4211_v50 = vadd.f32 %v950_v46, %v902_v56  ;;  %v1435_v56 = vmul.f32 %v1434_v6, %v4217_v30  ;;  %v1454_v39 = vstv %s3292_s9  ;;  %s3289_s9 = sld [smem:[#allocation4 + $0x4b]] }
 0x1bc   : > { %v913_v53 = vpop.permute.xlu1 %912  ;;  %v897_v57 = vpop.permute.xlu0 %896  ;;  %v1455_v46 = vmul.f32 %v1454_v39, %v4217_v30  ;;  %v1437_v17 = vmul.f32 %v1434_v6, %v4231_v41  ;;  %v1457_v58 = vmul.f32 %v1454_v39, %v4231_v41 }
 0x1bd   : > { %v921_v44 = vadd.f32 %v913_v53, %v861_v48  ;;  %v903_v9 = vadd.f32 %v897_v57, %v843_v18  ;;  %v1456_v53 = vmul.f32 %v1454_v39, %v4233_v19  ;;  %v1474_v57 = vstv %s3293_s10  ;;  %s3296_s10 = sld [smem:[#allocation4 + $0x18]] }
 0x1be   : > { %1376 = vrot.lane.b32.xlu1 %v1369_v60, %s3542_s6  ;;  %1374 = vrot.lane.b32.xlu0 %v1368_v61, %s3542_s6  ;;  %v1476_v62 = vmul.f32 %v1474_v57, %v4233_v19 }
 0x1bf   : > { %v4225_v36 = vadd.f32 %v951_v8, %v903_v9  ;;  %v4227_v2 = vadd.f32 %v957_v29, %v921_v44  ;;  %v1475_v44 = vmul.f32 %v1474_v57, %v4217_v30  ;;  %v1494_v9 = vstv %s3294_s11  ;;  %s3297_s11 = sld [smem:[#allocation4 + $0x33]] }
 0x1c0   : > { %v917_v43 = vpop.permute.xlu1 %916  ;;  %v915_v7 = vpop.permute.xlu0 %914 }
 0x1c1   : > { %v923_v35 = vadd.f32 %v917_v43, %v863_v15  ;;  %v922_v11 = vadd.f32 %v915_v7, %v862_v31  ;;  %v1495_v31 = vmul.f32 %v1494_v9, %v4217_v30  ;;  %v1477_v15 = vmul.f32 %v1474_v57, %v4231_v41 }
 0x1c2   : > { %1421 = vrot.lane.b32.xlu1 %v1415_v54, %s3541_s27  ;;  %1378 = vrot.lane.b32.xlu0 %v1370_v20, %s3542_s6  ;;  %v1095_v43 = vstv %s3269_s12  ;;  %s3298_s12 = sld [smem:[#allocation4 + $0x4e]] }
 0x1c3   : > { %v4243_v25 = vadd.f32 %v958_v0, %v922_v11  ;;  %v4245_v24 = vadd.f32 %v959_v16, %v923_v35  ;;  %v1497_v11 = vmul.f32 %v1494_v9, %v4231_v41  ;;  %v1496_v0 = vmul.f32 %v1494_v9, %v4233_v19 }
 0x1c4   : > { %v935_v10 = vpop.permute.xlu1 %934  ;;  %v933_v27 = vpop.permute.xlu0 %932  ;;  %v1514_v16 = vstv %s3295_s13  ;;  %s3309_s13 = sld [smem:[#allocation8 + $0x1]] }
 0x1c5   : > { %v942_v32 = vadd.f32 %v935_v10, %v882_v23  ;;  %v941_v33 = vadd.f32 %v933_v27, %v881_v21  ;;  %v1096_v23 = vmul.f32 %v1095_v43, %v4037_v47  ;;  %v1097_v10 = vmul.f32 %v1095_v43, %v4053_v63 }
 0x1c6   : > { %1425 = vrot.lane.b32.xlu1 %v1417_v28, %s3541_s27  ;;  %1423 = vrot.lane.b32.xlu0 %v1416_v13, %s3541_s27 }
 0x1c7   : > { %v4256_v40 = vadd.f32 %v965_v55, %v941_v33  ;;  %v4258_v22 = vadd.f32 %v966_v34, %v942_v32  ;;  %v1516_v33 = vmul.f32 %v1514_v16, %v4233_v19  ;;  %v1515_v55 = vmul.f32 %v1514_v16, %v4217_v30 }
 0x1c8   : > { %v980_v45 = vpop.permute.xlu1 %979  ;;  %v937_v59 = vpop.permute.xlu0 %936  ;;  %v1561_v34 = vstv %s3299_s15  ;;  %s3312_s15 = sld [smem:[#allocation8 + $0x2]] }
 0x1c9   : > { %v943_v4 = vadd.f32 %v937_v59, %v883_v3  ;;  %v988_v7 = vadd.f32 %v980_v45, %v4209_v51  ;;  %v1103_v51 = vstv %s3270_s14  ;;  %v4307_v59 = vld [vmem:[#allocation2 + $0x42] sm:$0xff]  ;;  %s3310_s14 = sld [smem:[#allocation8 + $0x1c]] }
 0x1ca   : > { %1443 = vrot.lane.b32.xlu1 %v1436_v5, %s3541_s27  ;;  %1441 = vrot.lane.b32.xlu0 %v1435_v56, %s3541_s27 }
 0x1cb   : > { %v4265_v14 = vadd.f32 %v967_v1, %v943_v4 }
 0x1cc   : > { %v984_v52 = vpop.permute.xlu1 %983  ;;  %v982_v42 = vpop.permute.xlu0 %981 }
 0x1cd   : > { %v989_v54 = vadd.f32 %v982_v42, %v4211_v50  ;;  %v990_v50 = vadd.f32 %v984_v52, %v4225_v36  ;;  %v1098_v36 = vmul.f32 %v1095_v43, %v4051_v49  ;;  %v1562_v42 = vmul.f32 %v1561_v34, %v4307_v59 }
 0x1ce   : > { %1461 = vrot.lane.b32.xlu1 %v1455_v46, %s3541_s27  ;;  %1445 = vrot.lane.b32.xlu0 %v1437_v17, %s3541_s27  ;;  %v1517_v46 = vmul.f32 %v1514_v16, %v4231_v41 }
 0x1d0   : > { %v1002_v18 = vpop.permute.xlu1 %1001  ;;  %v1000_v48 = vpop.permute.xlu0 %999 }
 0x1d1   : > { %v1008_v27 = vadd.f32 %v1000_v48, %v4227_v2  ;;  %v1104_v2 = vmul.f32 %v1103_v51, %v4037_v47  ;;  %v1009_v5 = vadd.f32 %v1002_v18, %v4243_v25  ;;  %v1105_v25 = vmul.f32 %v1103_v51, %v4053_v63 }
 0x1d2   : > { %1465 = vrot.lane.b32.xlu1 %v1457_v58, %s3541_s27  ;;  %1463 = vrot.lane.b32.xlu0 %v1456_v53, %s3541_s27  ;;  %v4321_v58 = vld [vmem:[#allocation2 + $0x52] sm:$0xff]  ;;  %v4323_v53 = vld [vmem:[#allocation2 + $0x4a] sm:$0xff]  ;;  %v1111_v18 = vstv %s4295_s16  ;;  %s3313_s16 = sld [smem:[#allocation8 + $0x1d]] }
 0x1d3   : > { %v1563_v43 = vmul.f32 %v1561_v34, %v4323_v53 }
 0x1d4   : > { %v4275_v60 = vpop.permute.xlu1 %1019  ;;  %v1004_v61 = vpop.permute.xlu0 %1003 }
 0x1d5   : > { %v1010_v56 = vadd.f32 %v1004_v61, %v4245_v24  ;;  %v1106_v24 = vmul.f32 %v1103_v51, %v4051_v49  ;;  %v1028_v57 = vadd.f32 %v4275_v60, %v4256_v40 }
 0x1d6   : > { %1483 = vrot.lane.b32.xlu1 %v1476_v62, %s3542_s6  ;;  %1481 = vrot.lane.b32.xlu0 %v1475_v44, %s3542_s6 }
 0x1d8   : > { %v4281_v8 = vpop.permute.xlu1 %1023  ;;  %v1022_v29 = vpop.permute.xlu0 %1021 }
 0x1d9   : > { %v1029_v61 = vadd.f32 %v1022_v29, %v4258_v22  ;;  %v1030_v40 = vadd.f32 %v4281_v8, %v4265_v14 }
 0x1da   : > { %1501 = vrot.lane.b32.xlu1 %v1495_v31, %s3542_s6  ;;  %1485 = vrot.lane.b32.xlu0 %v1477_v15, %s3542_s6  ;;  %v1564_v15 = vmul.f32 %v1561_v34, %v4321_v58 }
 0x1dc   : > { %v1042_v20 = vpop.permute.xlu1 %1041  ;;  %v1040_v35 = vpop.permute.xlu0 %1039 }
 0x1dd   : > { %v1049_v37 = vadd.f32 %v1042_v20, %v989_v54  ;;  %v1048_v21 = vadd.f32 %v1040_v35, %v988_v7  ;;  %v1581_v7 = vstv %s4305_s19  ;;  %v1112_v35 = vmul.f32 %v1111_v18, %v4037_v47  ;;  %s3314_s19 = sld [smem:[#allocation8 + $0x38]] }
 0x1de   : > { %1505 = vrot.lane.b32.xlu1 %v1497_v11, %s3542_s6  ;;  %1503 = vrot.lane.b32.xlu0 %v1496_v0, %s3542_s6  ;;  %v1113_v11 = vmul.f32 %v1111_v18, %v4053_v63  ;;  %v1583_v16 = vmul.f32 %v1581_v7, %v4323_v53  ;;  %v1114_v63 = vmul.f32 %v1111_v18, %v4051_v49 }
 0x1df   : > { %v4299_v28 = vadd.f32 %v1096_v23, %v1048_v21  ;;  %v4301_v13 = vadd.f32 %v1097_v10, %v1049_v37  ;;  %v1582_v37 = vmul.f32 %v1581_v7, %v4307_v59  ;;  %v1601_v21 = vstv %s3301_s20  ;;  %s3318_s20 = sld [smem:[#allocation8 + $0x4]] }
 0x1e0   : > { %v1060_v6 = vpop.permute.xlu1 %1059  ;;  %v1044_v32 = vpop.permute.xlu0 %1043  ;;  %v1602_v10 = vmul.f32 %v1601_v21, %v4307_v59  ;;  %v1584_v51 = vmul.f32 %v1581_v7, %v4321_v58  ;;  %v1604_v49 = vmul.f32 %v1601_v21, %v4321_v58 }
 0x1e1   : > { %v1068_v3 = vadd.f32 %v1060_v6, %v1008_v27  ;;  %v1050_v45 = vadd.f32 %v1044_v32, %v990_v50  ;;  %v1603_v6 = vmul.f32 %v1601_v21, %v4323_v53  ;;  %v1621_v32 = vstv %s3302_s24  ;;  %s3319_s24 = sld [smem:[#allocation8 + $0x1f]] }
 0x1e2   : > { %1523 = vrot.lane.b32.xlu1 %v1516_v33, %s3542_s6  ;;  %1521 = vrot.lane.b32.xlu0 %v1515_v55, %s3542_s6  ;;  %v1623_v34 = vmul.f32 %v1621_v32, %v4323_v53 }
 0x1e3   : > { %v4315_v4 = vadd.f32 %v1098_v36, %v1050_v45  ;;  %v4317_v39 = vadd.f32 %v1104_v2, %v1068_v3  ;;  %v1622_v3 = vmul.f32 %v1621_v32, %v4307_v59  ;;  %v1641_v45 = vstv %s3303_s25  ;;  %s3320_s25 = sld [smem:[#allocation8 + $0x3a]] }
 0x1e4   : > { %v1064_v1 = vpop.permute.xlu1 %1063  ;;  %v1062_v52 = vpop.permute.xlu0 %1061 }
 0x1e5   : > { %v1070_v17 = vadd.f32 %v1064_v1, %v1010_v56  ;;  %v1069_v48 = vadd.f32 %v1062_v52, %v1009_v5  ;;  %v1642_v5 = vmul.f32 %v1641_v45, %v4307_v59  ;;  %v1624_v56 = vmul.f32 %v1621_v32, %v4321_v58 }
 0x1e6   : > { %1568 = vrot.lane.b32.xlu1 %v1562_v42, %s3541_s27  ;;  %1525 = vrot.lane.b32.xlu0 %v1517_v46, %s3542_s6  ;;  %v1243_v1 = vstv %s3278_s26  ;;  %s3321_s26 = sld [smem:[#allocation8 + $0x5]] }
 0x1e7   : > { %v4333_v62 = vadd.f32 %v1105_v25, %v1069_v48  ;;  %v4335_v44 = vadd.f32 %v1106_v24, %v1070_v17  ;;  %v1644_v48 = vmul.f32 %v1641_v45, %v4321_v58  ;;  %v1643_v25 = vmul.f32 %v1641_v45, %v4323_v53 }
 0x1e8   : > { %v1082_v9 = vpop.permute.xlu1 %1081  ;;  %v1080_v31 = vpop.permute.xlu0 %1079  ;;  %v1661_v24 = vstv %s3304_s28  ;;  %s3322_s28 = sld [smem:[#allocation8 + $0x20]] }
 0x1e9   : > { %v1089_v54 = vadd.f32 %v1082_v9, %v1029_v61  ;;  %v1088_v20 = vadd.f32 %v1080_v31, %v1028_v57  ;;  %v1244_v61 = vmul.f32 %v1243_v1, %v4127_v26  ;;  %v1245_v9 = vmul.f32 %v1243_v1, %v4143_v38 }
 0x1ea   : > { %1572 = vrot.lane.b32.xlu1 %v1564_v15, %s3541_s27  ;;  %1570 = vrot.lane.b32.xlu0 %v1563_v43, %s3541_s27 }
 0x1eb   : > { %v4346_v22 = vadd.f32 %v1112_v35, %v1088_v20  ;;  %v4348_v60 = vadd.f32 %v1113_v11, %v1089_v54  ;;  %v1663_v20 = vmul.f32 %v1661_v24, %v4323_v53  ;;  %v1662_v35 = vmul.f32 %v1661_v24, %v4307_v59 }
 0x1ec   : > { %v1127_v29 = vpop.permute.xlu1 %1126  ;;  %v1084_v0 = vpop.permute.xlu0 %1083 }
 0x1ed   : > { %v1090_v47 = vadd.f32 %v1084_v0, %v1030_v40  ;;  %v1135_v52 = vadd.f32 %v1127_v29, %v4299_v28  ;;  %v1251_v28 = vstv %s3279_s29  ;;  %v1246_v29 = vmul.f32 %v1243_v1, %v4141_v12  ;;  %s3323_s29 = sld [smem:[#allocation8 + $0x3b]] }
 0x1ee   : > { %1590 = vrot.lane.b32.xlu1 %v1583_v16, %s3541_s27  ;;  %1588 = vrot.lane.b32.xlu0 %v1582_v37, %s3541_s27  ;;  %v1252_v0 = vmul.f32 %v1251_v28, %v4127_v26 }
 0x1ef   : > { %v4355_v14 = vadd.f32 %v1114_v63, %v1090_v47  ;;  %v1664_v63 = vmul.f32 %v1661_v24, %v4321_v58 }
 0x1f0   : > { %v1131_v8 = vpop.permute.xlu1 %1130  ;;  %v1129_v23 = vpop.permute.xlu0 %1128 }
 0x1f1   : > { %v1136_v42 = vadd.f32 %v1129_v23, %v4301_v13  ;;  %v1137_v13 = vadd.f32 %v1131_v8, %v4315_v4 }
 0x1f2   : > { %1608 = vrot.lane.b32.xlu1 %v1602_v10, %s3541_s27  ;;  %1592 = vrot.lane.b32.xlu0 %v1584_v51, %s3541_s27  ;;  %v1253_v10 = vmul.f32 %v1251_v28, %v4143_v38  ;;  %v1254_v51 = vmul.f32 %v1251_v28, %v4141_v12 }
 0x1f4   : > { %v1149_v50 = vpop.permute.xlu1 %1148  ;;  %v1147_v27 = vpop.permute.xlu0 %1146 }
 0x1f5   : > { %v1155_v31 = vadd.f32 %v1147_v27, %v4317_v39  ;;  %v1156_v4 = vadd.f32 %v1149_v50, %v4333_v62  ;;  %v1259_v27 = vstv %s3280_s30  ;;  %s3327_s30 = sld [smem:[#allocation8 + $0x7]] }
 0x1f6   : > { %1612 = vrot.lane.b32.xlu1 %v1604_v49, %s3541_s27  ;;  %1610 = vrot.lane.b32.xlu0 %v1603_v6, %s3541_s27  ;;  %v1261_v45 = vmul.f32 %v1259_v27, %v4143_v38 }
 0x1f8   : > { %v1167_v33 = vpop.permute.xlu1 %1166  ;;  %v1151_v55 = vpop.permute.xlu0 %1150 }
 0x1f9   : > { %v1157_v39 = vadd.f32 %v1151_v55, %v4335_v44  ;;  %v1175_v49 = vadd.f32 %v1167_v33, %v4346_v22  ;;  %v1262_v22 = vmul.f32 %v1259_v27, %v4141_v12 }
 0x1fa   : > { %1630 = vrot.lane.b32.xlu1 %v1623_v34, %s3542_s6  ;;  %1628 = vrot.lane.b32.xlu0 %v1622_v3, %s3542_s6  ;;  %v1260_v3 = vmul.f32 %v1259_v27, %v4127_v26 }
 0x1fc   : > { %v1171_v36 = vpop.permute.xlu1 %1170  ;;  %v1169_v2 = vpop.permute.xlu0 %1168 }
 0x1fd   : > { %v1176_v62 = vadd.f32 %v1169_v2, %v4348_v60 }
 0x1fe   : > { %1648 = vrot.lane.b32.xlu1 %v1642_v5, %s3542_s6  ;;  %1632 = vrot.lane.b32.xlu0 %v1624_v56, %s3542_s6  ;;  %v1177_v5 = vadd.f32 %v1171_v36, %v4355_v14 }
 0x200   : > { %v1189_v46 = vpop.permute.xlu1 %1188  ;;  %v1187_v17 = vpop.permute.xlu0 %1186 }
 0x201   : > { %v1196_v18 = vadd.f32 %v1189_v46, %v1136_v42  ;;  %v1195_v57 = vadd.f32 %v1187_v17, %v1135_v52 }
 0x202   : > { %1652 = vrot.lane.b32.xlu1 %v1644_v48, %s3542_s6  ;;  %1650 = vrot.lane.b32.xlu0 %v1643_v25, %s3542_s6 }
 0x203   : > { %v1247_v15 = vadd.f32 %v1244_v61, %v1195_v57  ;;  %v1248_v43 = vadd.f32 %v1245_v9, %v1196_v18  ;;  %v1390_v18 = vstv %s3287_s7  ;;  %s3328_s7 = sld [smem:[#allocation8 + $0x22]] }
 0x204   : > { %v1207_v7 = vpop.permute.xlu1 %1206  ;;  %v1191_v54 = vpop.permute.xlu0 %1190  ;;  %v1391_v12 = vmul.f32 %v1390_v18, %v4217_v30 }
 0x205   : > { %v1215_v11 = vadd.f32 %v1207_v7, %v1155_v31  ;;  %v1197_v40 = vadd.f32 %v1191_v54, %v1137_v13  ;;  %v1392_v13 = vmul.f32 %v1390_v18, %v4233_v19  ;;  %v1398_v31 = vstv %s3288_s8  ;;  %s3329_s8 = sld [smem:[#allocation8 + $0x3d]] }
 0x206   : > { %1670 = vrot.lane.b32.xlu1 %v1663_v20, %s3542_s6  ;;  %1668 = vrot.lane.b32.xlu0 %v1662_v35, %s3542_s6 }
 0x207   : > { %v1249_v16 = vadd.f32 %v1246_v29, %v1197_v40  ;;  %v1255_v37 = vadd.f32 %v1252_v0, %v1215_v11 }
 0x208   : > { %v1211_v47 = vpop.permute.xlu1 %1210  ;;  %v1209_v21 = vpop.permute.xlu0 %1208 }
 0x209   : > { %v1217_v8 = vadd.f32 %v1211_v47, %v1157_v39  ;;  %v1216_v23 = vadd.f32 %v1209_v21, %v1156_v4 }
 0x20a   : > { %1672 = vrot.lane.b32.xlu0 %v1664_v63, %s3542_s6 }
 0x20b   : > { %v1256_v44 = vadd.f32 %v1253_v10, %v1216_v23  ;;  %v1257_v50 = vadd.f32 %v1254_v51, %v1217_v8  ;;  %v1406_v51 = vstv %s3289_s9  ;;  %s3330_s9 = sld [smem:[#allocation8 + $0x8]] }
 0x20c   : > { %v1229_v6 = vpop.permute.xlu1 %1228  ;;  %v1227_v32 = vpop.permute.xlu0 %1226 }
 0x20d   : > { %v1236_v55 = vadd.f32 %v1229_v6, %v1176_v62  ;;  %v1235_v34 = vadd.f32 %v1227_v32, %v1175_v49 }
 0x20f   : > { %v1263_v56 = vadd.f32 %v1260_v3, %v1235_v34  ;;  %v1264_v1 = vadd.f32 %v1261_v45, %v1236_v55  ;;  %v1408_v3 = vmul.f32 %v1406_v51, %v4233_v19 }
 0x210   : > { %v1275_v52 = vpop.permute.xlu1 %1274  ;;  %v1231_v42 = vpop.permute.xlu0 %1230 }
 0x211   : > { %v1237_v46 = vadd.f32 %v1231_v42, %v1177_v5  ;;  %v1283_v14 = vadd.f32 %v1275_v52, %v1247_v15  ;;  %v1393_v15 = vmul.f32 %v1390_v18, %v4231_v41 }
 0x213   : > { %v1265_v60 = vadd.f32 %v1262_v22, %v1237_v46 }
 0x214   : > { %v1279_v33 = vpop.permute.xlu1 %1278  ;;  %v1277_v2 = vpop.permute.xlu0 %1276 }
 0x215   : > { %v1284_v36 = vadd.f32 %v1277_v2, %v1248_v43  ;;  %v1285_v7 = vadd.f32 %v1279_v33, %v1249_v16  ;;  %v1399_v43 = vmul.f32 %v1398_v31, %v4217_v30  ;;  %v1400_v16 = vmul.f32 %v1398_v31, %v4233_v19 }
 0x216   : > { %v1409_v33 = vmul.f32 %v1406_v51, %v4231_v41  ;;  %v1537_v19 = vstv %s3296_s10  ;;  %s3331_s10 = sld [smem:[#allocation8 + $0x23]] }
 0x218   : > { %v1297_v17 = vpop.permute.xlu1 %1296  ;;  %v1295_v48 = vpop.permute.xlu0 %1294 }
 0x219   : > { %v1303_v54 = vadd.f32 %v1295_v48, %v1255_v37  ;;  %v1304_v4 = vadd.f32 %v1297_v17, %v1256_v44  ;;  %v1401_v37 = vmul.f32 %v1398_v31, %v4231_v41  ;;  %v1538_v41 = vmul.f32 %v1537_v19, %v4307_v59 }
 0x21c   : > { %v1315_v25 = vpop.permute.xlu1 %1314  ;;  %v1299_v24 = vpop.permute.xlu0 %1298 }
 0x21d   : > { %v1305_v39 = vadd.f32 %v1299_v24, %v1257_v50  ;;  %v1323_v27 = vadd.f32 %v1315_v25, %v1263_v56  ;;  %v1407_v50 = vmul.f32 %v1406_v51, %v4217_v30 }
 0x220   : > { %v1319_v26 = vpop.permute.xlu1 %1318  ;;  %v1317_v38 = vpop.permute.xlu0 %1316 }
 0x221   : > { %v1324_v49 = vadd.f32 %v1317_v38, %v1264_v1  ;;  %v1325_v45 = vadd.f32 %v1319_v26, %v1265_v60 }
 0x224   : > { %v1337_v57 = vpop.permute.xlu1 %1336  ;;  %v1335_v61 = vpop.permute.xlu0 %1334 }
 0x225   : > { %v1344_v9 = vadd.f32 %v1337_v57, %v1284_v36  ;;  %v1343_v28 = vadd.f32 %v1335_v61, %v1283_v14  ;;  %v1539_v61 = vmul.f32 %v1537_v19, %v4323_v53 }
 0x227   : > { %v1394_v20 = vadd.f32 %v1391_v12, %v1343_v28  ;;  %v1395_v35 = vadd.f32 %v1392_v13, %v1344_v9  ;;  %v1545_v9 = vstv %s3297_s11  ;;  %s3332_s11 = sld [smem:[#allocation8 + $0x3e]] }
 0x228   : > { %v1355_v11 = vpop.permute.xlu1 %1354  ;;  %v1339_v40 = vpop.permute.xlu0 %1338 }
 0x229   : > { %v1363_v29 = vadd.f32 %v1355_v11, %v1303_v54  ;;  %v1345_v0 = vadd.f32 %v1339_v40, %v1285_v7 }
 0x22b   : > { %v1396_v47 = vadd.f32 %v1393_v15, %v1345_v0  ;;  %v1402_v21 = vadd.f32 %v1399_v43, %v1363_v29 }
 0x22c   : > { %v1359_v63 = vpop.permute.xlu1 %1358  ;;  %v1357_v8 = vpop.permute.xlu0 %1356 }
 0x22d   : > { %v1365_v23 = vadd.f32 %v1359_v63, %v1305_v39  ;;  %v1364_v10 = vadd.f32 %v1357_v8, %v1304_v4 }
 0x22f   : > { %v1403_v62 = vadd.f32 %v1400_v16, %v1364_v10  ;;  %v1404_v6 = vadd.f32 %v1401_v37, %v1365_v23  ;;  %v1553_v23 = vstv %s3298_s12  ;;  %s3336_s12 = sld [smem:[#allocation8 + $0xa]] }
 0x230   : > { %v1377_v32 = vpop.permute.xlu1 %1376  ;;  %v1375_v55 = vpop.permute.xlu0 %1374 }
 0x231   : > { %v1384_v34 = vadd.f32 %v1377_v32, %v1324_v49  ;;  %v1383_v44 = vadd.f32 %v1375_v55, %v1323_v27  ;;  %v1555_v55 = vmul.f32 %v1553_v23, %v4323_v53 }
 0x233   : > { %v1410_v5 = vadd.f32 %v1407_v50, %v1383_v44  ;;  %v1411_v52 = vadd.f32 %v1408_v3, %v1384_v34 }
 0x234   : > { %v1422_v42 = vpop.permute.xlu1 %1421  ;;  %v1379_v46 = vpop.permute.xlu0 %1378 }
 0x235   : > { %v1385_v22 = vadd.f32 %v1379_v46, %v1325_v45  ;;  %v1430_v60 = vadd.f32 %v1422_v42, %v1394_v20  ;;  %v1540_v20 = vmul.f32 %v1537_v19, %v4321_v58  ;;  %v1556_v46 = vmul.f32 %v1553_v23, %v4321_v58 }
 0x237   : > { %v1412_v56 = vadd.f32 %v1409_v33, %v1385_v22 }
 0x238   : > { %v1426_v1 = vpop.permute.xlu1 %1425  ;;  %v1424_v2 = vpop.permute.xlu0 %1423 }
 0x239   : > { %v1431_v26 = vadd.f32 %v1424_v2, %v1395_v35  ;;  %v1432_v28 = vadd.f32 %v1426_v1, %v1396_v47  ;;  %v1546_v35 = vmul.f32 %v1545_v9, %v4307_v59  ;;  %v1547_v47 = vmul.f32 %v1545_v9, %v4323_v53 }
 0x23c   : > { %v1444_v17 = vpop.permute.xlu1 %1443  ;;  %v1442_v48 = vpop.permute.xlu0 %1441 }
 0x23d   : > { %v1450_v12 = vadd.f32 %v1442_v48, %v1402_v21  ;;  %v1451_v29 = vadd.f32 %v1444_v17, %v1403_v62  ;;  %v1548_v21 = vmul.f32 %v1545_v9, %v4321_v58 }
 0x240   : > { %v1462_v25 = vpop.permute.xlu1 %1461  ;;  %v1446_v24 = vpop.permute.xlu0 %1445 }
 0x241   : > { %v1452_v0 = vadd.f32 %v1446_v24, %v1404_v6  ;;  %v1470_v10 = vadd.f32 %v1462_v25, %v1410_v5  ;;  %v1554_v6 = vmul.f32 %v1553_v23, %v4307_v59 }
 0x244   : > { %v1466_v30 = vpop.permute.xlu1 %1465  ;;  %v1464_v38 = vpop.permute.xlu0 %1463 }
 0x245   : > { %v1471_v16 = vadd.f32 %v1464_v38, %v1411_v52  ;;  %v1472_v34 = vadd.f32 %v1466_v30, %v1412_v56 }
 0x248   : > { %v1484_v18 = vpop.permute.xlu1 %1483  ;;  %v1482_v14 = vpop.permute.xlu0 %1481 }
 0x249   : > { %v1491_v36 = vadd.f32 %v1484_v18, %v1431_v26  ;;  %v1490_v57 = vadd.f32 %v1482_v14, %v1430_v60 }
 0x24b   : > { %v1541_v13 = vadd.f32 %v1538_v41, %v1490_v57  ;;  %v1542_v31 = vadd.f32 %v1539_v61, %v1491_v36 }
 0x24c   : > { %v1502_v7 = vpop.permute.xlu1 %1501  ;;  %v1486_v54 = vpop.permute.xlu0 %1485 }
 0x24d   : > { %v1510_v11 = vadd.f32 %v1502_v7, %v1450_v12  ;;  %v1492_v40 = vadd.f32 %v1486_v54, %v1432_v28 }
 0x24f   : > { %v1543_v15 = vadd.f32 %v1540_v20, %v1492_v40  ;;  %v1549_v43 = vadd.f32 %v1546_v35, %v1510_v11 }
 0x250   : > { %v1506_v4 = vpop.permute.xlu1 %1505  ;;  %v1504_v39 = vpop.permute.xlu0 %1503 }
 0x251   : > { %v1512_v63 = vadd.f32 %v1506_v4, %v1452_v0  ;;  %v1511_v8 = vadd.f32 %v1504_v39, %v1451_v29 }
 0x253   : > { %v1550_v37 = vadd.f32 %v1547_v47, %v1511_v8  ;;  %v1551_v51 = vadd.f32 %v1548_v21, %v1512_v63 }
 0x254   : > { %v1524_v27 = vpop.permute.xlu1 %1523  ;;  %v1522_v49 = vpop.permute.xlu0 %1521 }
 0x255   : > { %v1531_v32 = vadd.f32 %v1524_v27, %v1471_v16  ;;  %v1530_v62 = vadd.f32 %v1522_v49, %v1470_v10 }
 0x257   : > { %v1557_v44 = vadd.f32 %v1554_v6, %v1530_v62  ;;  %v1558_v50 = vadd.f32 %v1555_v55, %v1531_v32  ;;  %v1805_v55 = vstv %s3310_s14  ;;  %s3338_s14 = sld [smem:[#allocation8 + $0x40]] }
 0x258   : > { %v1569_v3 = vpop.permute.xlu1 %1568  ;;  %v1526_v45 = vpop.permute.xlu0 %1525 }
 0x259   : > { %v1532_v42 = vadd.f32 %v1526_v45, %v1472_v34  ;;  %v1577_v59 = vadd.f32 %v1569_v3, %v1541_v13 }
 0x25b   : > { %v1559_v5 = vadd.f32 %v1556_v46, %v1532_v42 }
 0x25c   : > { %v1573_v52 = vpop.permute.xlu1 %1572  ;;  %v1571_v22 = vpop.permute.xlu0 %1570 }
 0x25d   : > { %v1578_v24 = vadd.f32 %v1571_v22, %v1542_v31  ;;  %v1579_v19 = vadd.f32 %v1573_v52, %v1543_v15 }
 0x260   : > { %v1591_v33 = vpop.permute.xlu1 %1590  ;;  %v1589_v1 = vpop.permute.xlu0 %1588 }
 0x261   : > { %v1597_v60 = vadd.f32 %v1589_v1, %v1549_v43  ;;  %v1598_v41 = vadd.f32 %v1591_v33, %v1550_v37  ;;  %v1785_v37 = vstv %s3309_s13  ;;  %v1845_v1 = vstv %s3312_s15  ;;  %s3337_s13 = sld [smem:[#allocation8 + $0x25]] }
 0x262   : > { %s1760_s15 = sld [smem:[#allocation8]] }
 0x264   : > { %v1609_v2 = vpop.permute.xlu1 %1608  ;;  %v1593_v17 = vpop.permute.xlu0 %1592 }
 0x265   : > { %v1599_v61 = vadd.f32 %v1593_v17, %v1551_v51  ;;  %v1617_v54 = vadd.f32 %v1609_v2, %v1557_v44 }
 0x268   : > { %v1613_v48 = vpop.permute.xlu1 %1612  ;;  %v1611_v25 = vpop.permute.xlu0 %1610 }
 0x269   : > { %v1618_v11 = vadd.f32 %v1611_v25, %v1558_v50  ;;  %v1619_v43 = vadd.f32 %v1613_v48, %v1559_v5 }
 0x26c   : > { %v1631_v53 = vpop.permute.xlu1 %1630  ;;  %v1629_v56 = vpop.permute.xlu0 %1628 }
 0x26d   : > { %v1638_v30 = vadd.f32 %v1631_v53, %v1578_v24  ;;  %v1637_v38 = vadd.f32 %v1629_v56, %v1577_v59  ;;  %v1865_v59 = vstv %s3313_s16  ;;  %v1885_v56 = vstv %s3314_s19  ;;  %s1748_s16 = sld [smem:[#allocation9]] }
 0x26e   : > { %s4583_s19 = sld [smem:[#allocation9 + $0x1]] }
 0x26f   : > { %v1693_v26 = vmax.f32 %v1638_v30, 0.0  ;;  %v1692_v18 = vmax.f32 %v1637_v38, 0.0 }
 0x270   : > { %v1649_v58 = vpop.permute.xlu1 %1648  ;;  %v1633_v14 = vpop.permute.xlu0 %1632 }
 0x271   : > { %v1657_v36 = vadd.f32 %v1649_v58, %v1597_v60  ;;  %v1639_v57 = vadd.f32 %v1633_v14, %v1579_v19  ;;  %1700 = vrot.lane.b32.xlu0 %v1693_v26, %s3540_s23  ;;  %1698 = vrot.lane.b32.xlu1 %v1692_v18, %s3540_s23  ;;  %v1932_v18 = vstv %s3318_s20  ;;  %s3307_s20 = sld [smem:[#allocation8 + $0x1b]] }
 0x273   : > { %v1710_v9 = vmax.f32 %v1657_v36, 0.0  ;;  %v1694_v28 = vmax.f32 %v1639_v57, 0.0 }
 0x274   : > { %v1653_v12 = vpop.permute.xlu1 %1652  ;;  %v1651_v13 = vpop.permute.xlu0 %1650 }
 0x275   : > { %v1659_v31 = vadd.f32 %v1653_v12, %v1599_v61  ;;  %v1658_v7 = vadd.f32 %v1651_v13, %v1598_v41  ;;  %1716 = vrot.lane.b32.xlu0 %v1710_v9, %s3540_s23  ;;  %1702 = vrot.lane.b32.xlu1 %v1694_v28, %s3540_s23  ;;  %v1952_v41 = vstv %s3319_s24  ;;  %v1972_v13 = vstv %s3320_s25  ;;  %s3340_s24 = sld [smem:[#allocation8 + $0x26]] }
 0x276   : > { %s3315_s25 = sld [smem:[#allocation8 + $0x3]] }
 0x277   : > { %v1712_v40 = vmax.f32 %v1659_v31, 0.0  ;;  %v1711_v20 = vmax.f32 %v1658_v7, 0.0 }
 0x278   : > { %v1671_v35 = vpop.permute.xlu1 %1670  ;;  %v1669_v29 = vpop.permute.xlu0 %1668 }
 0x279   : > { %v1678_v0 = vadd.f32 %v1671_v35, %v1618_v11  ;;  %v1677_v15 = vadd.f32 %v1669_v29, %v1617_v54  ;;  %1720 = vrot.lane.b32.xlu0 %v1712_v40, %s3540_s23  ;;  %1718 = vrot.lane.b32.xlu1 %v1711_v20, %s3540_s23  ;;  %v1992_v54 = vstv %s3321_s26  ;;  %v2012_v29 = vstv %s3322_s28  ;;  %s3308_s26 = sld [smem:[#allocation8 + $0x36]] }
 0x27a   : > { %s3341_s28 = sld [smem:[#allocation8 + $0x41]] }
 0x27b   : > { %v1730_v4 = vmax.f32 %v1678_v0, 0.0  ;;  %v1729_v39 = vmax.f32 %v1677_v15, 0.0 }
 0x27c   : > { %v1673_v63 = vpop.permute.xlu0 %1672 }
 0x27d   : > { %v1679_v8 = vadd.f32 %v1673_v63, %v1619_v43  ;;  %1737 = vrot.lane.b32.xlu0 %v1730_v4, %s3540_s23  ;;  %1735 = vrot.lane.b32.xlu1 %v1729_v39, %s3540_s23  ;;  %v2032_v43 = vstv %s3323_s29  ;;  %s4600_s29 = sld [smem:[#allocation9 + $0x2]] }
 0x27f   : > { %v1731_v47 = vmax.f32 %v1679_v8, 0.0 }
 0x281   : > { %1739 = vrot.lane.b32.xlu1 %v1731_v47, %s3540_s23  ;;  %s3311_s23 = sld [smem:[#allocation8 + $0x37]] }
 0x287   : > { %v1825_v52 = vstv %s3311_s23  ;;  %s3339_s23 = sld [smem:[#allocation8 + $0xb]] }
 0x2e3   : > { %v1699_v21 = vpop.permute.xlu1 %1698  ;;  %v1701_v23 = vpop.permute.xlu0 %1700 }
 0x2e4   : > { %1707 = vst.msk [vmem:[#allocation3 + $0x1] sm:$0xff] %vm336_vm2, %v1699_v21  ;;  %1708 = vst.msk [vmem:[#allocation3 + $0x9] sm:$0xff] %vm336_vm2, %v1701_v23  ;;  %v2079_v21 = vstv %s3327_s30  ;;  %s4610_s30 = sld [smem:[#allocation8 + $0xd]] }
 0x2e7   : > { %v1703_v10 = vpop.permute.xlu1 %1702  ;;  %v1717_v16 = vpop.permute.xlu0 %1716 }
 0x2e8   : > { %1709 = vst.msk [vmem:[#allocation3 + $0x11] sm:$0xff] %vm336_vm2, %v1703_v10  ;;  %1726 = vst.msk [vmem:[#allocation3 + $0x21] sm:$0xff] %vm336_vm2, %v1717_v16 }
 0x2eb   : > { %v1719_v51 = vpop.permute.xlu1 %1718  ;;  %v1721_v27 = vpop.permute.xlu0 %1720  ;;  %v4432_v49 = vld [vmem:[#allocation3] sm:$0xff]  ;;  %v4434_v32 = vld [vmem:[#allocation3 + $0x8] sm:$0xff] }
 0x2ec   : > { %1727 = vst.msk [vmem:[#allocation3 + $0x29] sm:$0xff] %vm336_vm2, %v1719_v51  ;;  %1728 = vst.msk [vmem:[#allocation3 + $0x31] sm:$0xff] %vm336_vm2, %v1721_v27  ;;  %v1786_v62 = vmul.f32 %v1785_v37, %v4432_v49  ;;  %v1787_v6 = vmul.f32 %v1785_v37, %v4434_v32  ;;  %v1806_v45 = vmul.f32 %v1805_v55, %v4432_v49  ;;  %v4477_v26 = vld [vmem:[#allocation3 + $0x1] sm:$0xff]  ;;  %v4479_v58 = vld [vmem:[#allocation3 + $0x9] sm:$0xff]  ;;  %v2099_v51 = vstv %s3328_s7  ;;  %s4614_s7 = sld [smem:[#allocation8 + $0x1e]] }
 0x2ed   : > { %v1807_v46 = vmul.f32 %v1805_v55, %v4434_v32  ;;  %v1826_v22 = vmul.f32 %v1825_v52, %v4432_v49  ;;  %v1827_v33 = vmul.f32 %v1825_v52, %v4434_v32  ;;  %v1846_v17 = vmul.f32 %v1845_v1, %v4432_v49  ;;  %v4519_v47 = vld [vmem:[#allocation3 + $0x2] sm:$0xff] }
 0x2ee   : > { %1792 = vrot.lane.b32.xlu0 %v1786_v62, %s3541_s27  ;;  %1794 = vrot.lane.b32.xlu1 %v1787_v6, %s3541_s27  ;;  %v1847_v48 = vmul.f32 %v1845_v1, %v4434_v32  ;;  %v1866_v24 = vmul.f32 %v1865_v59, %v4432_v49  ;;  %v1867_v53 = vmul.f32 %v1865_v59, %v4434_v32 }
 0x2ef   : > { %v1736_v34 = vpop.permute.xlu1 %1735  ;;  %v1738_v44 = vpop.permute.xlu0 %1737  ;;  %v4442_v50 = vld [vmem:[#allocation3 + $0x10] sm:$0xff]  ;;  %v1886_v38 = vmul.f32 %v1885_v56, %v4432_v49  ;;  %v1887_v19 = vmul.f32 %v1885_v56, %v4434_v32  ;;  %v1933_v14 = vmul.f32 %v1932_v18, %v4477_v26  ;;  %v1934_v36 = vmul.f32 %v1932_v18, %v4479_v58 }
 0x2f0   : > { %1745 = vst.msk [vmem:[#allocation3 + $0x41] sm:$0xff] %vm336_vm2, %v1736_v34  ;;  %1746 = vst.msk [vmem:[#allocation3 + $0x49] sm:$0xff] %vm336_vm2, %v1738_v44  ;;  %v1788_v3 = vmul.f32 %v1785_v37, %v4442_v50  ;;  %v1808_v5 = vmul.f32 %v1805_v55, %v4442_v50  ;;  %v1828_v2 = vmul.f32 %v1825_v52, %v4442_v50  ;;  %v4485_v57 = vld [vmem:[#allocation3 + $0x11] sm:$0xff]  ;;  %v2119_v34 = vstv %s3329_s8  ;;  %s4623_s8 = sld [smem:[#allocation8 + $0x28]] }
 0x2f1   : > { %v1848_v25 = vmul.f32 %v1845_v1, %v4442_v50  ;;  %v1868_v30 = vmul.f32 %v1865_v59, %v4442_v50  ;;  %v1888_v60 = vmul.f32 %v1885_v56, %v4442_v50  ;;  %v1935_v61 = vmul.f32 %v1932_v18, %v4485_v57  ;;  %v4521_v23 = vld [vmem:[#allocation3 + $0xa] sm:$0xff]  ;;  %v4527_v37 = vld [vmem:[#allocation3 + $0x12] sm:$0xff]  ;;  %v4563_v56 = vld [vmem:[#allocation3 + $0x20] sm:$0xff] }
 0x2f2   : > { %1796 = vrot.lane.b32.xlu0 %v1788_v3, %s3541_s27  ;;  %1812 = vrot.lane.b32.xlu1 %v1806_v45, %s3541_s27  ;;  %v1953_v9 = vmul.f32 %v1952_v41, %v4477_v26  ;;  %v1954_v28 = vmul.f32 %v1952_v41, %v4479_v58  ;;  %v1955_v12 = vmul.f32 %v1952_v41, %v4485_v57  ;;  %v2139_v45 = vstv %s3330_s9  ;;  %s4630_s9 = sld [smem:[#allocation8 + $0x39]] }
 0x2f3   : > { %v1740_v42 = vpop.permute.xlu1 %1739  ;;  %v1973_v31 = vmul.f32 %v1972_v13, %v4477_v26  ;;  %v1974_v7 = vmul.f32 %v1972_v13, %v4479_v58  ;;  %v1975_v11 = vmul.f32 %v1972_v13, %v4485_v57  ;;  %v1993_v40 = vmul.f32 %v1992_v54, %v4477_v26 }
 0x2f4   : > { %1747 = vst.msk [vmem:[#allocation3 + $0x51] sm:$0xff] %vm336_vm2, %v1740_v42  ;;  %v1994_v20 = vmul.f32 %v1992_v54, %v4479_v58  ;;  %v1995_v35 = vmul.f32 %v1992_v54, %v4485_v57  ;;  %v2013_v0 = vmul.f32 %v2012_v29, %v4477_v26  ;;  %v2014_v15 = vmul.f32 %v2012_v29, %v4479_v58 }
 0x2f5   : > { %v2015_v4 = vmul.f32 %v2012_v29, %v4485_v57  ;;  %v2033_v39 = vmul.f32 %v2032_v43, %v4477_v26  ;;  %v2034_v63 = vmul.f32 %v2032_v43, %v4479_v58  ;;  %v2035_v8 = vmul.f32 %v2032_v43, %v4485_v57 }
 0x2f6   : > { %1814 = vrot.lane.b32.xlu0 %v1807_v46, %s3541_s27  ;;  %1816 = vrot.lane.b32.xlu1 %v1808_v5, %s3541_s27  ;;  %v2080_v10 = vmul.f32 %v2079_v21, %v4519_v47  ;;  %v2081_v16 = vmul.f32 %v2079_v21, %v4521_v23  ;;  %v2082_v27 = vmul.f32 %v2079_v21, %v4527_v37  ;;  %v2286_v54 = vstv %s3339_s23  ;;  %s3325_s23 = sld [smem:[#allocation8 + $0x21]] }
 0x2f7   : > { %v2100_v62 = vmul.f32 %v2099_v51, %v4519_v47  ;;  %v2101_v6 = vmul.f32 %v2099_v51, %v4521_v23  ;;  %v2102_v55 = vmul.f32 %v2099_v51, %v4527_v37  ;;  %v2120_v44 = vmul.f32 %v2119_v34, %v4519_v47 }
 0x2f8   : > { %v2121_v3 = vmul.f32 %v2119_v34, %v4521_v23  ;;  %v2122_v42 = vmul.f32 %v2119_v34, %v4527_v37  ;;  %v2140_v46 = vmul.f32 %v2139_v45, %v4519_v47  ;;  %v2141_v5 = vmul.f32 %v2139_v45, %v4521_v23 }
 0x2f9   : > { %v2142_v52 = vmul.f32 %v2139_v45, %v4527_v37  ;;  %v1769_v43 = vstv %s3307_s20  ;;  %v2306_v51 = vstv %s3340_s24  ;;  %v1777_v34 = vstv %s3308_s26  ;;  %s3356_s20 = sld [smem:[#allocation8 + $0x46]] }
 0x2fa   : > { %1832 = vrot.lane.b32.xlu0 %v1826_v22, %s3541_s27  ;;  %1834 = vrot.lane.b32.xlu1 %v1827_v33, %s3541_s27  ;;  %v2159_v22 = vstv %s3331_s10  ;;  %s3347_s10 = sld [smem:[#allocation8 + $0x43]] }
 0x2fb   : > { %v2160_v33 = vmul.f32 %v2159_v22, %v4519_v47  ;;  %v2161_v1 = vmul.f32 %v2159_v22, %v4521_v23  ;;  %s3357_s24 = sld [smem:[#allocation8 + $0x11]] }
 0x2fc   : > { %s3333_s26 = sld [smem:[#allocation8 + $0x9]] }
 0x2fe   : > { %1836 = vrot.lane.b32.xlu0 %v1828_v2, %s3541_s27  ;;  %1852 = vrot.lane.b32.xlu1 %v1846_v17, %s3542_s6  ;;  %v2179_v2 = vstv %s3332_s11  ;;  %v2162_v17 = vmul.f32 %v2159_v22, %v4527_v37  ;;  %s3348_s11 = sld [smem:[#allocation8 + $0xe]] }
 0x2ff   : > { %v2182_v59 = vmul.f32 %v2179_v2, %v4527_v37 }
 0x302   : > { %1854 = vrot.lane.b32.xlu0 %v1847_v48, %s3542_s6  ;;  %1856 = vrot.lane.b32.xlu1 %v1848_v25, %s3542_s6  ;;  %v2180_v48 = vmul.f32 %v2179_v2, %v4519_v47  ;;  %v2181_v25 = vmul.f32 %v2179_v2, %v4521_v23  ;;  %v1772_v2 = vmul.f32 %v1769_v43, %v4442_v50 }
 0x306   : > { %1872 = vrot.lane.b32.xlu0 %v1866_v24, %s3542_s6  ;;  %1874 = vrot.lane.b32.xlu1 %v1867_v53, %s3542_s6  ;;  %v4561_v24 = vld [vmem:[#allocation3 + $0x28] sm:$0xff]  ;;  %v2226_v53 = vstv %s3336_s12  ;;  %s3349_s12 = sld [smem:[#allocation8 + $0x29]] }
 0x30a   : > { %1876 = vrot.lane.b32.xlu0 %v1868_v30, %s3542_s6  ;;  %1892 = vrot.lane.b32.xlu1 %v1886_v38, %s3542_s6  ;;  %v2228_v30 = vmul.f32 %v2226_v53, %v4561_v24  ;;  %v2227_v38 = vmul.f32 %v2226_v53, %v4563_v56 }
 0x30e   : > { %1894 = vrot.lane.b32.xlu0 %v1887_v19, %s3542_s6  ;;  %1896 = vrot.lane.b32.xlu1 %v1888_v60, %s3542_s6  ;;  %v2246_v19 = vstv %s3337_s13  ;;  %v4569_v60 = vld [vmem:[#allocation3 + $0x30] sm:$0xff]  ;;  %s3324_s13 = sld [smem:[#allocation8 + $0x6]] }
 0x30f   : > { %v2247_v18 = vmul.f32 %v2246_v19, %v4563_v56 }
 0x312   : > { %1939 = vrot.lane.b32.xlu0 %v1933_v14, %s3541_s27  ;;  %1941 = vrot.lane.b32.xlu1 %v1934_v36, %s3541_s27  ;;  %v2229_v14 = vmul.f32 %v2226_v53, %v4569_v60 }
 0x316   : > { %1943 = vrot.lane.b32.xlu0 %v1935_v61, %s3541_s27  ;;  %1959 = vrot.lane.b32.xlu1 %v1953_v9, %s3541_s27  ;;  %v2249_v61 = vmul.f32 %v2246_v19, %v4569_v60  ;;  %v2248_v9 = vmul.f32 %v2246_v19, %v4561_v24 }
 0x31a   : > { %1961 = vrot.lane.b32.xlu0 %v1954_v28, %s3541_s27  ;;  %1963 = vrot.lane.b32.xlu1 %v1955_v12, %s3541_s27  ;;  %v2266_v28 = vstv %s3338_s14  ;;  %s3350_s14 = sld [smem:[#allocation8 + $0x44]] }
 0x31b   : > { %v2269_v29 = vmul.f32 %v2266_v28, %v4569_v60 }
 0x31e   : > { %1979 = vrot.lane.b32.xlu0 %v1973_v31, %s3541_s27  ;;  %1981 = vrot.lane.b32.xlu1 %v1974_v7, %s3541_s27  ;;  %v2268_v31 = vmul.f32 %v2266_v28, %v4561_v24  ;;  %v2267_v7 = vmul.f32 %v2266_v28, %v4563_v56 }
 0x322   : > { %1983 = vrot.lane.b32.xlu0 %v1975_v11, %s3541_s27  ;;  %1999 = vrot.lane.b32.xlu1 %v1993_v40, %s3542_s6  ;;  %v1761_v11 = vstv %s1760_s15  ;;  %s3354_s15 = sld [smem:[#allocation8 + $0x10]] }
 0x323   : > { %v1763_v21 = vmul.f32 %v1761_v11, %v4434_v32 }
 0x326   : > { %2001 = vrot.lane.b32.xlu0 %v1994_v20, %s3542_s6  ;;  %2003 = vrot.lane.b32.xlu1 %v1995_v35, %s3542_s6  ;;  %v2287_v35 = vmul.f32 %v2286_v54, %v4563_v56 }
 0x32a   : > { %2019 = vrot.lane.b32.xlu0 %v2013_v0, %s3542_s6  ;;  %2021 = vrot.lane.b32.xlu1 %v2014_v15, %s3542_s6  ;;  %v1762_v0 = vmul.f32 %v1761_v11, %v4432_v49  ;;  %v1749_v15 = vstv %s1748_s16  ;;  %s4718_s16 = sld [smem:[#allocation8 + $0x3c]] }
 0x32e   : > { %2023 = vrot.lane.b32.xlu0 %v2015_v4, %s3542_s6  ;;  %2039 = vrot.lane.b32.xlu1 %v2033_v39, %s3542_s6 }
 0x332   : > { %2041 = vrot.lane.b32.xlu0 %v2034_v63, %s3542_s6  ;;  %2043 = vrot.lane.b32.xlu1 %v2035_v8, %s3542_s6  ;;  %v2289_v63 = vmul.f32 %v2286_v54, %v4569_v60  ;;  %v2288_v8 = vmul.f32 %v2286_v54, %v4561_v24 }
 0x336   : > { %2086 = vrot.lane.b32.xlu0 %v2080_v10, %s3541_s27  ;;  %2088 = vrot.lane.b32.xlu1 %v2081_v16, %s3541_s27  ;;  %v1765_v10 = vadd.f32 %v1762_v0, %v1749_v15  ;;  %v1764_v16 = vmul.f32 %v1761_v11, %v4442_v50 }
 0x338   : > { %v1767_v22 = vadd.f32 %v1764_v16, %v1749_v15 }
 0x33a   : > { %2090 = vrot.lane.b32.xlu0 %v2082_v27, %s3541_s27  ;;  %2106 = vrot.lane.b32.xlu1 %v2100_v62, %s3541_s27  ;;  %v1908_v27 = vstv %s3315_s25  ;;  %s3358_s25 = sld [smem:[#allocation8 + $0x2c]] }
 0x33b   : > { %v1910_v28 = vmul.f32 %v1908_v27, %v4479_v58 }
 0x33e   : > { %2108 = vrot.lane.b32.xlu0 %v2101_v6, %s3541_s27  ;;  %2110 = vrot.lane.b32.xlu1 %v2102_v55, %s3541_s27  ;;  %v1752_v6 = vstv %s4583_s19  ;;  %v1770_v55 = vmul.f32 %v1769_v43, %v4432_v49  ;;  %s4726_s19 = sld [smem:[#allocation8 + $0x2b]] }
 0x342   : > { %2126 = vrot.lane.b32.xlu0 %v2120_v44, %s3541_s27  ;;  %2128 = vrot.lane.b32.xlu1 %v2121_v3, %s3541_s27  ;;  %v1771_v44 = vmul.f32 %v1769_v43, %v4434_v32 }
 0x346   : > { %2130 = vrot.lane.b32.xlu0 %v2122_v42, %s3541_s27  ;;  %2146 = vrot.lane.b32.xlu1 %v2140_v46, %s3542_s6  ;;  %v2308_v42 = vmul.f32 %v2306_v51, %v4561_v24  ;;  %v2307_v46 = vmul.f32 %v2306_v51, %v4563_v56 }
 0x34a   : > { %2148 = vrot.lane.b32.xlu0 %v2141_v5, %s3542_s6  ;;  %2150 = vrot.lane.b32.xlu1 %v2142_v52, %s3542_s6  ;;  %v2326_v5 = vstv %s3341_s28  ;;  %v1766_v52 = vadd.f32 %v1763_v21, %v1749_v15  ;;  %v1780_v15 = vmul.f32 %v1777_v34, %v4442_v50  ;;  %v2393_v50 = vstv %s4623_s8  ;;  %s3359_s28 = sld [smem:[#allocation8 + $0x47]] }
 0x34b   : > { %s4813_s8 = sld [smem:[#allocation8 + $0x2e]] }
 0x34e   : > { %2166 = vrot.lane.b32.xlu0 %v2160_v33, %s3542_s6  ;;  %2168 = vrot.lane.b32.xlu1 %v2161_v1, %s3542_s6  ;;  %v1909_v1 = vmul.f32 %v1908_v27, %v4477_v26 }
 0x352   : > { %2170 = vrot.lane.b32.xlu0 %v2162_v17, %s3542_s6  ;;  %2186 = vrot.lane.b32.xlu1 %v2180_v48, %s3542_s6  ;;  %v1755_v17 = vstv %s4600_s29  ;;  %s3334_s29 = sld [smem:[#allocation8 + $0x24]] }
 0x356   : > { %2188 = vrot.lane.b32.xlu0 %v2181_v25, %s3542_s6  ;;  %2190 = vrot.lane.b32.xlu1 %v2182_v59, %s3542_s6  ;;  %v1773_v25 = vadd.f32 %v1770_v55, %v1752_v6 }
 0x35a   : > { %2235 = vrot.lane.b32.xlu1 %v2228_v30, %s3541_s27  ;;  %2233 = vrot.lane.b32.xlu0 %v2227_v38, %s3541_s27  ;;  %v1774_v30 = vadd.f32 %v1771_v44, %v1752_v6  ;;  %v1778_v38 = vmul.f32 %v1777_v34, %v4432_v49  ;;  %v2373_v49 = vstv %s4610_s30  ;;  %s3363_s30 = sld [smem:[#allocation8 + $0x13]] }
 0x35c   : > { %v1781_v0 = vadd.f32 %v1778_v38, %v1755_v17 }
 0x35e   : > { %2253 = vrot.lane.b32.xlu1 %v2247_v18, %s3541_s27  ;;  %2237 = vrot.lane.b32.xlu0 %v2229_v14, %s3541_s27  ;;  %v2327_v14 = vmul.f32 %v2326_v5, %v4563_v56 }
 0x360   : > { %v4577_v36 = vpop.permute.xlu1 %1794  ;;  %v1793_v41 = vpop.permute.xlu0 %1792 }
 0x361   : > { %v1801_v62 = vadd.f32 %v1793_v41, %v1765_v10  ;;  %v1802_v48 = vadd.f32 %v4577_v36, %v1766_v52  ;;  %v2309_v41 = vmul.f32 %v2306_v51, %v4569_v60  ;;  %v1911_v36 = vmul.f32 %v1908_v27, %v4485_v57 }
 0x362   : > { %2257 = vrot.lane.b32.xlu1 %v2249_v61, %s3541_s27  ;;  %2255 = vrot.lane.b32.xlu0 %v2248_v9, %s3541_s27  ;;  %v1924_v27 = vstv %s4630_s9  ;;  %s3366_s9 = sld [smem:[#allocation8 + $0x14]] }
 0x364   : > { %v4585_v12 = vpop.permute.xlu1 %1812  ;;  %v1797_v13 = vpop.permute.xlu0 %1796 }
 0x365   : > { %v1803_v59 = vadd.f32 %v1797_v13, %v1767_v22  ;;  %v1775_v13 = vadd.f32 %v1772_v2, %v1752_v6  ;;  %v1821_v54 = vadd.f32 %v4585_v12, %v1773_v25  ;;  %v4654_v12 = vld [vmem:[#allocation3 + $0x29] sm:$0xff] }
 0x366   : > { %2275 = vrot.lane.b32.xlu1 %v2268_v31, %s3541_s27  ;;  %2273 = vrot.lane.b32.xlu0 %v2267_v7, %s3541_s27  ;;  %v1779_v31 = vmul.f32 %v1777_v34, %v4434_v32  ;;  %v1916_v7 = vstv %s4614_s7  ;;  %s4805_s7 = sld [smem:[#allocation8 + $0x3f]] }
 0x367   : > { %v1917_v16 = vmul.f32 %v1916_v7, %v4477_v26  ;;  %v1918_v51 = vmul.f32 %v1916_v7, %v4479_v58 }
 0x368   : > { %v4591_v40 = vpop.permute.xlu1 %1816  ;;  %v4593_v20 = vpop.permute.xlu0 %1814  ;;  %v1782_v44 = vadd.f32 %v1779_v31, %v1755_v17 }
 0x369   : > { %v1822_v11 = vadd.f32 %v4593_v20, %v1774_v30  ;;  %v4656_v20 = vld [vmem:[#allocation3 + $0x21] sm:$0xff] }
 0x36a   : > { %2293 = vrot.lane.b32.xlu1 %v2287_v35, %s3542_s6  ;;  %2277 = vrot.lane.b32.xlu0 %v2269_v29, %s3541_s27  ;;  %v2374_v52 = vmul.f32 %v2373_v49, %v4656_v20  ;;  %v2394_v38 = vmul.f32 %v2393_v50, %v4656_v20 }
 0x36c   : > { %v4602_v4 = vpop.permute.xlu1 %1834  ;;  %v4604_v39 = vpop.permute.xlu0 %1832 }
 0x36d   : > { %v1841_v6 = vadd.f32 %v4604_v39, %v1781_v0  ;;  %v1925_v39 = vmul.f32 %v1924_v27, %v4477_v26  ;;  %v1842_v2 = vadd.f32 %v4602_v4, %v1782_v44  ;;  %v2473_v44 = vstv %s3350_s14  ;;  %s3367_s14 = sld [smem:[#allocation8 + $0x2f]] }
 0x36e   : > { %2297 = vrot.lane.b32.xlu1 %v2289_v63, %s3542_s6  ;;  %2295 = vrot.lane.b32.xlu0 %v2288_v8, %s3542_s6  ;;  %v2329_v63 = vmul.f32 %v2326_v5, %v4569_v60  ;;  %v2328_v8 = vmul.f32 %v2326_v5, %v4561_v24  ;;  %v2375_v5 = vmul.f32 %v2373_v49, %v4654_v12 }
 0x370   : > { %v1853_v3 = vpop.permute.xlu1 %1852  ;;  %v4619_v45 = vpop.permute.xlu0 %1836 }
 0x371   : > { %v1861_v33 = vadd.f32 %v1853_v3, %v1801_v62  ;;  %v1823_v62 = vadd.f32 %v4591_v40, %v1775_v13  ;;  %v1783_v3 = vadd.f32 %v1780_v15, %v1755_v17  ;;  %v1919_v40 = vmul.f32 %v1916_v7, %v4485_v57 }
 0x372   : > { %2315 = vrot.lane.b32.xlu1 %v2308_v42, %s3542_s6  ;;  %2313 = vrot.lane.b32.xlu0 %v2307_v46, %s3542_s6  ;;  %v2413_v13 = vstv %s3347_s10  ;;  %v2433_v7 = vstv %s3348_s11  ;;  %s3365_s10 = sld [smem:[#allocation8 + $0x49]] }
 0x373   : > { %v4633_v53 = vadd.f32 %v1909_v1, %v1861_v33  ;;  %v4672_v1 = vld [vmem:[#allocation3 + $0x31] sm:$0xff]  ;;  %v1843_v17 = vadd.f32 %v4619_v45, %v1783_v3  ;;  %v2415_v31 = vmul.f32 %v2413_v13, %v4654_v12  ;;  %v2434_v0 = vmul.f32 %v2433_v7, %v4656_v20  ;;  %s3372_s11 = sld [smem:[#allocation8 + $0x16]] }
 0x374   : > { %v1857_v19 = vpop.permute.xlu1 %1856  ;;  %v1855_v18 = vpop.permute.xlu0 %1854  ;;  %v2416_v15 = vmul.f32 %v2413_v13, %v4672_v1 }
 0x375   : > { %v1863_v61 = vadd.f32 %v1857_v19, %v1803_v59  ;;  %v1862_v9 = vadd.f32 %v1855_v18, %v1802_v48  ;;  %v2376_v19 = vmul.f32 %v2373_v49, %v4672_v1  ;;  %v2414_v49 = vmul.f32 %v2413_v13, %v4656_v20 }
 0x376   : > { %2333 = vrot.lane.b32.xlu1 %v2327_v14, %s3542_s6  ;;  %2317 = vrot.lane.b32.xlu0 %v2309_v41, %s3542_s6  ;;  %v1926_v14 = vmul.f32 %v1924_v27, %v4479_v58  ;;  %v1927_v41 = vmul.f32 %v1924_v27, %v4485_v57  ;;  %v2071_v13 = vstv %s4718_s16  ;;  %s4903_s16 = sld [smem:[#allocation8 + $0x42]] }
 0x377   : > { %v4647_v35 = vadd.f32 %v1910_v28, %v1862_v9  ;;  %v4649_v29 = vadd.f32 %v1911_v36, %v1863_v61  ;;  %v2396_v28 = vmul.f32 %v2393_v50, %v4672_v1  ;;  %v2395_v36 = vmul.f32 %v2393_v50, %v4654_v12 }
 0x378   : > { %v1875_v32 = vpop.permute.xlu1 %1874  ;;  %v1873_v43 = vpop.permute.xlu0 %1872 }
 0x379   : > { %v1882_v21 = vadd.f32 %v1875_v32, %v1822_v11  ;;  %v1881_v10 = vadd.f32 %v1873_v43, %v1821_v54 }
 0x37a   : > { %2337 = vrot.lane.b32.xlu1 %v2329_v63, %s3542_s6  ;;  %2335 = vrot.lane.b32.xlu0 %v2328_v8, %s3542_s6  ;;  %v2436_v63 = vmul.f32 %v2433_v7, %v4672_v1  ;;  %v2435_v8 = vmul.f32 %v2433_v7, %v4654_v12 }
 0x37b   : > { %v4666_v55 = vadd.f32 %v1917_v16, %v1881_v10  ;;  %v4668_v34 = vadd.f32 %v1918_v51, %v1882_v21  ;;  %v2453_v21 = vstv %s3349_s12  ;;  %v2055_v10 = vstv %s3324_s13  ;;  %s3375_s12 = sld [smem:[#allocation8 + $0x17]] }
 0x37c   : > { %v1893_v42 = vpop.permute.xlu1 %1892  ;;  %v1877_v46 = vpop.permute.xlu0 %1876  ;;  %v2455_v27 = vmul.f32 %v2453_v21, %v4654_v12  ;;  %v2056_v3 = vmul.f32 %v2055_v10, %v4519_v47  ;;  %s3342_s13 = sld [smem:[#allocation8 + $0xc]] }
 0x37d   : > { %v1901_v22 = vadd.f32 %v1893_v42, %v1841_v6  ;;  %v1883_v33 = vadd.f32 %v1877_v46, %v1823_v62  ;;  %v2454_v62 = vmul.f32 %v2453_v21, %v4656_v20 }
 0x37e   : > { %2382 = vrot.lane.b32.xlu1 %v2375_v5, %s3541_s27  ;;  %2380 = vrot.lane.b32.xlu0 %v2374_v52, %s3541_s27 }
 0x37f   : > { %v4680_v48 = vadd.f32 %v1919_v40, %v1883_v33  ;;  %v4682_v25 = vadd.f32 %v1925_v39, %v1901_v22  ;;  %v2474_v22 = vmul.f32 %v2473_v44, %v4656_v20  ;;  %v2456_v33 = vmul.f32 %v2453_v21, %v4672_v1 }
 0x380   : > { %v1897_v59 = vpop.permute.xlu1 %1896  ;;  %v1895_v30 = vpop.permute.xlu0 %1894 }
 0x381   : > { %v1903_v18 = vadd.f32 %v1897_v59, %v1843_v17  ;;  %v1902_v26 = vadd.f32 %v1895_v30, %v1842_v2  ;;  %v2057_v2 = vmul.f32 %v2055_v10, %v4521_v23  ;;  %v2058_v17 = vmul.f32 %v2055_v10, %v4527_v37  ;;  %v4758_v10 = vld [vmem:[#allocation3 + $0x32] sm:$0xff] }
 0x382   : > { %2400 = vrot.lane.b32.xlu1 %v2394_v38, %s3541_s27  ;;  %2384 = vrot.lane.b32.xlu0 %v2376_v19, %s3541_s27 }
 0x383   : > { %v4690_v4 = vadd.f32 %v1926_v14, %v1902_v26  ;;  %v4692_v45 = vadd.f32 %v1927_v41, %v1903_v18  ;;  %v2476_v26 = vmul.f32 %v2473_v44, %v4672_v1  ;;  %v2475_v14 = vmul.f32 %v2473_v44, %v4654_v12 }
 0x384   : > { %v1942_v61 = vpop.permute.xlu1 %1941  ;;  %v1940_v9 = vpop.permute.xlu0 %1939  ;;  %v2520_v41 = vstv %s3354_s15  ;;  %s3381_s15 = sld [smem:[#allocation8 + $0x19]] }
 0x385   : > { %v1948_v16 = vadd.f32 %v1940_v9, %v4633_v53  ;;  %v1949_v42 = vadd.f32 %v1942_v61, %v4647_v35  ;;  %v2063_v35 = vstv %s3325_s23  ;;  %v2523_v44 = vmul.f32 %v2520_v41, %v4758_v10  ;;  %s3343_s23 = sld [smem:[#allocation8 + $0x27]] }
 0x386   : > { %2404 = vrot.lane.b32.xlu1 %v2396_v28, %s3541_s27  ;;  %2402 = vrot.lane.b32.xlu0 %v2395_v36, %s3541_s27  ;;  %v4740_v28 = vld [vmem:[#allocation3 + $0x2a] sm:$0xff]  ;;  %v2065_v36 = vmul.f32 %v2063_v35, %v4521_v23 }
 0x388   : > { %v1960_v58 = vpop.permute.xlu1 %1959  ;;  %v1944_v57 = vpop.permute.xlu0 %1943 }
 0x389   : > { %v1950_v53 = vadd.f32 %v1944_v57, %v4649_v29  ;;  %v1968_v29 = vadd.f32 %v1960_v58, %v4666_v55  ;;  %v4742_v55 = vld [vmem:[#allocation3 + $0x22] sm:$0xff] }
 0x38a   : > { %2422 = vrot.lane.b32.xlu1 %v2415_v31, %s3541_s27  ;;  %2420 = vrot.lane.b32.xlu0 %v2414_v49, %s3541_s27 }
 0x38c   : > { %v1964_v54 = vpop.permute.xlu1 %1963  ;;  %v1962_v11 = vpop.permute.xlu0 %1961 }
 0x38d   : > { %v1969_v59 = vadd.f32 %v1962_v11, %v4668_v34  ;;  %v2064_v34 = vmul.f32 %v2063_v35, %v4519_v47  ;;  %v1970_v58 = vadd.f32 %v1964_v54, %v4680_v48  ;;  %v2066_v48 = vmul.f32 %v2063_v35, %v4527_v37 }
 0x38e   : > { %2440 = vrot.lane.b32.xlu1 %v2434_v0, %s3542_s6  ;;  %2424 = vrot.lane.b32.xlu0 %v2416_v15, %s3541_s27  ;;  %v2522_v0 = vmul.f32 %v2520_v41, %v4740_v28  ;;  %v2521_v15 = vmul.f32 %v2520_v41, %v4742_v55  ;;  %v2202_v41 = vstv %s3333_s26  ;;  %s3368_s26 = sld [smem:[#allocation8 + $0x4a]] }
 0x390   : > { %v4706_v32 = vpop.permute.xlu1 %1981  ;;  %v1980_v43 = vpop.permute.xlu0 %1979 }
 0x391   : > { %v1988_v57 = vadd.f32 %v1980_v43, %v4682_v25  ;;  %v2072_v25 = vmul.f32 %v2071_v13, %v4519_v47  ;;  %v1989_v54 = vadd.f32 %v4706_v32, %v4690_v4 }
 0x392   : > { %2444 = vrot.lane.b32.xlu1 %v2436_v63, %s3542_s6  ;;  %2442 = vrot.lane.b32.xlu0 %v2435_v8, %s3542_s6  ;;  %v2540_v63 = vstv %s4726_s19  ;;  %s4921_s19 = sld [smem:[#allocation8 + $0x1a]] }
 0x394   : > { %v2000_v51 = vpop.permute.xlu1 %1999  ;;  %v1984_v50 = vpop.permute.xlu0 %1983 }
 0x395   : > { %v2008_v6 = vadd.f32 %v2000_v51, %v1948_v16  ;;  %v1990_v43 = vadd.f32 %v1984_v50, %v4692_v45 }
 0x396   : > { %2462 = vrot.lane.b32.xlu1 %v2455_v27, %s3542_s6  ;;  %2460 = vrot.lane.b32.xlu0 %v2454_v62, %s3542_s6 }
 0x397   : > { %v4722_v46 = vadd.f32 %v2056_v3, %v2008_v6  ;;  %v2541_v6 = vmul.f32 %v2540_v63, %v4742_v55 }
 0x398   : > { %v2004_v5 = vpop.permute.xlu1 %2003  ;;  %v2002_v52 = vpop.permute.xlu0 %2001 }
 0x399   : > { %v2010_v40 = vadd.f32 %v2004_v5, %v1950_v53  ;;  %v2009_v39 = vadd.f32 %v2002_v52, %v1949_v42  ;;  %v2073_v42 = vmul.f32 %v2071_v13, %v4521_v23  ;;  %v2074_v53 = vmul.f32 %v2071_v13, %v4527_v37 }
 0x39a   : > { %2480 = vrot.lane.b32.xlu1 %v2474_v22, %s3542_s6  ;;  %2464 = vrot.lane.b32.xlu0 %v2456_v33, %s3542_s6  ;;  %v2543_v5 = vmul.f32 %v2540_v63, %v4758_v10  ;;  %v2542_v52 = vmul.f32 %v2540_v63, %v4740_v28  ;;  %v2560_v22 = vstv %s3356_s20  ;;  %s3373_s20 = sld [smem:[#allocation8 + $0x31]] }
 0x39b   : > { %v4734_v30 = vadd.f32 %v2057_v2, %v2009_v39  ;;  %v4736_v38 = vadd.f32 %v2058_v17, %v2010_v40  ;;  %v2562_v33 = vmul.f32 %v2560_v22, %v4740_v28  ;;  %v2561_v40 = vmul.f32 %v2560_v22, %v4742_v55 }
 0x39c   : > { %v2022_v19 = vpop.permute.xlu1 %2021  ;;  %v2020_v18 = vpop.permute.xlu0 %2019  ;;  %v2580_v39 = vstv %s3357_s24  ;;  %s3376_s24 = sld [smem:[#allocation8 + $0x32]] }
 0x39d   : > { %v2029_v61 = vadd.f32 %v2022_v19, %v1969_v59  ;;  %v2028_v9 = vadd.f32 %v2020_v18, %v1968_v29  ;;  %v2581_v35 = vmul.f32 %v2580_v39, %v4742_v55  ;;  %v2563_v29 = vmul.f32 %v2560_v22, %v4758_v10 }
 0x39e   : > { %2484 = vrot.lane.b32.xlu1 %v2476_v26, %s3542_s6  ;;  %2482 = vrot.lane.b32.xlu0 %v2475_v14, %s3542_s6  ;;  %v2583_v18 = vmul.f32 %v2580_v39, %v4758_v10  ;;  %v2582_v26 = vmul.f32 %v2580_v39, %v4740_v28  ;;  %v2600_v14 = vstv %s3358_s25  ;;  %v2218_v22 = vstv %s4805_s7  ;;  %s3351_s25 = sld [smem:[#allocation8 + $0xf]] }
 0x39f   : > { %v4751_v31 = vadd.f32 %v2064_v34, %v2028_v9  ;;  %v4753_v49 = vadd.f32 %v2065_v36, %v2029_v61  ;;  %v2602_v36 = vmul.f32 %v2600_v14, %v4740_v28  ;;  %v2601_v13 = vmul.f32 %v2600_v14, %v4742_v55  ;;  %s3385_s7 = sld [smem:[#allocation8 + $0x35]] }
 0x3a0   : > { %v2040_v7 = vpop.permute.xlu1 %2039  ;;  %v2024_v11 = vpop.permute.xlu0 %2023 }
 0x3a1   : > { %v2048_v8 = vadd.f32 %v2040_v7, %v1988_v57  ;;  %v2030_v21 = vadd.f32 %v2024_v11, %v1970_v58  ;;  %v2620_v57 = vstv %s3359_s28  ;;  %v2203_v7 = vmul.f32 %v2202_v41, %v4563_v56  ;;  %s3352_s28 = sld [smem:[#allocation8 + $0x2a]] }
 0x3a2   : > { %2529 = vrot.lane.b32.xlu1 %v2522_v0, %s3541_s27  ;;  %2527 = vrot.lane.b32.xlu0 %v2521_v15, %s3541_s27 }
 0x3a3   : > { %v4767_v16 = vadd.f32 %v2066_v48, %v2030_v21  ;;  %v4769_v51 = vadd.f32 %v2072_v25, %v2048_v8  ;;  %v2621_v8 = vmul.f32 %v2620_v57, %v4742_v55  ;;  %v2603_v21 = vmul.f32 %v2600_v14, %v4758_v10 }
 0x3a4   : > { %v2044_v27 = vpop.permute.xlu1 %2043  ;;  %v2042_v62 = vpop.permute.xlu0 %2041 }
 0x3a5   : > { %v2050_v47 = vadd.f32 %v2044_v27, %v1990_v43  ;;  %v2049_v3 = vadd.f32 %v2042_v62, %v1989_v54  ;;  %v2204_v54 = vmul.f32 %v2202_v41, %v4561_v24  ;;  %v2205_v43 = vmul.f32 %v2202_v41, %v4569_v60  ;;  %v4845_v41 = vld [vmem:[#allocation3 + $0x50] sm:$0xff] }
 0x3a6   : > { %2547 = vrot.lane.b32.xlu1 %v2541_v6, %s3541_s27  ;;  %2531 = vrot.lane.b32.xlu0 %v2523_v44, %s3541_s27 }
 0x3a7   : > { %v4777_v4 = vadd.f32 %v2073_v42, %v2049_v3  ;;  %v4779_v45 = vadd.f32 %v2074_v53, %v2050_v47  ;;  %v2623_v3 = vmul.f32 %v2620_v57, %v4758_v10  ;;  %v2622_v42 = vmul.f32 %v2620_v57, %v4740_v28 }
 0x3a8   : > { %v2089_v32 = vpop.permute.xlu1 %2088  ;;  %v2087_v50 = vpop.permute.xlu0 %2086  ;;  %v2667_v53 = vstv %s3363_s30  ;;  %s3353_s30 = sld [smem:[#allocation8 + $0x45]] }
 0x3a9   : > { %v2095_v61 = vadd.f32 %v2087_v50, %v4722_v46  ;;  %v2096_v11 = vadd.f32 %v2089_v32, %v4734_v30  ;;  %v2210_v30 = vstv %s3334_s29  ;;  %v2670_v57 = vmul.f32 %v2667_v53, %v4845_v41  ;;  %s3382_s29 = sld [smem:[#allocation8 + $0x34]] }
 0x3aa   : > { %2551 = vrot.lane.b32.xlu1 %v2543_v5, %s3541_s27  ;;  %2549 = vrot.lane.b32.xlu0 %v2542_v52, %s3541_s27  ;;  %v4827_v5 = vld [vmem:[#allocation3 + $0x48] sm:$0xff]  ;;  %v2212_v52 = vmul.f32 %v2210_v30, %v4561_v24 }
 0x3ac   : > { %v2107_v23 = vpop.permute.xlu1 %2106  ;;  %v2091_v37 = vpop.permute.xlu0 %2090 }
 0x3ad   : > { %v2097_v46 = vadd.f32 %v2091_v37, %v4736_v38  ;;  %v2115_v38 = vadd.f32 %v2107_v23, %v4751_v31  ;;  %v4829_v31 = vld [vmem:[#allocation3 + $0x40] sm:$0xff] }
 0x3ae   : > { %2569 = vrot.lane.b32.xlu1 %v2562_v33, %s3541_s27  ;;  %2567 = vrot.lane.b32.xlu0 %v2561_v40, %s3541_s27 }
 0x3b0   : > { %v2111_v2 = vpop.permute.xlu1 %2110  ;;  %v2109_v17 = vpop.permute.xlu0 %2108 }
 0x3b1   : > { %v2116_v27 = vadd.f32 %v2109_v17, %v4753_v49  ;;  %v2211_v49 = vmul.f32 %v2210_v30, %v4563_v56  ;;  %v2117_v23 = vadd.f32 %v2111_v2, %v4767_v16  ;;  %v2213_v16 = vmul.f32 %v2210_v30, %v4569_v60 }
 0x3b2   : > { %2587 = vrot.lane.b32.xlu1 %v2581_v35, %s3542_s6  ;;  %2571 = vrot.lane.b32.xlu0 %v2563_v29, %s3541_s27  ;;  %v2669_v35 = vmul.f32 %v2667_v53, %v4827_v5  ;;  %v2668_v29 = vmul.f32 %v2667_v53, %v4829_v31 }
 0x3b4   : > { %v4793_v59 = vpop.permute.xlu1 %2128  ;;  %v2127_v19 = vpop.permute.xlu0 %2126 }
 0x3b5   : > { %v2135_v37 = vadd.f32 %v2127_v19, %v4769_v51  ;;  %v2219_v51 = vmul.f32 %v2218_v22, %v4563_v56  ;;  %v2136_v2 = vadd.f32 %v4793_v59, %v4777_v4 }
 0x3b6   : > { %2591 = vrot.lane.b32.xlu1 %v2583_v18, %s3542_s6  ;;  %2589 = vrot.lane.b32.xlu0 %v2582_v26, %s3542_s6  ;;  %v2687_v18 = vstv %s4813_s8  ;;  %s3374_s8 = sld [smem:[#allocation8 + $0x4c]] }
 0x3b8   : > { %v2147_v9 = vpop.permute.xlu1 %2146  ;;  %v2131_v34 = vpop.permute.xlu0 %2130 }
 0x3b9   : > { %v2155_v58 = vadd.f32 %v2147_v9, %v2095_v61  ;;  %v2137_v19 = vadd.f32 %v2131_v34, %v4779_v45 }
 0x3ba   : > { %2609 = vrot.lane.b32.xlu1 %v2602_v36, %s3542_s6  ;;  %2607 = vrot.lane.b32.xlu0 %v2601_v13, %s3542_s6 }
 0x3bb   : > { %v4809_v0 = vadd.f32 %v2203_v7, %v2155_v58  ;;  %v2688_v58 = vmul.f32 %v2687_v18, %v4829_v31 }
 0x3bc   : > { %v2151_v15 = vpop.permute.xlu1 %2150  ;;  %v2149_v63 = vpop.permute.xlu0 %2148 }
 0x3bd   : > { %v2157_v48 = vadd.f32 %v2151_v15, %v2097_v46  ;;  %v2156_v25 = vadd.f32 %v2149_v63, %v2096_v11  ;;  %v2220_v11 = vmul.f32 %v2218_v22, %v4561_v24  ;;  %v2221_v46 = vmul.f32 %v2218_v22, %v4569_v60 }
 0x3be   : > { %2627 = vrot.lane.b32.xlu1 %v2621_v8, %s3542_s6  ;;  %2611 = vrot.lane.b32.xlu0 %v2603_v21, %s3542_s6  ;;  %v2690_v15 = vmul.f32 %v2687_v18, %v4845_v41  ;;  %v2689_v63 = vmul.f32 %v2687_v18, %v4827_v5  ;;  %v2727_v8 = vstv %s3366_s9  ;;  %v4870_v21 = vstv %s3365_s10  ;;  %s3377_s9 = sld [smem:[#allocation8 + $0x4d]] }
 0x3bf   : > { %v4821_v62 = vadd.f32 %v2204_v54, %v2156_v25  ;;  %v4823_v6 = vadd.f32 %v2205_v43, %v2157_v48  ;;  %v2728_v48 = vmul.f32 %v2727_v8, %v4829_v31  ;;  %v2708_v25 = vmul.f32 %v4870_v21, %v4829_v31  ;;  %s3383_s10 = sld [smem:[#allocation8 + $0x4f]] }
 0x3c0   : > { %v2169_v44 = vpop.permute.xlu1 %2168  ;;  %v2167_v47 = vpop.permute.xlu0 %2166  ;;  %v2730_v30 = vmul.f32 %v2727_v8, %v4845_v41 }
 0x3c1   : > { %v2176_v32 = vadd.f32 %v2169_v44, %v2116_v27  ;;  %v2175_v50 = vadd.f32 %v2167_v47, %v2115_v38  ;;  %v2729_v38 = vmul.f32 %v2727_v8, %v4827_v5  ;;  %v4883_v27 = vld [vmem:[#allocation3 + $0x49] sm:$0xff]  ;;  %v2814_v44 = vstv %s3372_s11  ;;  %v4885_v47 = vld [vmem:[#allocation3 + $0x41] sm:$0xff]  ;;  %s3360_s11 = sld [smem:[#allocation8 + $0x12]] }
 0x3c2   : > { %2631 = vrot.lane.b32.xlu1 %v2623_v3, %s3542_s6  ;;  %2629 = vrot.lane.b32.xlu0 %v2622_v42, %s3542_s6  ;;  %v2816_v53 = vmul.f32 %v2814_v44, %v4883_v27 }
 0x3c3   : > { %v4838_v33 = vadd.f32 %v2211_v49, %v2175_v50  ;;  %v4840_v40 = vadd.f32 %v2212_v52, %v2176_v32  ;;  %v2815_v32 = vmul.f32 %v2814_v44, %v4885_v47  ;;  %v2874_v50 = vstv %s3375_s12  ;;  %v4893_v49 = vld [vmem:[#allocation3 + $0x51] sm:$0xff]  ;;  %s3386_s12 = sld [smem:[#allocation8 + $0x50]] }
 0x3c4   : > { %v2187_v39 = vpop.permute.xlu1 %2186  ;;  %v2171_v17 = vpop.permute.xlu0 %2170  ;;  %v2349_v52 = vstv %s3342_s13  ;;  %s3361_s13 = sld [smem:[#allocation8 + $0x2d]] }
 0x3c5   : > { %v2195_v26 = vadd.f32 %v2187_v39, %v2135_v37  ;;  %v2177_v14 = vadd.f32 %v2171_v17, %v2117_v23  ;;  %v2875_v39 = vmul.f32 %v2874_v50, %v4885_v47  ;;  %v2817_v17 = vmul.f32 %v2814_v44, %v4893_v49 }
 0x3c6   : > { %2676 = vrot.lane.b32.xlu1 %v2669_v35, %s3541_s27  ;;  %2674 = vrot.lane.b32.xlu0 %v2668_v29, %s3541_s27  ;;  %v2350_v29 = vmul.f32 %v2349_v52, %v4656_v20 }
 0x3c7   : > { %v4854_v61 = vadd.f32 %v2213_v16, %v2177_v14  ;;  %v4856_v9 = vadd.f32 %v2219_v51, %v2195_v26  ;;  %v2877_v51 = vmul.f32 %v2874_v50, %v4893_v49 }
 0x3c8   : > { %v2191_v36 = vpop.permute.xlu1 %2190  ;;  %v2189_v13 = vpop.permute.xlu0 %2188 }
 0x3c9   : > { %v2197_v56 = vadd.f32 %v2191_v36, %v2137_v19  ;;  %v2196_v7 = vadd.f32 %v2189_v13, %v2136_v2  ;;  %v2876_v2 = vmul.f32 %v2874_v50, %v4883_v27  ;;  %v2747_v19 = vstv %s3367_s14  ;;  %s3362_s14 = sld [smem:[#allocation8 + $0x48]] }
 0x3ca   : > { %2694 = vrot.lane.b32.xlu1 %v2688_v58, %s3541_s27  ;;  %2678 = vrot.lane.b32.xlu0 %v2670_v57, %s3541_s27  ;;  %v2351_v58 = vmul.f32 %v2349_v52, %v4654_v12  ;;  %v2352_v57 = vmul.f32 %v2349_v52, %v4672_v1  ;;  %v2750_v50 = vmul.f32 %v2747_v19, %v4845_v41 }
 0x3cb   : > { %v4864_v4 = vadd.f32 %v2220_v11, %v2196_v7  ;;  %v4866_v45 = vadd.f32 %v2221_v46, %v2197_v56 }
 0x3cc   : > { %v2236_v59 = vpop.permute.xlu1 %2235  ;;  %v2234_v34 = vpop.permute.xlu0 %2233 }
 0x3cd   : > { %v2242_v22 = vadd.f32 %v2234_v34, %v4809_v0  ;;  %v2243_v18 = vadd.f32 %v2236_v59, %v4821_v62  ;;  %v2357_v62 = vstv %s3343_s23  ;;  %v2749_v34 = vmul.f32 %v2747_v19, %v4827_v5  ;;  %s3370_s23 = sld [smem:[#allocation8 + $0x30]] }
 0x3ce   : > { %2698 = vrot.lane.b32.xlu1 %v2690_v15, %s3541_s27  ;;  %2696 = vrot.lane.b32.xlu0 %v2689_v63, %s3541_s27  ;;  %v2748_v15 = vmul.f32 %v2747_v19, %v4829_v31  ;;  %v2961_v63 = vstv %s3381_s15  ;;  %s3379_s15 = sld [smem:[#allocation8 + $0x33]] }
 0x3d0   : > { %v2254_v24 = vpop.permute.xlu1 %2253  ;;  %v2238_v60 = vpop.permute.xlu0 %2237 }
 0x3d1   : > { %v2244_v0 = vadd.f32 %v2238_v60, %v4823_v6  ;;  %v2262_v6 = vadd.f32 %v2254_v24, %v4838_v33  ;;  %v2358_v33 = vmul.f32 %v2357_v62, %v4656_v20  ;;  %v2365_v24 = vstv %s4903_s16 }
 0x3d2   : > { %2734 = vrot.lane.b32.xlu1 %v2728_v48, %s3542_s6  ;;  %2714 = vrot.lane.b32.xlu0 %v2708_v25, %s3541_s27  ;;  %v4923_v48 = vld [vmem:[#allocation3 + $0x42] sm:$0xff]  ;;  %v2368_v19 = vmul.f32 %v2365_v24, %v4672_v1 }
 0x3d4   : > { %v4879_v54 = vpop.permute.xlu1 %2257  ;;  %v2256_v43 = vpop.permute.xlu0 %2255 }
 0x3d5   : > { %v2263_v56 = vadd.f32 %v2256_v43, %v4840_v40  ;;  %v2359_v40 = vmul.f32 %v2357_v62, %v4654_v12  ;;  %v2264_v25 = vadd.f32 %v4879_v54, %v4854_v61  ;;  %v2360_v61 = vmul.f32 %v2357_v62, %v4672_v1 }
 0x3d6   : > { %2738 = vrot.lane.b32.xlu1 %v2730_v30, %s3542_s6  ;;  %2736 = vrot.lane.b32.xlu0 %v2729_v38, %s3542_s6  ;;  %v2834_v62 = vstv %s3373_s20  ;;  %s5086_s20 = scalar_lea.vmem %s5132_s5, %s3401_s17  ;;  %s3380_s17 = sld [smem:[#allocation8 + $0x4e]] }
 0x3d8   : > { %v4889_v3 = vpop.permute.xlu1 %2275  ;;  %v2274_v42 = vpop.permute.xlu0 %2273 }
 0x3d9   : > { %v2282_v43 = vadd.f32 %v2274_v42, %v4856_v9  ;;  %v2366_v9 = vmul.f32 %v2365_v24, %v4656_v20  ;;  %v2283_v54 = vadd.f32 %v4889_v3, %v4864_v4 }
 0x3da   : > { %2823 = vrot.lane.b32.xlu1 %v2816_v53, %s3541_s27  ;;  %2821 = vrot.lane.b32.xlu0 %v2815_v32, %s3541_s27  ;;  %v2962_v32 = vmul.f32 %v2961_v63, %v4923_v48 }
 0x3dc   : > { %v2294_v23 = vpop.permute.xlu1 %2293  ;;  %v2278_v37 = vpop.permute.xlu0 %2277 }
 0x3dd   : > { %v2302_v35 = vadd.f32 %v2294_v23, %v2242_v22  ;;  %v4935_v23 = vld [vmem:[#allocation3 + $0x52] sm:$0xff]  ;;  %v2284_v42 = vadd.f32 %v2278_v37, %v4866_v45 }
 0x3de   : > { %2881 = vrot.lane.b32.xlu1 %v2875_v39, %s3542_s6  ;;  %2825 = vrot.lane.b32.xlu0 %v2817_v17, %s3541_s27  ;;  %v4937_v39 = vld [vmem:[#allocation3 + $0x4a] sm:$0xff] }
 0x3df   : > { %v4907_v26 = vadd.f32 %v2350_v29, %v2302_v35 }
 0x3e0   : > { %v2298_v14 = vpop.permute.xlu1 %2297  ;;  %v2296_v16 = vpop.permute.xlu0 %2295 }
 0x3e1   : > { %v2304_v36 = vadd.f32 %v2298_v14, %v2244_v0  ;;  %v2303_v13 = vadd.f32 %v2296_v16, %v2243_v18  ;;  %v2964_v0 = vmul.f32 %v2961_v63, %v4935_v23  ;;  %v2963_v14 = vmul.f32 %v2961_v63, %v4937_v39 }
 0x3e2   : > { %2885 = vrot.lane.b32.xlu1 %v2877_v51, %s3542_s6  ;;  %2883 = vrot.lane.b32.xlu0 %v2876_v2, %s3542_s6  ;;  %v3021_v16 = vstv %s4921_s19  ;;  %v2367_v2 = vmul.f32 %v2365_v24, %v4654_v12 }
 0x3e3   : > { %v2354_v7 = vadd.f32 %v2351_v58, %v2303_v13  ;;  %v4917_v11 = vadd.f32 %v2352_v57, %v2304_v36  ;;  %v3023_v36 = vmul.f32 %v3021_v16, %v4937_v39  ;;  %v3022_v13 = vmul.f32 %v3021_v16, %v4923_v48 }
 0x3e4   : > { %v2316_v46 = vpop.permute.xlu1 %2315  ;;  %v2314_v59 = vpop.permute.xlu0 %2313 }
 0x3e5   : > { %v2323_v8 = vadd.f32 %v2316_v46, %v2263_v56  ;;  %v2322_v60 = vadd.f32 %v2314_v59, %v2262_v6  ;;  %v2835_v6 = vmul.f32 %v2834_v62, %v4885_v47  ;;  %v3024_v56 = vmul.f32 %v3021_v16, %v4935_v23 }
 0x3e6   : > { %2756 = vrot.lane.b32.xlu1 %v2749_v34, %s3542_s6  ;;  %2754 = vrot.lane.b32.xlu0 %v2748_v15, %s3542_s6  ;;  %v2837_v34 = vmul.f32 %v2834_v62, %v4893_v49  ;;  %v2836_v15 = vmul.f32 %v2834_v62, %v4883_v27  ;;  %v2504_v16 = vstv %s3352_s28 }
 0x3e7   : > { %v2361_v30 = vadd.f32 %v2358_v33, %v2322_v60  ;;  %v2362_v38 = vadd.f32 %v2359_v40, %v2323_v8  ;;  %v2894_v60 = vstv %s3376_s24 }
 0x3e8   : > { %v2334_v44 = vpop.permute.xlu1 %2333  ;;  %v2318_v53 = vpop.permute.xlu0 %2317  ;;  %v2896_v40 = vmul.f32 %v2894_v60, %v4883_v27  ;;  %v2895_v24 = vmul.f32 %v2894_v60, %v4885_v47 }
 0x3e9   : > { %v2342_v52 = vadd.f32 %v2334_v44, %v2282_v43  ;;  %v2324_v22 = vadd.f32 %v2318_v53, %v2264_v25  ;;  %v2709_v53 = vmul.f32 %v4870_v21, %v4827_v5 }
 0x3ea   : > { %2968 = vrot.lane.b32.xlu1 %v2962_v32, %s3541_s27  ;;  %2758 = vrot.lane.b32.xlu0 %v2750_v50, %s3542_s6  ;;  %v2897_v32 = vmul.f32 %v2894_v60, %v4893_v49 }
 0x3eb   : > { %v2363_v17 = vadd.f32 %v2360_v61, %v2324_v22  ;;  %v2369_v35 = vadd.f32 %v2366_v9, %v2342_v52  ;;  %v2767_v22 = vstv %s3368_s26 }
 0x3ec   : > { %v2338_v29 = vpop.permute.xlu1 %2337  ;;  %v2336_v18 = vpop.permute.xlu0 %2335 }
 0x3ed   : > { %v2344_v51 = vadd.f32 %v2338_v29, %v2284_v42  ;;  %v2343_v20 = vadd.f32 %v2336_v18, %v2283_v54 }
 0x3ee   : > { %2972 = vrot.lane.b32.xlu1 %v2964_v0, %s3541_s27  ;;  %2970 = vrot.lane.b32.xlu0 %v2963_v14, %s3541_s27 }
 0x3ef   : > { %v2370_v4 = vadd.f32 %v2367_v2, %v2343_v20  ;;  %v2371_v45 = vadd.f32 %v2368_v19, %v2344_v51 }
 0x3f0   : > { %v2383_v3 = vpop.permute.xlu1 %2382  ;;  %v2381_v37 = vpop.permute.xlu0 %2380 }
 0x3f1   : > { %v2390_v58 = vadd.f32 %v2383_v3, %v2354_v7  ;;  %v2389_v57 = vadd.f32 %v2381_v37, %v4907_v26 }
 0x3f2   : > { %3030 = vrot.lane.b32.xlu1 %v3023_v36, %s3542_s6  ;;  %3028 = vrot.lane.b32.xlu0 %v3022_v13, %s3542_s6  ;;  %v2505_v36 = vmul.f32 %v2504_v16, %v4742_v55  ;;  %v2506_v13 = vmul.f32 %v2504_v16, %v4740_v28 }
 0x3f4   : > { %v2401_v12 = vpop.permute.xlu1 %2400  ;;  %v2385_v1 = vpop.permute.xlu0 %2384 }
 0x3f5   : > { %v2409_v46 = vadd.f32 %v2401_v12, %v2361_v30  ;;  %v2391_v59 = vadd.f32 %v2385_v1, %v4917_v11  ;;  %v2496_v30 = vstv %s3351_s25 }
 0x3f6   : > { %2841 = vrot.lane.b32.xlu1 %v2835_v6, %s3541_s27  ;;  %3032 = vrot.lane.b32.xlu0 %v3024_v56, %s3542_s6  ;;  %v2497_v61 = vmul.f32 %v2496_v30, %v4742_v55  ;;  %v2498_v0 = vmul.f32 %v2496_v30, %v4740_v28  ;;  %v2499_v14 = vmul.f32 %v2496_v30, %v4758_v10 }
 0x3f8   : > { %v2405_v26 = vpop.permute.xlu1 %2404  ;;  %v2403_v7 = vpop.permute.xlu0 %2402 }
 0x3f9   : > { %v4965_v63 = vadd.f32 %v2405_v26, %v2363_v17  ;;  %v2410_v8 = vadd.f32 %v2403_v7, %v2362_v38  ;;  %v2768_v17 = vmul.f32 %v2767_v22, %v4829_v31  ;;  %v2507_v7 = vmul.f32 %v2504_v16, %v4758_v10 }
 0x3fa   : > { %2845 = vrot.lane.b32.xlu1 %v2837_v34, %s3541_s27  ;;  %2843 = vrot.lane.b32.xlu0 %v2836_v15, %s3541_s27 }
 0x3fc   : > { %v2423_v11 = vpop.permute.xlu1 %2422  ;;  %v2421_v33 = vpop.permute.xlu0 %2420 }
 0x3fd   : > { %v4971_v25 = vadd.f32 %v2423_v11, %v2370_v4  ;;  %v2429_v43 = vadd.f32 %v2421_v33, %v2369_v35  ;;  %v2710_v35 = vmul.f32 %v4870_v21, %v4845_v41  ;;  %v2770_v21 = vmul.f32 %v2767_v22, %v4845_v41 }
 0x3fe   : > { %2903 = vrot.lane.b32.xlu1 %v2896_v40, %s3542_s6  ;;  %2901 = vrot.lane.b32.xlu0 %v2895_v24, %s3542_s6  ;;  %v2769_v4 = vmul.f32 %v2767_v22, %v4827_v5 }
 0x400   : > { %v2441_v38 = vpop.permute.xlu1 %2440  ;;  %v2425_v44 = vpop.permute.xlu0 %2424 }
 0x401   : > { %v2449_v50 = vadd.f32 %v2441_v38, %v2389_v57  ;;  %v2431_v52 = vadd.f32 %v2425_v44, %v2371_v45  ;;  %v2981_v45 = vstv %s3382_s29 }
 0x402   : > { %2716 = vrot.lane.b32.xlu1 %v2709_v53, %s3541_s27  ;;  %2905 = vrot.lane.b32.xlu0 %v2897_v32, %s3542_s6  ;;  %v2983_v6 = vmul.f32 %v2981_v45, %v4937_v39  ;;  %v2982_v56 = vmul.f32 %v2981_v45, %v4923_v48  ;;  %v2984_v40 = vmul.f32 %v2981_v45, %v4935_v23  ;;  %v3001_v45 = vstv %s3383_s10 }
 0x403   : > { %v4981_v9 = vadd.f32 %v2497_v61, %v2449_v50 }
 0x404   : > { %v2445_v54 = vpop.permute.xlu1 %2444  ;;  %v2443_v42 = vpop.permute.xlu0 %2442 }
 0x405   : > { %v2451_v29 = vadd.f32 %v2445_v54, %v2391_v59  ;;  %v2450_v18 = vadd.f32 %v2443_v42, %v2390_v58  ;;  %v2512_v58 = vstv %s3353_s30  ;;  %v3041_v59 = vstv %s3385_s7 }
 0x406   : > { %2774 = vrot.lane.b32.xlu1 %v2768_v17, %s3542_s6  ;;  %2718 = vrot.lane.b32.xlu0 %v2710_v35, %s3541_s27  ;;  %v2513_v34 = vmul.f32 %v2512_v58, %v4742_v55  ;;  %v3042_v33 = vmul.f32 %v3041_v59, %v4923_v48  ;;  %v2515_v55 = vmul.f32 %v2512_v58, %v4758_v10  ;;  %v2914_v54 = vstv %s3377_s9 }
 0x407   : > { %v4990_v51 = vadd.f32 %v2498_v0, %v2450_v18  ;;  %v4992_v20 = vadd.f32 %v2499_v14, %v2451_v29  ;;  %v3044_v32 = vmul.f32 %v3041_v59, %v4935_v23  ;;  %v3043_v50 = vmul.f32 %v3041_v59, %v4937_v39 }
 0x408   : > { %v2463_v2 = vpop.permute.xlu1 %2462  ;;  %v2461_v19 = vpop.permute.xlu0 %2460  ;;  %v2915_v35 = vmul.f32 %v2914_v54, %v4885_v47 }
 0x409   : > { %v2470_v3 = vadd.f32 %v2463_v2, %v2410_v8  ;;  %v2469_v37 = vadd.f32 %v2461_v19, %v2409_v46  ;;  %v2917_v2 = vmul.f32 %v2914_v54, %v4893_v49  ;;  %v2916_v19 = vmul.f32 %v2914_v54, %v4883_v27 }
 0x40a   : > { %2778 = vrot.lane.b32.xlu1 %v2770_v21, %s3542_s6  ;;  %2776 = vrot.lane.b32.xlu0 %v2769_v4, %s3542_s6 }
 0x40b   : > { %v2508_v57 = vadd.f32 %v2505_v36, %v2469_v37  ;;  %v2509_v62 = vadd.f32 %v2506_v13, %v2470_v3  ;;  %v2643_v3 = vstv %s3360_s11 }
 0x40c   : > { %v2481_v12 = vpop.permute.xlu1 %2480  ;;  %v2465_v1 = vpop.permute.xlu0 %2464 }
 0x40d   : > { %v2489_v26 = vadd.f32 %v2481_v12, %v2429_v43  ;;  %v2471_v46 = vadd.f32 %v2465_v1, %v4965_v63  ;;  %v2514_v43 = vmul.f32 %v2512_v58, %v4740_v28  ;;  %v3003_v58 = vmul.f32 %v3001_v45, %v4937_v39 }
 0x40e   : > { %2990 = vrot.lane.b32.xlu1 %v2983_v6, %s3541_s27  ;;  %2988 = vrot.lane.b32.xlu0 %v2982_v56, %s3541_s27  ;;  %v3061_v1 = vstv %s3386_s12  ;;  %v2644_v6 = vmul.f32 %v2643_v3, %v4829_v31 }
 0x40f   : > { %v2510_v15 = vadd.f32 %v2507_v7, %v2471_v46  ;;  %v2516_v8 = vadd.f32 %v2513_v34, %v2489_v26  ;;  %v3062_v7 = vmul.f32 %v3061_v1, %v4923_v48  ;;  %v3004_v34 = vmul.f32 %v3001_v45, %v4935_v23 }
 0x410   : > { %v2485_v60 = vpop.permute.xlu1 %2484  ;;  %v2483_v11 = vpop.permute.xlu0 %2482 }
 0x411   : > { %v2491_v24 = vadd.f32 %v2485_v60, %v2431_v52  ;;  %v2490_v63 = vadd.f32 %v2483_v11, %v4971_v25  ;;  %v2854_v52 = vstv %s3374_s8  ;;  %v2645_v60 = vmul.f32 %v2643_v3, %v4827_v5 }
 0x412   : > { %3048 = vrot.lane.b32.xlu1 %v3042_v33, %s3542_s6  ;;  %2992 = vrot.lane.b32.xlu0 %v2984_v40, %s3541_s27  ;;  %v2856_v10 = vmul.f32 %v2854_v52, %v4883_v27  ;;  %v2855_v22 = vmul.f32 %v2854_v52, %v4885_v47  ;;  %v2857_v29 = vmul.f32 %v2854_v52, %v4893_v49 }
 0x413   : > { %v2517_v30 = vadd.f32 %v2514_v43, %v2490_v63  ;;  %v2518_v38 = vadd.f32 %v2515_v55, %v2491_v24  ;;  %v2646_v11 = vmul.f32 %v2643_v3, %v4845_v41  ;;  %v3064_v63 = vmul.f32 %v3061_v1, %v4935_v23 }
 0x414   : > { %v2530_v44 = vpop.permute.xlu1 %2529  ;;  %v2528_v53 = vpop.permute.xlu0 %2527  ;;  %v3063_v43 = vmul.f32 %v3061_v1, %v4937_v39 }
 0x415   : > { %v2536_v37 = vadd.f32 %v2528_v53, %v4981_v9  ;;  %v2537_v56 = vadd.f32 %v2530_v44, %v4990_v51  ;;  %v2651_v51 = vstv %s3361_s13  ;;  %v2659_v53 = vstv %s3362_s14 }
 0x416   : > { %3052 = vrot.lane.b32.xlu1 %v3044_v32, %s3542_s6  ;;  %3050 = vrot.lane.b32.xlu0 %v3043_v50, %s3542_s6  ;;  %v2653_v44 = vmul.f32 %v2651_v51, %v4827_v5 }
 0x418   : > { %v2548_v28 = vpop.permute.xlu1 %2547  ;;  %v2532_v25 = vpop.permute.xlu0 %2531 }
 0x419   : > { %v2556_v61 = vadd.f32 %v2548_v28, %v2508_v57  ;;  %v3002_v57 = vmul.f32 %v3001_v45, %v4923_v48  ;;  %v2538_v9 = vadd.f32 %v2532_v25, %v4992_v20 }
 0x41a   : > { %2863 = vrot.lane.b32.xlu1 %v2856_v10, %s3541_s27  ;;  %2861 = vrot.lane.b32.xlu0 %v2855_v22, %s3541_s27  ;;  %v2654_v22 = vmul.f32 %v2651_v51, %v4845_v41 }
 0x41c   : > { %v2552_v42 = vpop.permute.xlu1 %2551  ;;  %v2550_v17 = vpop.permute.xlu0 %2549 }
 0x41d   : > { %v2558_v18 = vadd.f32 %v2552_v42, %v2510_v15  ;;  %v2557_v0 = vadd.f32 %v2550_v17, %v2509_v62 }
 0x41e   : > { %2921 = vrot.lane.b32.xlu1 %v2915_v35, %s3542_s6  ;;  %2865 = vrot.lane.b32.xlu0 %v2857_v29, %s3541_s27 }
 0x420   : > { %v2570_v14 = vpop.permute.xlu1 %2569  ;;  %v2568_v16 = vpop.permute.xlu0 %2567 }
 0x421   : > { %v2577_v21 = vadd.f32 %v2570_v14, %v2517_v30  ;;  %v2576_v4 = vadd.f32 %v2568_v16, %v2516_v8  ;;  %v2661_v14 = vmul.f32 %v2659_v53, %v4827_v5  ;;  %v2662_v16 = vmul.f32 %v2659_v53, %v4845_v41 }
 0x422   : > { %2925 = vrot.lane.b32.xlu1 %v2917_v2, %s3542_s6  ;;  %2923 = vrot.lane.b32.xlu0 %v2916_v19, %s3542_s6 }
 0x424   : > { %v2588_v36 = vpop.permute.xlu1 %2587  ;;  %v2572_v13 = vpop.permute.xlu0 %2571 }
 0x425   : > { %v2596_v62 = vadd.f32 %v2588_v36, %v2536_v37  ;;  %v2578_v12 = vadd.f32 %v2572_v13, %v2518_v38  ;;  %v2652_v38 = vmul.f32 %v2651_v51, %v4829_v31 }
 0x426   : > { %3010 = vrot.lane.b32.xlu1 %v3003_v58, %s3541_s27  ;;  %3008 = vrot.lane.b32.xlu0 %v3002_v57, %s3541_s27 }
 0x427   : > { %v2647_v59 = vadd.f32 %v2644_v6, %v2596_v62 }
 0x428   : > { %v2592_v26 = vpop.permute.xlu1 %2591  ;;  %v2590_v46 = vpop.permute.xlu0 %2589 }
 0x429   : > { %v2598_v15 = vadd.f32 %v2592_v26, %v2538_v9  ;;  %v2597_v8 = vadd.f32 %v2590_v46, %v2537_v56 }
 0x42a   : > { %3068 = vrot.lane.b32.xlu1 %v3062_v7, %s3542_s6  ;;  %3012 = vrot.lane.b32.xlu0 %v3004_v34, %s3541_s27  ;;  %s3369_s27 = sld [smem:[#allocation8 + $0x15]] }
 0x42b   : > { %v2648_v33 = vadd.f32 %v2645_v60, %v2597_v8  ;;  %v2649_v20 = vadd.f32 %v2646_v11, %v2598_v15 }
 0x42c   : > { %v2610_v40 = vpop.permute.xlu1 %2609  ;;  %v2608_v24 = vpop.permute.xlu0 %2607 }
 0x42d   : > { %v2617_v55 = vadd.f32 %v2610_v40, %v2557_v0  ;;  %v2616_v30 = vadd.f32 %v2608_v24, %v2556_v61  ;;  %v2660_v61 = vmul.f32 %v2659_v53, %v4829_v31 }
 0x42e   : > { %3072 = vrot.lane.b32.xlu1 %v3064_v63, %s3542_s6  ;;  %3070 = vrot.lane.b32.xlu0 %v3063_v43, %s3542_s6  ;;  %s3378_s6 = sld [smem:[#allocation8 + $0x18]] }
 0x42f   : > { %v5050_v32 = vadd.f32 %v2652_v38, %v2616_v30  ;;  %v5052_v50 = vadd.f32 %v2653_v44, %v2617_v55 }
 0x430   : > { %v2628_v52 = vpop.permute.xlu1 %2627  ;;  %v2612_v28 = vpop.permute.xlu0 %2611  ;;  %v2790_v36 = vstv %s3369_s27 }
 0x431   : > { %v2636_v25 = vadd.f32 %v2628_v52, %v2576_v4  ;;  %v2618_v10 = vadd.f32 %v2612_v28, %v2558_v18  ;;  %v2791_v5 = vmul.f32 %v2790_v36, %v4885_v47  ;;  %v2792_v46 = vmul.f32 %v2790_v36, %v4883_v27 }
 0x432   : > { %v2793_v7 = vmul.f32 %v2790_v36, %v4893_v49  ;;  %v2798_v28 = vstv %s3370_s23 }
 0x433   : > { %v5056_v54 = vadd.f32 %v2654_v22, %v2618_v10  ;;  %v2663_v42 = vadd.f32 %v2660_v61, %v2636_v25 }
 0x434   : > { %v2632_v17 = vpop.permute.xlu1 %2631  ;;  %v2630_v35 = vpop.permute.xlu0 %2629  ;;  %v2937_v60 = vstv %s3378_s6 }
 0x435   : > { %v2638_v29 = vadd.f32 %v2632_v17, %v2578_v12  ;;  %v2637_v0 = vadd.f32 %v2630_v35, %v2577_v21  ;;  %v2940_v53 = vmul.f32 %v2937_v60, %v4935_v23  ;;  %v2939_v52 = vmul.f32 %v2937_v60, %v4937_v39 }
 0x437   : > { %v5060_v2 = vadd.f32 %v2661_v14, %v2637_v0  ;;  %v5062_v19 = vadd.f32 %v2662_v16, %v2638_v29  ;;  %v2799_v0 = vmul.f32 %v2798_v28, %v4885_v47  ;;  %v2800_v14 = vmul.f32 %v2798_v28, %v4883_v27 }
 0x438   : > { %v2677_v18 = vpop.permute.xlu1 %2676  ;;  %v2675_v4 = vpop.permute.xlu0 %2674 }
 0x439   : > { %v2683_v13 = vadd.f32 %v2675_v4, %v2647_v59  ;;  %v2684_v41 = vadd.f32 %v2677_v18, %v2648_v33 }
 0x43c   : > { %v2695_v45 = vpop.permute.xlu1 %2694  ;;  %v2679_v31 = vpop.permute.xlu0 %2678 }
 0x43d   : > { %v2685_v12 = vadd.f32 %v2679_v31, %v2649_v20  ;;  %v2938_v20 = vmul.f32 %v2937_v60, %v4923_v48  ;;  %v2703_v25 = vadd.f32 %v2695_v45, %v5050_v32  ;;  %v2801_v31 = vmul.f32 %v2798_v28, %v4893_v49 }
 0x43e   : > { %v2806_v28 = vstv %s3371_s22 }
 0x440   : > { %v2699_v3 = vpop.permute.xlu1 %2698  ;;  %v2697_v37 = vpop.permute.xlu0 %2696 }
 0x441   : > { %v2704_v10 = vadd.f32 %v2697_v37, %v5052_v50  ;;  %v2705_v16 = vadd.f32 %v2699_v3, %v5056_v54  ;;  %v3082_v3 = vld [vmem:[%s3701_s21 + $0x10] sm:$0xff] }
 0x444   : > { %v2735_v58 = vpop.permute.xlu1 %2734  ;;  %v2715_v57 = vpop.permute.xlu0 %2714 }
 0x445   : > { %v2743_v21 = vadd.f32 %v2735_v58, %v2683_v13  ;;  %v5064_v62 = vadd.f32 %v2715_v57, %v2663_v42 }
 0x447   : > { %v2794_v1 = vadd.f32 %v2791_v5, %v2743_v21  ;;  %v3081_v21 = vld [vmem:[%s3701_s21 + $0x8] sm:$0xff] }
 0x448   : > { %v2739_v6 = vpop.permute.xlu1 %2738  ;;  %v2737_v56 = vpop.permute.xlu0 %2736 }
 0x449   : > { %v2745_v9 = vadd.f32 %v2739_v6, %v2685_v12  ;;  %v2744_v26 = vadd.f32 %v2737_v56, %v2684_v41  ;;  %v3080_v41 = vld [vmem:[%s3701_s21] sm:$0xff] }
 0x44b   : > { %v2795_v59 = vadd.f32 %v2792_v46, %v2744_v26  ;;  %v2796_v34 = vadd.f32 %v2793_v7, %v2745_v9 }
 0x44c   : > { %v2824_v15 = vpop.permute.xlu1 %2823  ;;  %v2822_v8 = vpop.permute.xlu0 %2821 }
 0x44d   : > { %v2830_v11 = vadd.f32 %v2822_v8, %v2794_v1  ;;  %v2831_v24 = vadd.f32 %v2824_v15, %v2795_v59  ;;  %v2945_v8 = vstv %s3379_s15 }
 0x450   : > { %v2882_v51 = vpop.permute.xlu1 %2881  ;;  %v2826_v40 = vpop.permute.xlu0 %2825 }
 0x451   : > { %v2890_v33 = vadd.f32 %v2882_v51, %v2830_v11  ;;  %v2832_v63 = vadd.f32 %v2826_v40, %v2796_v34 }
 0x453   : > { %v2941_v43 = vadd.f32 %v2938_v20, %v2890_v33 }
 0x454   : > { %v2886_v55 = vpop.permute.xlu1 %2885  ;;  %v2884_v30 = vpop.permute.xlu0 %2883 }
 0x455   : > { %v2892_v38 = vadd.f32 %v2886_v55, %v2832_v63  ;;  %v2891_v44 = vadd.f32 %v2884_v30, %v2831_v24  ;;  %v2947_v24 = vmul.f32 %v2945_v8, %v4937_v39  ;;  %v2946_v63 = vmul.f32 %v2945_v8, %v4923_v48 }
 0x457   : > { %v2943_v22 = vadd.f32 %v2940_v53, %v2892_v38  ;;  %v2942_v61 = vadd.f32 %v2939_v52, %v2891_v44  ;;  %v2948_v52 = vmul.f32 %v2945_v8, %v4935_v23 }
 0x458   : > { %v2757_v42 = vpop.permute.xlu1 %2756  ;;  %v2755_v17 = vpop.permute.xlu0 %2754 }
 0x459   : > { %v2764_v35 = vadd.f32 %v2757_v42, %v2704_v10  ;;  %v2763_v29 = vadd.f32 %v2755_v17, %v2703_v25  ;;  %v2807_v42 = vmul.f32 %v2806_v28, %v4885_v47 }
 0x45b   : > { %v2802_v18 = vadd.f32 %v2799_v0, %v2763_v29  ;;  %v2803_v4 = vadd.f32 %v2800_v14, %v2764_v35 }
 0x45c   : > { %v2969_v32 = vpop.permute.xlu1 %2968  ;;  %v2759_v45 = vpop.permute.xlu0 %2758 }
 0x45d   : > { %v2765_v50 = vadd.f32 %v2759_v45, %v2705_v16  ;;  %v2977_v58 = vadd.f32 %v2969_v32, %v2941_v43  ;;  %v2809_v32 = vmul.f32 %v2806_v28, %v4893_v49 }
 0x45f   : > { %v2804_v37 = vadd.f32 %v2801_v31, %v2765_v50 }
 0x460   : > { %v2973_v36 = vpop.permute.xlu1 %2972  ;;  %v2971_v13 = vpop.permute.xlu0 %2970 }
 0x461   : > { %v2978_v57 = vadd.f32 %v2971_v13, %v2942_v61  ;;  %v2979_v6 = vadd.f32 %v2973_v36, %v2943_v22 }
 0x464   : > { %v3031_v5 = vpop.permute.xlu1 %3030  ;;  %v3029_v12 = vpop.permute.xlu0 %3028 }
 0x465   : > { %v3038_v1 = vadd.f32 %v3031_v5, %v2978_v57  ;;  %v3037_v54 = vadd.f32 %v3029_v12, %v2977_v58 }
 0x467   : > { %v3084_v56 = vadd.f32 %v3081_v21, %v3038_v1  ;;  %v3083_v9 = vadd.f32 %v3080_v41, %v3037_v54 }
 0x468   : > { %v2842_v26 = vpop.permute.xlu1 %2841  ;;  %v3033_v46 = vpop.permute.xlu0 %3032 }
 0x469   : > { %v3039_v7 = vadd.f32 %v3033_v46, %v2979_v6  ;;  %3087 = vst.msk [vmem:[%s5086_s20] sm:$0xff] %vm3086_vm3, %v3083_v9  ;;  %3088 = vst.msk [vmem:[%s5086_s20 + $0x8] sm:$0xff] %vm3086_vm3, %v3084_v56  ;;  %v2850_v60 = vadd.f32 %v2842_v26, %v2802_v18  ;;  %v2953_v56 = vstv %s3380_s17 }
 0x46b   : > { %v3085_v59 = vadd.f32 %v3082_v3, %v3039_v7 }
 0x46c   : > { %v2846_v34 = vpop.permute.xlu1 %2845  ;;  %v2844_v15 = vpop.permute.xlu0 %2843 }
 0x46d   : > { %3089 = vst.msk [vmem:[%s5086_s20 + $0x10] sm:$0xff] %vm3086_vm3, %v3085_v59  ;;  %v2851_v11 = vadd.f32 %v2844_v15, %v2803_v4  ;;  %v2852_v43 = vadd.f32 %v2846_v34, %v2804_v37  ;;  %v2808_v4 = vmul.f32 %v2806_v28, %v4883_v27  ;;  %v2954_v59 = vmul.f32 %v2953_v56, %v4923_v48 }
 0x470   : > { %v2904_v51 = vpop.permute.xlu1 %2903  ;;  %v2902_v40 = vpop.permute.xlu0 %2901 }
 0x471   : > { %v2911_v33 = vadd.f32 %v2904_v51, %v2851_v11  ;;  %v2910_v20 = vadd.f32 %v2902_v40, %v2850_v60 }
 0x473   : > { %v2950_v55 = vadd.f32 %v2947_v24, %v2911_v33  ;;  %v2949_v30 = vadd.f32 %v2946_v63, %v2910_v20  ;;  %v2955_v33 = vmul.f32 %v2953_v56, %v4937_v39  ;;  %v2956_v20 = vmul.f32 %v2953_v56, %v4935_v23 }
 0x474   : > { %v2717_v38 = vpop.permute.xlu1 %2716  ;;  %v2906_v44 = vpop.permute.xlu0 %2905  ;;  %v3387_v36 = vld [vmem:[%s3701_s21 + $0x18] sm:$0xff]  ;;  %v3389_v21 = vld [vmem:[%s3701_s21 + $0x28] sm:$0xff]  ;;  %v3388_v49 = vld [vmem:[%s3701_s21 + $0x20] sm:$0xff] }
 0x475   : > { %v2912_v53 = vadd.f32 %v2906_v44, %v2852_v43  ;;  %v2724_v17 = vadd.f32 %v2717_v38, %v5060_v2 }
 0x477   : > { %v2951_v25 = vadd.f32 %v2948_v52, %v2912_v53 }
 0x478   : > { %v2775_v10 = vpop.permute.xlu1 %2774  ;;  %v2719_v22 = vpop.permute.xlu0 %2718 }
 0x479   : > { %v2783_v61 = vadd.f32 %v2775_v10, %v5064_v62  ;;  %v2725_v35 = vadd.f32 %v2719_v22, %v5062_v19 }
 0x47b   : > { %v2810_v29 = vadd.f32 %v2807_v42, %v2783_v61 }
 0x47c   : > { %v2779_v0 = vpop.permute.xlu1 %2778  ;;  %v2777_v14 = vpop.permute.xlu0 %2776 }
 0x47d   : > { %v2785_v16 = vadd.f32 %v2779_v0, %v2725_v35  ;;  %v2784_v18 = vadd.f32 %v2777_v14, %v2724_v17 }
 0x47f   : > { %v2811_v45 = vadd.f32 %v2808_v4, %v2784_v18  ;;  %v2812_v62 = vadd.f32 %v2809_v32, %v2785_v16 }
 0x480   : > { %v2991_v50 = vpop.permute.xlu1 %2990  ;;  %v2989_v47 = vpop.permute.xlu0 %2988 }
 0x481   : > { %v2997_v2 = vadd.f32 %v2989_v47, %v2949_v30  ;;  %v2998_v13 = vadd.f32 %v2991_v50, %v2950_v55 }
 0x484   : > { %v3049_v31 = vpop.permute.xlu1 %3048  ;;  %v2993_v19 = vpop.permute.xlu0 %2992 }
 0x485   : > { %v3057_v37 = vadd.f32 %v3049_v31, %v2997_v2  ;;  %v2999_v27 = vadd.f32 %v2993_v19, %v2951_v25 }
 0x487   : > { %v3094_v58 = vadd.f32 %v3387_v36, %v3057_v37 }
 0x488   : > { %v3053_v57 = vpop.permute.xlu1 %3052  ;;  %v3051_v5 = vpop.permute.xlu0 %3050 }
 0x489   : > { %v3059_v41 = vadd.f32 %v3053_v57, %v2999_v27  ;;  %v3058_v12 = vadd.f32 %v3051_v5, %v2998_v13  ;;  %3390 = vst.msk [vmem:[%s5086_s20 + $0x18] sm:$0xff] %vm3086_vm3, %v3094_v58 }
 0x48b   : > { %v3096_v1 = vadd.f32 %v3389_v21, %v3059_v41  ;;  %v3095_v54 = vadd.f32 %v3388_v49, %v3058_v12 }
 0x48c   : > { %v2864_v3 = vpop.permute.xlu1 %2863  ;;  %v2862_v6 = vpop.permute.xlu0 %2861 }
 0x48d   : > { %3391 = vst.msk [vmem:[%s5086_s20 + $0x20] sm:$0xff] %vm3086_vm3, %v3095_v54  ;;  %3392 = vst.msk [vmem:[%s5086_s20 + $0x28] sm:$0xff] %vm3086_vm3, %v3096_v1  ;;  %v2870_v9 = vadd.f32 %v2862_v6, %v2810_v29  ;;  %v2871_v34 = vadd.f32 %v2864_v3, %v2811_v45 }
 0x490   : > { %v2922_v26 = vpop.permute.xlu1 %2921  ;;  %v2866_v46 = vpop.permute.xlu0 %2865 }
 0x491   : > { %v2930_v7 = vadd.f32 %v2922_v26, %v2870_v9  ;;  %v2872_v15 = vadd.f32 %v2866_v46, %v2812_v62 }
 0x493   : > { %v2957_v8 = vadd.f32 %v2954_v59, %v2930_v7 }
 0x494   : > { %v2926_v60 = vpop.permute.xlu1 %2925  ;;  %v2924_v11 = vpop.permute.xlu0 %2923  ;;  %v3393_v53 = vld [vmem:[%s3701_s21 + $0x30] sm:$0xff]  ;;  %v3395_v39 = vld [vmem:[%s3701_s21 + $0x40] sm:$0xff]  ;;  %v3394_v22 = vld [vmem:[%s3701_s21 + $0x38] sm:$0xff] }
 0x495   : > { %v2932_v51 = vadd.f32 %v2926_v60, %v2872_v15  ;;  %v2931_v40 = vadd.f32 %v2924_v11, %v2871_v34 }
 0x497   : > { %v2958_v24 = vadd.f32 %v2955_v33, %v2931_v40  ;;  %v2959_v63 = vadd.f32 %v2956_v20, %v2932_v51 }
 0x498   : > { %v3011_v43 = vpop.permute.xlu1 %3010  ;;  %v3009_v55 = vpop.permute.xlu0 %3008 }
 0x499   : > { %v3017_v48 = vadd.f32 %v3009_v55, %v2957_v8  ;;  %v3018_v52 = vadd.f32 %v3011_v43, %v2958_v24 }
 0x49c   : > { %v3069_v30 = vpop.permute.xlu1 %3068  ;;  %v3013_v38 = vpop.permute.xlu0 %3012 }
 0x49d   : > { %v3077_v44 = vadd.f32 %v3069_v30, %v3017_v48  ;;  %v3019_v25 = vadd.f32 %v3013_v38, %v2959_v63 }
 0x49f   : > { %v3105_v28 = vadd.f32 %v3393_v53, %v3077_v44 }
 0x4a0   : > { %v3073_v10 = vpop.permute.xlu1 %3072  ;;  %v3071_v61 = vpop.permute.xlu0 %3070 }
 0x4a1   : > { %v3079_v23 = vadd.f32 %v3073_v10, %v3019_v25  ;;  %3396 = vst.msk [vmem:[%s5086_s20 + $0x30] sm:$0xff] %vm3086_vm3, %v3105_v28  ;;  %v3078_v42 = vadd.f32 %v3071_v61, %v3018_v52 }
 0x4a3   : > { %v3107_v17 = vadd.f32 %v3395_v39, %v3079_v23  ;;  %v3106_v35 = vadd.f32 %v3394_v22, %v3078_v42 }
 0x4a5   : > { %3398 = vst.msk [vmem:[%s5086_s20 + $0x40] sm:$0xff] %vm3086_vm3, %v3107_v17  ;;  %3397 = vst.msk [vmem:[%s5086_s20 + $0x38] sm:$0xff] %vm3086_vm3, %v3106_v35 }
 0x4a6 PF: > { %s18_s18 = sadd.s32 1, %s3533_s18  }
 0x4a7   : > { %p15_p2 = scmp.ge.s32.totalorder %s18_s18, 4  }
 0x4a9   :  { %17 = sbr.rel (!%p15_p2) target bundleno = 3 (0x3), region = 95 }
 0x4ae   :  { %3133 = vsyncpa [#allocation5], 1 }
 0x4af   :  { %3135 = vsyncpa [#allocation5 + $0x1], 1 }
 0x4b0   :  { %3136 = vsyncpa [#allocation7], 1 }
 0x4b1   :  { %3137 = vsyncpa [#allocation10], 1 }

</bundles_post_ra>
